<compile_context>
chip_gen: v7x
topology: tpu7x:2x2x1
jax: 0.10.0
libtpu: 0.0.40
codegen_flags: <defaults>
</compile_context>

<pallas_src>
import functools
import numpy as np
import jax
import jax.numpy as jnp
from jax import lax
from jax.experimental import pallas as pl
from jax.experimental.pallas import tpu as pltpu

# ----------------------------- configuration --------------------------------
BATCH = 2
SEQ = 8
HIDDEN = 312            # matches the hard-coded 312 in the PyTorch module
NUM_HEADS = 4
HEAD_DIM = HIDDEN // NUM_HEADS   # 78
INTER = 624             # FFN intermediate size
NUM_LAYERS = 2
VOCAB = 128
MAX_POS = 16
NUM_LABELS = 9          # len(LABEL_ENCODE)
D_IN = 2 * HIDDEN       # 624 == 1 * 312 * 2

# padded, lane-aligned sizes used inside the kernel
HP = 384                # HIDDEN   312 -> 3*128
DP = 128                # HEAD_DIM  78 -> 128 (padded K/V columns are zero)
QKVP = NUM_HEADS * DP   # 512
QKV3 = 3 * QKVP         # 1536 (fused QKV width)
IP = 640                # INTER    624 -> 5*128

NB = 2 * BATCH          # fused Siamese batch
ROWS = NB * SEQ         # 32 flattened (batch*seq) rows
SROWS = NUM_HEADS * ROWS  # 128 stacked per-head score rows

# rows of the packed per-layer f32 "small" slab (width QKV3)
_R_BQKV, _R_BO, _R_B1, _R_B2, _R_G1, _R_BE1, _R_G2, _R_BE2 = range(8)


# ----------------------------- small math helpers ---------------------------
def _gelu(x):
    # tanh-approx GELU in f32 (EUP path; v5e has no bf16 VPU/EUP).
    # TODO(synk): HF BERT uses erf-GELU; tanh approximation deviates slightly.
    return 0.5 * x * (1.0 + jnp.tanh(0.7978845608028654 * (x + 0.044715 * x * x * x)))


# ----------------------------- fused Pallas kernel ---------------------------
def fused_bert_kernel(x_ref, bias_ref, misc_ref, wqkv_ref, wo_ref, w1_ref,
                      w2_ref, small_ref, o_ref, ctx_ref, sc_ref):
    """One encoder layer per grid step; hidden state carried in resident o_ref."""
    l = pl.program_id(0)

    misc = misc_ref[...]                       # (8, HP) f32
    hmask = misc[0:1, :]                       # 1.0 on the 312 real columns
    inv_h = 1.0 / float(HIDDEN)

    def layernorm(v, g, b):
        mu = jnp.sum(v * hmask, axis=-1, keepdims=True) * inv_h
        d = (v - mu) * hmask
        var = jnp.sum(d * d, axis=-1, keepdims=True) * inv_h
        return d * lax.rsqrt(var + 1e-12) * g + b

    @pl.when(l == 0)
    def _():
        # embedding LayerNorm; o_ref doubles as the carried hidden state
        o_ref[...] = layernorm(x_ref[...], misc[1:2, :], misc[2:3, :])

    x = o_ref[...]                             # (ROWS, HP) f32
    x_bf = x.astype(jnp.bfloat16)

    small = small_ref[...]                     # (8, QKV3) f32 packed per-layer
    bqkv = small[_R_BQKV:_R_BQKV + 1, :]
    bo = small[_R_BO:_R_BO + 1, :HP]
    b1 = small[_R_B1:_R_B1 + 1, :IP]
    b2 = small[_R_B2:_R_B2 + 1, :HP]
    g1 = small[_R_G1:_R_G1 + 1, :HP]
    be1 = small[_R_BE1:_R_BE1 + 1, :HP]
    g2 = small[_R_G2:_R_G2 + 1, :HP]
    be2 = small[_R_BE2:_R_BE2 + 1, :HP]

    # fused QKV projection: one MXU pass, one bf16 cast of the activations
    qkv = jnp.dot(x_bf, wqkv_ref[...], preferred_element_type=jnp.float32) + bqkv
    qkv_bf = qkv.astype(jnp.bfloat16)          # single cast feeding q/k/v
    q = qkv_bf[:, 0:QKVP]
    k = qkv_bf[:, QKVP:2 * QKVP]
    v = qkv_bf[:, 2 * QKVP:QKV3]

    # Scores per head over the whole fused 32-row batch; cross-batch entries
    # are killed by the precomputed block-diagonal bias, so 4 matmuls replace
    # the old 16 per-(batch, head) ones.  Each dot_general contracts k on
    # dim 1; with only NUM_HEADS of them per layer the one-shot explicit kT
    # transpose buys nothing measurable, so it was skipped for robustness.
    for h in range(NUM_HEADS):
        c0 = h * DP
        sc_ref[h * ROWS:(h + 1) * ROWS, :] = lax.dot_general(
            q[:, c0:c0 + DP], k[:, c0:c0 + DP],
            (((1,), (1,)), ((), ())), preferred_element_type=jnp.float32)

    # ONE batched softmax over all NUM_HEADS*ROWS stacked score rows (f32)
    s = sc_ref[...] + bias_ref[...]            # (SROWS, ROWS)
    s = s - jnp.max(s, axis=-1, keepdims=True)
    e = jnp.exp(s)
    denom = jnp.sum(e, axis=-1, keepdims=True)
    p = (e * pl.reciprocal(denom, approx=False)).astype(jnp.bfloat16)

    # per-head context, stored straight into a bf16 VMEM scratch (no concats)
    for h in range(NUM_HEADS):
        c0 = h * DP
        ctx_ref[:, c0:c0 + DP] = jnp.dot(
            p[h * ROWS:(h + 1) * ROWS, :], v[:, c0:c0 + DP],
            preferred_element_type=jnp.float32).astype(jnp.bfloat16)

    attn = jnp.dot(ctx_ref[...], wo_ref[...],
                   preferred_element_type=jnp.float32) + bo
    h1 = layernorm(x + attn, g1, be1)

    ff = _gelu(jnp.dot(h1.astype(jnp.bfloat16), w1_ref[...],
                       preferred_element_type=jnp.float32) + b1)
    out2 = jnp.dot(ff.astype(jnp.bfloat16), w2_ref[...],
                   preferred_element_type=jnp.float32) + b2
    o_ref[...] = layernorm(h1 + out2, g2, be2)


# ----------------------------- model ----------------------------------------
def bert_classifier_forward(params, ids_l, mask_l, ids_r, mask_r):
    B, S = ids_l.shape
    assert (B, S) == (BATCH, SEQ)

    # Siamese fusion: stack left/right into one batch of 2*B
    ids = jnp.concatenate([ids_l, ids_r], axis=0)                    # (NB, S)
    mask = jnp.concatenate([mask_l, mask_r], axis=0).astype(jnp.float32)

    # Embedding gather/sum is XLA glue; everything downstream is Pallas.
    emb = (jnp.take(params['word_emb'], ids, axis=0)
           + params['pos_emb'][None, :S, :]
           + params['type_emb'][0][None, None, :])                   # (NB, S, HP)
    x = emb.reshape(ROWS, HP)

    # Additive attention bias over the fused 32-key axis:
    # 0 where key is in the same batch element AND unmasked, -1e9 otherwise;
    # tiled over heads so the kernel adds it once to the stacked score slab.
    batch_idx = jnp.repeat(jnp.arange(NB), SEQ)                       # (ROWS,)
    same = (batch_idx[:, None] == batch_idx[None, :]).astype(jnp.float32)
    key_ok = mask.reshape(1, ROWS)
    bias32 = (same * key_ok - 1.0) * 1e9                              # (ROWS, ROWS)
    mask_bias = jnp.tile(bias32, (NUM_HEADS, 1))                      # (SROWS, ROWS)

    h = pl.pallas_call(
        fused_bert_kernel,
        out_shape=jax.ShapeDtypeStruct((ROWS, HP), jnp.float32),
        grid_spec=pltpu.PrefetchScalarGridSpec(
            num_scalar_prefetch=0,
            grid=(NUM_LAYERS,),
            in_specs=[
                pl.BlockSpec((ROWS, HP), lambda l: (0, 0)),            # embeddings
                pl.BlockSpec((SROWS, ROWS), lambda l: (0, 0)),         # attn bias
                pl.BlockSpec((8, HP), lambda l: (0, 0)),               # hmask/emb LN
                pl.BlockSpec((None, HP, QKV3), lambda l: (l, 0, 0)),   # Wqkv
                pl.BlockSpec((None, QKVP, HP), lambda l: (l, 0, 0)),   # Wo
                pl.BlockSpec((None, HP, IP), lambda l: (l, 0, 0)),     # W1
                pl.BlockSpec((None, IP, HP), lambda l: (l, 0, 0)),     # W2
                pl.BlockSpec((None, 8, QKV3), lambda l: (l, 0, 0)),    # packed small
            ],
            out_specs=pl.BlockSpec((ROWS, HP), lambda l: (0, 0)),
            scratch_shapes=[
                pltpu.VMEM((ROWS, QKVP), jnp.bfloat16),                # ctx
                pltpu.VMEM((SROWS, ROWS), jnp.float32),                # stacked scores
            ]),
        compiler_params=pltpu.CompilerParams(
            dimension_semantics=("arbitrary",),
            vmem_limit_bytes=32 * 1024 * 1024),
    )(x, mask_bias, params['misc'], params['wqkv'], params['wo'],
      params['w1'], params['w2'], params['small'])

    # CLS concat + tiny classifier in plain jnp (cheaper than a launch)
    h = h.reshape(NB, S, HP)
    cls_cat = jnp.concatenate([h[:BATCH, 0, :HIDDEN], h[BATCH:, 0, :HIDDEN]], axis=1)
    logits = (jnp.dot(cls_cat, params['cls_w'],
                      preferred_element_type=jnp.float32) + params['cls_b'])
    return logits                                                    # (B, 9)


# ----------------------------- pure-JAX reference ----------------------------
def reference_forward(params, ids_l, mask_l, ids_r, mask_r):
    ids = jnp.concatenate([ids_l, ids_r], axis=0)
    mask = jnp.concatenate([mask_l, mask_r], axis=0).astype(jnp.float32)
    emb = (jnp.take(params['word_emb'], ids, axis=0)
           + params['pos_emb'][None, :SEQ, :]
           + params['type_emb'][0][None, None, :])
    x = emb.reshape(ROWS, HP)
    key_bias = (1.0 - mask) * (-1e9)                                 # (NB, SEQ)

    misc = params['misc']
    hmask = misc[0:1, :]
    inv_h = 1.0 / float(HIDDEN)

    def ln(v, g, b):
        mu = jnp.sum(v * hmask, -1, keepdims=True) * inv_h
        d = (v - mu) * hmask
        var = jnp.sum(d * d, -1, keepdims=True) * inv_h
        return d * lax.rsqrt(var + 1e-12) * g + b

    x = ln(x, misc[1:2, :], misc[2:3, :])
    for l in range(NUM_LAYERS):
        small = params['small'][l]
        qkv = jnp.dot(x.astype(jnp.bfloat16), params['wqkv'][l],
                      preferred_element_type=jnp.float32) + small[_R_BQKV:_R_BQKV + 1, :]
        q = qkv[:, :QKVP].reshape(NB, SEQ, NUM_HEADS, DP)
        k = qkv[:, QKVP:2 * QKVP].reshape(NB, SEQ, NUM_HEADS, DP)
        v = qkv[:, 2 * QKVP:].reshape(NB, SEQ, NUM_HEADS, DP)
        s = jnp.einsum('bqhd,bkhd->bhqk', q.astype(jnp.bfloat16),
                       k.astype(jnp.bfloat16), preferred_element_type=jnp.float32)
        s = s + key_bias[:, None, None, :]
        p = jax.nn.softmax(s, axis=-1)
        ctx = jnp.einsum('bhqk,bkhd->bqhd', p.astype(jnp.bfloat16),
                         v.astype(jnp.bfloat16),
                         preferred_element_type=jnp.float32).reshape(ROWS, QKVP)
        attn = jnp.dot(ctx.astype(jnp.bfloat16), params['wo'][l],
                       preferred_element_type=jnp.float32) + small[_R_BO:_R_BO + 1, :HP]
        h1 = ln(x + attn, small[_R_G1:_R_G1 + 1, :HP], small[_R_BE1:_R_BE1 + 1, :HP])
        ff = _gelu(jnp.dot(h1.astype(jnp.bfloat16), params['w1'][l],
                           preferred_element_type=jnp.float32) + small[_R_B1:_R_B1 + 1, :IP])
        out2 = jnp.dot(ff.astype(jnp.bfloat16), params['w2'][l],
                       preferred_element_type=jnp.float32) + small[_R_B2:_R_B2 + 1, :HP]
        x = ln(h1 + out2, small[_R_G2:_R_G2 + 1, :HP], small[_R_BE2:_R_BE2 + 1, :HP])

    h = x.reshape(NB, SEQ, HP)
    cls_cat = jnp.concatenate([h[:BATCH, 0, :HIDDEN], h[BATCH:, 0, :HIDDEN]], axis=1)
    return jnp.dot(cls_cat, params['cls_w'],
                   preferred_element_type=jnp.float32) + params['cls_b']


# ----------------------------- deterministic init ---------------------------
def init_params(key):
    std = 0.02
    keys = iter(jax.random.split(key, 8 + 16 * NUM_LAYERS))

    def rnd(shape, s=std):
        return (s * jax.random.normal(next(keys), shape)).astype(jnp.float32)

    def pad2(a, rows, cols):
        return jnp.zeros((rows, cols), jnp.float32).at[:a.shape[0], :a.shape[1]].set(a)

    def pad1(v, n):
        return jnp.zeros((n,), jnp.float32).at[:v.shape[0]].set(v)

    def head_cols(a):       # (HIDDEN, HIDDEN) -> (HP, QKVP), head-blocked columns
        out = jnp.zeros((HP, QKVP), jnp.float32)
        for h in range(NUM_HEADS):
            out = out.at[:HIDDEN, h * DP:h * DP + HEAD_DIM].set(
                a[:, h * HEAD_DIM:(h + 1) * HEAD_DIM])
        return out

    def head_rows(a):       # (HIDDEN, HIDDEN) -> (QKVP, HP), head-blocked rows
        out = jnp.zeros((QKVP, HP), jnp.float32)
        for h in range(NUM_HEADS):
            out = out.at[h * DP:h * DP + HEAD_DIM, :HIDDEN].set(
                a[h * HEAD_DIM:(h + 1) * HEAD_DIM, :])
        return out

    def head_vec(v):        # (HIDDEN,) -> (QKVP,), head-blocked
        out = jnp.zeros((QKVP,), jnp.float32)
        for h in range(NUM_HEADS):
            out = out.at[h * DP:h * DP + HEAD_DIM].set(
                v[h * HEAD_DIM:(h + 1) * HEAD_DIM])
        return out

    emb_g = 1.0 + rnd((HIDDEN,), 0.1)
    emb_b = rnd((HIDDEN,))
    misc = (jnp.zeros((8, HP), jnp.float32)
            .at[0, :HIDDEN].set(1.0)            # hmask
            .at[1, :HIDDEN].set(emb_g)          # embedding LN gamma
            .at[2, :HIDDEN].set(emb_b))         # embedding LN beta

    wqkv_l, wo_l, w1_l, w2_l, small_l = [], [], [], [], []
    scale = 1.0 / float(np.sqrt(HEAD_DIM))
    for _ in range(NUM_LAYERS):
        wq = head_cols(rnd((HIDDEN, HIDDEN)) * scale)   # 1/sqrt(dh) folded into Wq
        wk = head_cols(rnd((HIDDEN, HIDDEN)))
        wv = head_cols(rnd((HIDDEN, HIDDEN)))
        wqkv_l.append(jnp.concatenate([wq, wk, wv], axis=1))          # (HP, QKV3)
        wo_l.append(head_rows(rnd((HIDDEN, HIDDEN))))
        w1_l.append(pad2(rnd((HIDDEN, INTER)), HP, IP))
        w2_l.append(pad2(rnd((INTER, HIDDEN)), IP, HP))

        bq = head_vec(rnd((HIDDEN,)) * scale)                          # scale folded
        bk = head_vec(rnd((HIDDEN,)))
        bv = head_vec(rnd((HIDDEN,)))
        small = jnp.zeros((8, QKV3), jnp.float32)
        small = small.at[_R_BQKV, :].set(jnp.concatenate([bq, bk, bv]))
        small = small.at[_R_BO, :HP].set(pad1(rnd((HIDDEN,)), HP))
        small = small.at[_R_B1, :IP].set(pad1(rnd((INTER,)), IP))
        small = small.at[_R_B2, :HP].set(pad1(rnd((HIDDEN,)), HP))
        small = small.at[_R_G1, :HP].set(pad1(1.0 + rnd((HIDDEN,), 0.1), HP))
        small = small.at[_R_BE1, :HP].set(pad1(rnd((HIDDEN,)), HP))
        small = small.at[_R_G2, :HP].set(pad1(1.0 + rnd((HIDDEN,), 0.1), HP))
        small = small.at[_R_BE2, :HP].set(pad1(rnd((HIDDEN,)), HP))
        small_l.append(small)

    params = {
        'word_emb': pad2(rnd((VOCAB, HIDDEN)), VOCAB, HP),
        'pos_emb': pad2(rnd((MAX_POS, HIDDEN)), MAX_POS, HP),
        'type_emb': pad2(rnd((2, HIDDEN)), 2, HP),
        'misc': misc,
        'wqkv': jnp.stack(wqkv_l).astype(jnp.bfloat16),   # (L, HP, QKV3)
        'wo': jnp.stack(wo_l).astype(jnp.bfloat16),       # (L, QKVP, HP)
        'w1': jnp.stack(w1_l).astype(jnp.bfloat16),       # (L, HP, IP)
        'w2': jnp.stack(w2_l).astype(jnp.bfloat16),       # (L, IP, HP)
        'small': jnp.stack(small_l),                      # (L, 8, QKV3) f32
        'cls_w': rnd((D_IN, NUM_LABELS)),                 # classifier stays f32 glue
        'cls_b': rnd((NUM_LABELS,)),
    }
    return params


# ----------------------------- main ------------------------------------------
if __name__ == "__main__":
    root = jax.random.PRNGKey(0)
    k_param, k_idl, k_idr = jax.random.split(root, 3)

    params = init_params(k_param)

    input_ids_left = jax.random.randint(k_idl, (BATCH, SEQ), 0, VOCAB, dtype=jnp.int32)
    input_ids_right = jax.random.randint(k_idr, (BATCH, SEQ), 0, VOCAB, dtype=jnp.int32)
    attention_mask_left = jnp.ones((BATCH, SEQ), jnp.float32)
    # make the right mask non-trivial (last two tokens of batch element 1 padded)
    attention_mask_right = jnp.ones((BATCH, SEQ), jnp.float32).at[1, SEQ - 2:].set(0.0)

    fwd = jax.jit(functools.partial(bert_classifier_forward, params))
    logits = jax.block_until_ready(fwd(input_ids_left, attention_mask_left,
                                       input_ids_right, attention_mask_right))

    assert logits.shape == (BATCH, NUM_LABELS), logits.shape
    assert logits.dtype == jnp.float32
    assert bool(jnp.all(jnp.isfinite(logits)))

    ref = jax.jit(functools.partial(reference_forward, params))(
        input_ids_left, attention_mask_left, input_ids_right, attention_mask_right)
    ref = jax.block_until_ready(ref)
    assert bool(jnp.allclose(logits, ref, rtol=5e-2, atol=5e-2)), (
        np.asarray(logits), np.asarray(ref))

    print("KERNEL_OK")
</pallas_src>

<mosaic_0001>
module attributes {stable_mosaic.version = 11 : i64} {
  func.func @fused_bert_kernel(%arg0: i32, %arg1: memref<32x384xf32, #tpu.memory_space<vmem>>, %arg2: memref<128x32xf32, #tpu.memory_space<vmem>>, %arg3: memref<8x384xf32, #tpu.memory_space<vmem>>, %arg4: memref<1x384x1536xbf16, #tpu.memory_space<vmem>>, %arg5: memref<1x512x384xbf16, #tpu.memory_space<vmem>>, %arg6: memref<1x384x640xbf16, #tpu.memory_space<vmem>>, %arg7: memref<1x640x384xbf16, #tpu.memory_space<vmem>>, %arg8: memref<1x8x1536xf32, #tpu.memory_space<vmem>>, %arg9: memref<32x384xf32, #tpu.memory_space<vmem>>, %arg10: memref<32x512xbf16, #tpu.memory_space<vmem>>, %arg11: memref<128x32xf32, #tpu.memory_space<vmem>>) attributes {dimension_semantics = [#tpu.dimension_semantics<arbitrary>], iteration_bounds = array<i64: 2>, scalar_prefetch = 0 : i64, scratch_operands = 2 : i64, tpu.core_type = #tpu.core_type<tc>, window_params = [{pipeline_mode = #tpu.pipeline_mode<synchronous>, transform_indices = @transform_0, window_bounds = array<i64: 32, 384>}, {pipeline_mode = #tpu.pipeline_mode<synchronous>, transform_indices = @transform_1, window_bounds = array<i64: 128, 32>}, {pipeline_mode = #tpu.pipeline_mode<synchronous>, transform_indices = @transform_2, window_bounds = array<i64: 8, 384>}, {transform_indices = @transform_3, window_bounds = array<i64: 1, 384, 1536>}, {transform_indices = @transform_4, window_bounds = array<i64: 1, 512, 384>}, {transform_indices = @transform_5, window_bounds = array<i64: 1, 384, 640>}, {transform_indices = @transform_6, window_bounds = array<i64: 1, 640, 384>}, {transform_indices = @transform_7, window_bounds = array<i64: 1, 8, 1536>}, {pipeline_mode = #tpu.pipeline_mode<synchronous>, transform_indices = @transform_8, window_bounds = array<i64: 32, 384>}]} {
    %c0 = arith.constant 0 : index
    %c0_0 = arith.constant 0 : index
    %0 = vector.load %arg3[%c0, %c0_0] : memref<8x384xf32, #tpu.memory_space<vmem>>, vector<8x384xf32>
    %1 = vector.extract_strided_slice %0 {offsets = [0, 0], sizes = [1, 384], strides = [1, 1]} : vector<8x384xf32> to vector<1x384xf32>
    %c0_i32 = arith.constant 0 : i32
    %2 = arith.cmpi eq, %arg0, %c0_i32 : i32
    %3 = arith.extui %2 : i1 to i32
    %c0_i32_1 = arith.constant 0 : i32
    %4 = arith.cmpi ne, %3, %c0_i32_1 : i32
    scf.if %4 {
      %c0_64 = arith.constant 0 : index
      %c0_65 = arith.constant 0 : index
      %158 = vector.load %arg1[%c0_64, %c0_65] : memref<32x384xf32, #tpu.memory_space<vmem>>, vector<32x384xf32>
      %159 = vector.extract_strided_slice %0 {offsets = [1, 0], sizes = [1, 384], strides = [1, 1]} : vector<8x384xf32> to vector<1x384xf32>
      %160 = vector.extract_strided_slice %0 {offsets = [2, 0], sizes = [1, 384], strides = [1, 1]} : vector<8x384xf32> to vector<1x384xf32>
      %161 = vector.broadcast %1 : vector<1x384xf32> to vector<32x384xf32>
      %162 = arith.mulf %158, %161 : vector<32x384xf32>
      %cst_66 = arith.constant dense<0.000000e+00> : vector<32xf32>
      %163 = vector.multi_reduction <add>, %162, %cst_66 [1] : vector<32x384xf32> to vector<32xf32>
      %164 = vector.shape_cast %163 : vector<32xf32> to vector<32x1xf32>
      %cst_67 = arith.constant 0.00320512825 : f32
      %165 = vector.broadcast %cst_67 : f32 to vector<32x1xf32>
      %166 = arith.mulf %164, %165 : vector<32x1xf32>
      %167 = vector.broadcast %166 : vector<32x1xf32> to vector<32x384xf32>
      %168 = arith.subf %158, %167 : vector<32x384xf32>
      %169 = vector.broadcast %1 : vector<1x384xf32> to vector<32x384xf32>
      %170 = arith.mulf %168, %169 : vector<32x384xf32>
      %171 = arith.mulf %170, %170 : vector<32x384xf32>
      %cst_68 = arith.constant dense<0.000000e+00> : vector<32xf32>
      %172 = vector.multi_reduction <add>, %171, %cst_68 [1] : vector<32x384xf32> to vector<32xf32>
      %173 = vector.shape_cast %172 : vector<32xf32> to vector<32x1xf32>
      %cst_69 = arith.constant 0.00320512825 : f32
      %174 = vector.broadcast %cst_69 : f32 to vector<32x1xf32>
      %175 = arith.mulf %173, %174 : vector<32x1xf32>
      %cst_70 = arith.constant 9.99999996E-13 : f32
      %176 = vector.broadcast %cst_70 : f32 to vector<32x1xf32>
      %177 = arith.addf %175, %176 : vector<32x1xf32>
      %178 = math.rsqrt %177 : vector<32x1xf32>
      %179 = vector.broadcast %178 : vector<32x1xf32> to vector<32x384xf32>
      %180 = arith.mulf %170, %179 : vector<32x384xf32>
      %181 = vector.broadcast %159 : vector<1x384xf32> to vector<32x384xf32>
      %182 = arith.mulf %180, %181 : vector<32x384xf32>
      %183 = vector.broadcast %160 : vector<1x384xf32> to vector<32x384xf32>
      %184 = arith.addf %182, %183 : vector<32x384xf32>
      %c0_71 = arith.constant 0 : index
      %c0_72 = arith.constant 0 : index
      %185 = vector.load %arg9[%c0_71, %c0_72] : memref<32x384xf32, #tpu.memory_space<vmem>>, vector<32x384xf32>
      tpu.vector_store %arg9[%c0_71, %c0_72], %184 {strides = array<i32>} : memref<32x384xf32, #tpu.memory_space<vmem>>, vector<32x384xf32>,
    } else {
    }
    %c0_2 = arith.constant 0 : index
    %c0_3 = arith.constant 0 : index
    %5 = vector.load %arg9[%c0_2, %c0_3] : memref<32x384xf32, #tpu.memory_space<vmem>>, vector<32x384xf32>
    %6 = arith.truncf %5 : vector<32x384xf32> to vector<32x384xbf16>
    %c0_4 = arith.constant 0 : index
    %c0_5 = arith.constant 0 : index
    %c0_6 = arith.constant 0 : index
    %7 = vector.load %arg8[%c0_4, %c0_5, %c0_6] : memref<1x8x1536xf32, #tpu.memory_space<vmem>>, vector<1x8x1536xf32>
    %8 = vector.shape_cast %7 : vector<1x8x1536xf32> to vector<8x1536xf32>
    %9 = vector.extract_strided_slice %8 {offsets = [0, 0], sizes = [1, 1536], strides = [1, 1]} : vector<8x1536xf32> to vector<1x1536xf32>
    %10 = vector.extract_strided_slice %8 {offsets = [1, 0], sizes = [1, 384], strides = [1, 1]} : vector<8x1536xf32> to vector<1x384xf32>
    %11 = vector.extract_strided_slice %8 {offsets = [2, 0], sizes = [1, 640], strides = [1, 1]} : vector<8x1536xf32> to vector<1x640xf32>
    %12 = vector.extract_strided_slice %8 {offsets = [3, 0], sizes = [1, 384], strides = [1, 1]} : vector<8x1536xf32> to vector<1x384xf32>
    %13 = vector.extract_strided_slice %8 {offsets = [4, 0], sizes = [1, 384], strides = [1, 1]} : vector<8x1536xf32> to vector<1x384xf32>
    %14 = vector.extract_strided_slice %8 {offsets = [5, 0], sizes = [1, 384], strides = [1, 1]} : vector<8x1536xf32> to vector<1x384xf32>
    %15 = vector.extract_strided_slice %8 {offsets = [6, 0], sizes = [1, 384], strides = [1, 1]} : vector<8x1536xf32> to vector<1x384xf32>
    %16 = vector.extract_strided_slice %8 {offsets = [7, 0], sizes = [1, 384], strides = [1, 1]} : vector<8x1536xf32> to vector<1x384xf32>
    %c0_7 = arith.constant 0 : index
    %c0_8 = arith.constant 0 : index
    %c0_9 = arith.constant 0 : index
    %17 = vector.load %arg4[%c0_7, %c0_8, %c0_9] : memref<1x384x1536xbf16, #tpu.memory_space<vmem>>, vector<1x384x1536xbf16>
    %18 = vector.shape_cast %17 : vector<1x384x1536xbf16> to vector<384x1536xbf16>
    %cst = arith.constant dense<0.000000e+00> : vector<32x1536xf32>
    %19 = tpu.matmul %6, %18, %cst {dimension_numbers = #tpu.dot_dimension_numbers<[1], [0], [0], [1], [0, 0, 1, 1], [], []>} : vector<32x384xbf16>, vector<384x1536xbf16>, vector<32x1536xf32> -> vector<32x1536xf32>
    %20 = vector.broadcast %9 : vector<1x1536xf32> to vector<32x1536xf32>
    %21 = arith.addf %19, %20 : vector<32x1536xf32>
    %22 = arith.truncf %21 : vector<32x1536xf32> to vector<32x1536xbf16>
    %23 = vector.extract_strided_slice %22 {offsets = [0, 0], sizes = [32, 512], strides = [1, 1]} : vector<32x1536xbf16> to vector<32x512xbf16>
    %24 = vector.extract_strided_slice %22 {offsets = [0, 512], sizes = [32, 512], strides = [1, 1]} : vector<32x1536xbf16> to vector<32x512xbf16>
    %25 = vector.extract_strided_slice %22 {offsets = [0, 1024], sizes = [32, 512], strides = [1, 1]} : vector<32x1536xbf16> to vector<32x512xbf16>
    %26 = vector.extract_strided_slice %23 {offsets = [0, 0], sizes = [32, 128], strides = [1, 1]} : vector<32x512xbf16> to vector<32x128xbf16>
    %27 = vector.extract_strided_slice %24 {offsets = [0, 0], sizes = [32, 128], strides = [1, 1]} : vector<32x512xbf16> to vector<32x128xbf16>
    %cst_10 = arith.constant dense<0.000000e+00> : vector<32x32xf32>
    %28 = tpu.matmul %26, %27, %cst_10 {dimension_numbers = #tpu.dot_dimension_numbers<[1], [1], [0], [0], [0, 0, 1, 0], [], []>} : vector<32x128xbf16>, vector<32x128xbf16>, vector<32x32xf32> -> vector<32x32xf32>
    %c0_11 = arith.constant 0 : index
    %c0_12 = arith.constant 0 : index
    %29 = vector.load %arg11[%c0_11, %c0_12] : memref<128x32xf32, #tpu.memory_space<vmem>>, vector<32x32xf32>
    tpu.vector_store %arg11[%c0_11, %c0_12], %28 {strides = array<i32>} : memref<128x32xf32, #tpu.memory_space<vmem>>, vector<32x32xf32>,
    %30 = vector.extract_strided_slice %23 {offsets = [0, 128], sizes = [32, 128], strides = [1, 1]} : vector<32x512xbf16> to vector<32x128xbf16>
    %31 = vector.extract_strided_slice %24 {offsets = [0, 128], sizes = [32, 128], strides = [1, 1]} : vector<32x512xbf16> to vector<32x128xbf16>
    %cst_13 = arith.constant dense<0.000000e+00> : vector<32x32xf32>
    %32 = tpu.matmul %30, %31, %cst_13 {dimension_numbers = #tpu.dot_dimension_numbers<[1], [1], [0], [0], [0, 0, 1, 0], [], []>} : vector<32x128xbf16>, vector<32x128xbf16>, vector<32x32xf32> -> vector<32x32xf32>
    %c32 = arith.constant 32 : index
    %c0_14 = arith.constant 0 : index
    %33 = vector.load %arg11[%c32, %c0_14] : memref<128x32xf32, #tpu.memory_space<vmem>>, vector<32x32xf32>
    tpu.vector_store %arg11[%c32, %c0_14], %32 {strides = array<i32>} : memref<128x32xf32, #tpu.memory_space<vmem>>, vector<32x32xf32>,
    %34 = vector.extract_strided_slice %23 {offsets = [0, 256], sizes = [32, 128], strides = [1, 1]} : vector<32x512xbf16> to vector<32x128xbf16>
    %35 = vector.extract_strided_slice %24 {offsets = [0, 256], sizes = [32, 128], strides = [1, 1]} : vector<32x512xbf16> to vector<32x128xbf16>
    %cst_15 = arith.constant dense<0.000000e+00> : vector<32x32xf32>
    %36 = tpu.matmul %34, %35, %cst_15 {dimension_numbers = #tpu.dot_dimension_numbers<[1], [1], [0], [0], [0, 0, 1, 0], [], []>} : vector<32x128xbf16>, vector<32x128xbf16>, vector<32x32xf32> -> vector<32x32xf32>
    %c64 = arith.constant 64 : index
    %c0_16 = arith.constant 0 : index
    %37 = vector.load %arg11[%c64, %c0_16] : memref<128x32xf32, #tpu.memory_space<vmem>>, vector<32x32xf32>
    tpu.vector_store %arg11[%c64, %c0_16], %36 {strides = array<i32>} : memref<128x32xf32, #tpu.memory_space<vmem>>, vector<32x32xf32>,
    %38 = vector.extract_strided_slice %23 {offsets = [0, 384], sizes = [32, 128], strides = [1, 1]} : vector<32x512xbf16> to vector<32x128xbf16>
    %39 = vector.extract_strided_slice %24 {offsets = [0, 384], sizes = [32, 128], strides = [1, 1]} : vector<32x512xbf16> to vector<32x128xbf16>
    %cst_17 = arith.constant dense<0.000000e+00> : vector<32x32xf32>
    %40 = tpu.matmul %38, %39, %cst_17 {dimension_numbers = #tpu.dot_dimension_numbers<[1], [1], [0], [0], [0, 0, 1, 0], [], []>} : vector<32x128xbf16>, vector<32x128xbf16>, vector<32x32xf32> -> vector<32x32xf32>
    %c96 = arith.constant 96 : index
    %c0_18 = arith.constant 0 : index
    %41 = vector.load %arg11[%c96, %c0_18] : memref<128x32xf32, #tpu.memory_space<vmem>>, vector<32x32xf32>
    tpu.vector_store %arg11[%c96, %c0_18], %40 {strides = array<i32>} : memref<128x32xf32, #tpu.memory_space<vmem>>, vector<32x32xf32>,
    %c0_19 = arith.constant 0 : index
    %c0_20 = arith.constant 0 : index
    %42 = vector.load %arg11[%c0_19, %c0_20] : memref<128x32xf32, #tpu.memory_space<vmem>>, vector<128x32xf32>
    %c0_21 = arith.constant 0 : index
    %c0_22 = arith.constant 0 : index
    %43 = vector.load %arg2[%c0_21, %c0_22] : memref<128x32xf32, #tpu.memory_space<vmem>>, vector<128x32xf32>
    %44 = arith.addf %42, %43 : vector<128x32xf32>
    %cst_23 = arith.constant dense<0xFF800000> : vector<128xf32>
    %45 = vector.multi_reduction <maximumf>, %44, %cst_23 [1] : vector<128x32xf32> to vector<128xf32>
    %46 = vector.shape_cast %45 : vector<128xf32> to vector<128x1xf32>
    %47 = vector.broadcast %46 : vector<128x1xf32> to vector<128x32xf32>
    %48 = arith.subf %44, %47 : vector<128x32xf32>
    %49 = math.exp %48 : vector<128x32xf32>
    %cst_24 = arith.constant dense<0.000000e+00> : vector<128xf32>
    %50 = vector.multi_reduction <add>, %49, %cst_24 [1] : vector<128x32xf32> to vector<128xf32>
    %51 = vector.shape_cast %50 : vector<128xf32> to vector<128x1xf32>
    %52 = tpu.reciprocal %51 : vector<128x1xf32> -> vector<128x1xf32>
    %53 = vector.broadcast %52 : vector<128x1xf32> to vector<128x32xf32>
    %54 = arith.mulf %49, %53 : vector<128x32xf32>
    %55 = arith.truncf %54 : vector<128x32xf32> to vector<128x32xbf16>
    %56 = vector.extract_strided_slice %55 {offsets = [0, 0], sizes = [32, 32], strides = [1, 1]} : vector<128x32xbf16> to vector<32x32xbf16>
    %57 = vector.extract_strided_slice %25 {offsets = [0, 0], sizes = [32, 128], strides = [1, 1]} : vector<32x512xbf16> to vector<32x128xbf16>
    %cst_25 = arith.constant dense<0.000000e+00> : vector<32x128xf32>
    %58 = tpu.matmul %56, %57, %cst_25 {dimension_numbers = #tpu.dot_dimension_numbers<[1], [0], [0], [1], [0, 0, 1, 1], [], []>} : vector<32x32xbf16>, vector<32x128xbf16>, vector<32x128xf32> -> vector<32x128xf32>
    %59 = arith.truncf %58 : vector<32x128xf32> to vector<32x128xbf16>
    %c0_26 = arith.constant 0 : index
    %c0_27 = arith.constant 0 : index
    %60 = vector.load %arg10[%c0_26, %c0_27] : memref<32x512xbf16, #tpu.memory_space<vmem>>, vector<32x128xbf16>
    tpu.vector_store %arg10[%c0_26, %c0_27], %59 {strides = array<i32>} : memref<32x512xbf16, #tpu.memory_space<vmem>>, vector<32x128xbf16>,
    %61 = vector.extract_strided_slice %55 {offsets = [32, 0], sizes = [32, 32], strides = [1, 1]} : vector<128x32xbf16> to vector<32x32xbf16>
    %62 = vector.extract_strided_slice %25 {offsets = [0, 128], sizes = [32, 128], strides = [1, 1]} : vector<32x512xbf16> to vector<32x128xbf16>
    %cst_28 = arith.constant dense<0.000000e+00> : vector<32x128xf32>
    %63 = tpu.matmul %61, %62, %cst_28 {dimension_numbers = #tpu.dot_dimension_numbers<[1], [0], [0], [1], [0, 0, 1, 1], [], []>} : vector<32x32xbf16>, vector<32x128xbf16>, vector<32x128xf32> -> vector<32x128xf32>
    %64 = arith.truncf %63 : vector<32x128xf32> to vector<32x128xbf16>
    %c0_29 = arith.constant 0 : index
    %c128 = arith.constant 128 : index
    %65 = vector.load %arg10[%c0_29, %c128] : memref<32x512xbf16, #tpu.memory_space<vmem>>, vector<32x128xbf16>
    tpu.vector_store %arg10[%c0_29, %c128], %64 {strides = array<i32>} : memref<32x512xbf16, #tpu.memory_space<vmem>>, vector<32x128xbf16>,
    %66 = vector.extract_strided_slice %55 {offsets = [64, 0], sizes = [32, 32], strides = [1, 1]} : vector<128x32xbf16> to vector<32x32xbf16>
    %67 = vector.extract_strided_slice %25 {offsets = [0, 256], sizes = [32, 128], strides = [1, 1]} : vector<32x512xbf16> to vector<32x128xbf16>
    %cst_30 = arith.constant dense<0.000000e+00> : vector<32x128xf32>
    %68 = tpu.matmul %66, %67, %cst_30 {dimension_numbers = #tpu.dot_dimension_numbers<[1], [0], [0], [1], [0, 0, 1, 1], [], []>} : vector<32x32xbf16>, vector<32x128xbf16>, vector<32x128xf32> -> vector<32x128xf32>
    %69 = arith.truncf %68 : vector<32x128xf32> to vector<32x128xbf16>
    %c0_31 = arith.constant 0 : index
    %c256 = arith.constant 256 : index
    %70 = vector.load %arg10[%c0_31, %c256] : memref<32x512xbf16, #tpu.memory_space<vmem>>, vector<32x128xbf16>
    tpu.vector_store %arg10[%c0_31, %c256], %69 {strides = array<i32>} : memref<32x512xbf16, #tpu.memory_space<vmem>>, vector<32x128xbf16>,
    %71 = vector.extract_strided_slice %55 {offsets = [96, 0], sizes = [32, 32], strides = [1, 1]} : vector<128x32xbf16> to vector<32x32xbf16>
    %72 = vector.extract_strided_slice %25 {offsets = [0, 384], sizes = [32, 128], strides = [1, 1]} : vector<32x512xbf16> to vector<32x128xbf16>
    %cst_32 = arith.constant dense<0.000000e+00> : vector<32x128xf32>
    %73 = tpu.matmul %71, %72, %cst_32 {dimension_numbers = #tpu.dot_dimension_numbers<[1], [0], [0], [1], [0, 0, 1, 1], [], []>} : vector<32x32xbf16>, vector<32x128xbf16>, vector<32x128xf32> -> vector<32x128xf32>
    %74 = arith.truncf %73 : vector<32x128xf32> to vector<32x128xbf16>
    %c0_33 = arith.constant 0 : index
    %c384 = arith.constant 384 : index
    %75 = vector.load %arg10[%c0_33, %c384] : memref<32x512xbf16, #tpu.memory_space<vmem>>, vector<32x128xbf16>
    tpu.vector_store %arg10[%c0_33, %c384], %74 {strides = array<i32>} : memref<32x512xbf16, #tpu.memory_space<vmem>>, vector<32x128xbf16>,
    %c0_34 = arith.constant 0 : index
    %c0_35 = arith.constant 0 : index
    %76 = vector.load %arg10[%c0_34, %c0_35] : memref<32x512xbf16, #tpu.memory_space<vmem>>, vector<32x512xbf16>
    %c0_36 = arith.constant 0 : index
    %c0_37 = arith.constant 0 : index
    %c0_38 = arith.constant 0 : index
    %77 = vector.load %arg5[%c0_36, %c0_37, %c0_38] : memref<1x512x384xbf16, #tpu.memory_space<vmem>>, vector<1x512x384xbf16>
    %78 = vector.shape_cast %77 : vector<1x512x384xbf16> to vector<512x384xbf16>
    %cst_39 = arith.constant dense<0.000000e+00> : vector<32x384xf32>
    %79 = tpu.matmul %76, %78, %cst_39 {dimension_numbers = #tpu.dot_dimension_numbers<[1], [0], [0], [1], [0, 0, 1, 1], [], []>} : vector<32x512xbf16>, vector<512x384xbf16>, vector<32x384xf32> -> vector<32x384xf32>
    %80 = vector.broadcast %10 : vector<1x384xf32> to vector<32x384xf32>
    %81 = arith.addf %79, %80 : vector<32x384xf32>
    %82 = arith.addf %5, %81 : vector<32x384xf32>
    %83 = vector.broadcast %1 : vector<1x384xf32> to vector<32x384xf32>
    %84 = arith.mulf %82, %83 : vector<32x384xf32>
    %cst_40 = arith.constant dense<0.000000e+00> : vector<32xf32>
    %85 = vector.multi_reduction <add>, %84, %cst_40 [1] : vector<32x384xf32> to vector<32xf32>
    %86 = vector.shape_cast %85 : vector<32xf32> to vector<32x1xf32>
    %cst_41 = arith.constant 0.00320512825 : f32
    %87 = vector.broadcast %cst_41 : f32 to vector<32x1xf32>
    %88 = arith.mulf %86, %87 : vector<32x1xf32>
    %89 = vector.broadcast %88 : vector<32x1xf32> to vector<32x384xf32>
    %90 = arith.subf %82, %89 : vector<32x384xf32>
    %91 = vector.broadcast %1 : vector<1x384xf32> to vector<32x384xf32>
    %92 = arith.mulf %90, %91 : vector<32x384xf32>
    %93 = arith.mulf %92, %92 : vector<32x384xf32>
    %cst_42 = arith.constant dense<0.000000e+00> : vector<32xf32>
    %94 = vector.multi_reduction <add>, %93, %cst_42 [1] : vector<32x384xf32> to vector<32xf32>
    %95 = vector.shape_cast %94 : vector<32xf32> to vector<32x1xf32>
    %cst_43 = arith.constant 0.00320512825 : f32
    %96 = vector.broadcast %cst_43 : f32 to vector<32x1xf32>
    %97 = arith.mulf %95, %96 : vector<32x1xf32>
    %cst_44 = arith.constant 9.99999996E-13 : f32
    %98 = vector.broadcast %cst_44 : f32 to vector<32x1xf32>
    %99 = arith.addf %97, %98 : vector<32x1xf32>
    %100 = math.rsqrt %99 : vector<32x1xf32>
    %101 = vector.broadcast %100 : vector<32x1xf32> to vector<32x384xf32>
    %102 = arith.mulf %92, %101 : vector<32x384xf32>
    %103 = vector.broadcast %13 : vector<1x384xf32> to vector<32x384xf32>
    %104 = arith.mulf %102, %103 : vector<32x384xf32>
    %105 = vector.broadcast %14 : vector<1x384xf32> to vector<32x384xf32>
    %106 = arith.addf %104, %105 : vector<32x384xf32>
    %107 = arith.truncf %106 : vector<32x384xf32> to vector<32x384xbf16>
    %c0_45 = arith.constant 0 : index
    %c0_46 = arith.constant 0 : index
    %c0_47 = arith.constant 0 : index
    %108 = vector.load %arg6[%c0_45, %c0_46, %c0_47] : memref<1x384x640xbf16, #tpu.memory_space<vmem>>, vector<1x384x640xbf16>
    %109 = vector.shape_cast %108 : vector<1x384x640xbf16> to vector<384x640xbf16>
    %cst_48 = arith.constant dense<0.000000e+00> : vector<32x640xf32>
    %110 = tpu.matmul %107, %109, %cst_48 {dimension_numbers = #tpu.dot_dimension_numbers<[1], [0], [0], [1], [0, 0, 1, 1], [], []>} : vector<32x384xbf16>, vector<384x640xbf16>, vector<32x640xf32> -> vector<32x640xf32>
    %111 = vector.broadcast %11 : vector<1x640xf32> to vector<32x640xf32>
    %112 = arith.addf %110, %111 : vector<32x640xf32>
    %cst_49 = arith.constant 5.000000e-01 : f32
    %113 = vector.broadcast %cst_49 : f32 to vector<32x640xf32>
    %114 = arith.mulf %113, %112 : vector<32x640xf32>
    %cst_50 = arith.constant 4.471500e-02 : f32
    %115 = vector.broadcast %cst_50 : f32 to vector<32x640xf32>
    %116 = arith.mulf %115, %112 : vector<32x640xf32>
    %117 = arith.mulf %116, %112 : vector<32x640xf32>
    %118 = arith.mulf %117, %112 : vector<32x640xf32>
    %119 = arith.addf %112, %118 : vector<32x640xf32>
    %cst_51 = arith.constant 0.797884583 : f32
    %120 = vector.broadcast %cst_51 : f32 to vector<32x640xf32>
    %121 = arith.mulf %120, %119 : vector<32x640xf32>
    %122 = math.tanh %121 : vector<32x640xf32>
    %cst_52 = arith.constant 1.000000e+00 : f32
    %123 = vector.broadcast %cst_52 : f32 to vector<32x640xf32>
    %124 = arith.addf %123, %122 : vector<32x640xf32>
    %125 = arith.mulf %114, %124 : vector<32x640xf32>
    %126 = arith.truncf %125 : vector<32x640xf32> to vector<32x640xbf16>
    %c0_53 = arith.constant 0 : index
    %c0_54 = arith.constant 0 : index
    %c0_55 = arith.constant 0 : index
    %127 = vector.load %arg7[%c0_53, %c0_54, %c0_55] : memref<1x640x384xbf16, #tpu.memory_space<vmem>>, vector<1x640x384xbf16>
    %128 = vector.shape_cast %127 : vector<1x640x384xbf16> to vector<640x384xbf16>
    %cst_56 = arith.constant dense<0.000000e+00> : vector<32x384xf32>
    %129 = tpu.matmul %126, %128, %cst_56 {dimension_numbers = #tpu.dot_dimension_numbers<[1], [0], [0], [1], [0, 0, 1, 1], [], []>} : vector<32x640xbf16>, vector<640x384xbf16>, vector<32x384xf32> -> vector<32x384xf32>
    %130 = vector.broadcast %12 : vector<1x384xf32> to vector<32x384xf32>
    %131 = arith.addf %129, %130 : vector<32x384xf32>
    %132 = arith.addf %106, %131 : vector<32x384xf32>
    %133 = vector.broadcast %1 : vector<1x384xf32> to vector<32x384xf32>
    %134 = arith.mulf %132, %133 : vector<32x384xf32>
    %cst_57 = arith.constant dense<0.000000e+00> : vector<32xf32>
    %135 = vector.multi_reduction <add>, %134, %cst_57 [1] : vector<32x384xf32> to vector<32xf32>
    %136 = vector.shape_cast %135 : vector<32xf32> to vector<32x1xf32>
    %cst_58 = arith.constant 0.00320512825 : f32
    %137 = vector.broadcast %cst_58 : f32 to vector<32x1xf32>
    %138 = arith.mulf %136, %137 : vector<32x1xf32>
    %139 = vector.broadcast %138 : vector<32x1xf32> to vector<32x384xf32>
    %140 = arith.subf %132, %139 : vector<32x384xf32>
    %141 = vector.broadcast %1 : vector<1x384xf32> to vector<32x384xf32>
    %142 = arith.mulf %140, %141 : vector<32x384xf32>
    %143 = arith.mulf %142, %142 : vector<32x384xf32>
    %cst_59 = arith.constant dense<0.000000e+00> : vector<32xf32>
    %144 = vector.multi_reduction <add>, %143, %cst_59 [1] : vector<32x384xf32> to vector<32xf32>
    %145 = vector.shape_cast %144 : vector<32xf32> to vector<32x1xf32>
    %cst_60 = arith.constant 0.00320512825 : f32
    %146 = vector.broadcast %cst_60 : f32 to vector<32x1xf32>
    %147 = arith.mulf %145, %146 : vector<32x1xf32>
    %cst_61 = arith.constant 9.99999996E-13 : f32
    %148 = vector.broadcast %cst_61 : f32 to vector<32x1xf32>
    %149 = arith.addf %147, %148 : vector<32x1xf32>
    %150 = math.rsqrt %149 : vector<32x1xf32>
    %151 = vector.broadcast %150 : vector<32x1xf32> to vector<32x384xf32>
    %152 = arith.mulf %142, %151 : vector<32x384xf32>
    %153 = vector.broadcast %15 : vector<1x384xf32> to vector<32x384xf32>
    %154 = arith.mulf %152, %153 : vector<32x384xf32>
    %155 = vector.broadcast %16 : vector<1x384xf32> to vector<32x384xf32>
    %156 = arith.addf %154, %155 : vector<32x384xf32>
    %c0_62 = arith.constant 0 : index
    %c0_63 = arith.constant 0 : index
    %157 = vector.load %arg9[%c0_62, %c0_63] : memref<32x384xf32, #tpu.memory_space<vmem>>, vector<32x384xf32>
    tpu.vector_store %arg9[%c0_62, %c0_63], %156 {strides = array<i32>} : memref<32x384xf32, #tpu.memory_space<vmem>>, vector<32x384xf32>,
    return
  }
  func.func @transform_0(%arg0: i32) -> (i32, i32) {
    %c0_i32 = arith.constant 0 : i32
    %c0_i32_0 = arith.constant 0 : i32
    %c0_i32_1 = arith.constant 0 : i32
    return %c0_i32, %c0_i32_0 : i32, i32
  }
  func.func @transform_1(%arg0: i32) -> (i32, i32) {
    %c0_i32 = arith.constant 0 : i32
    %c0_i32_0 = arith.constant 0 : i32
    %c0_i32_1 = arith.constant 0 : i32
    return %c0_i32, %c0_i32_0 : i32, i32
  }
  func.func @transform_2(%arg0: i32) -> (i32, i32) {
    %c0_i32 = arith.constant 0 : i32
    %c0_i32_0 = arith.constant 0 : i32
    %c0_i32_1 = arith.constant 0 : i32
    return %c0_i32, %c0_i32_0 : i32, i32
  }
  func.func @transform_3(%arg0: i32) -> (i32, i32, i32) {
    %c0_i32 = arith.constant 0 : i32
    %c0_i32_0 = arith.constant 0 : i32
    %c0_i32_1 = arith.constant 0 : i32
    return %arg0, %c0_i32, %c0_i32_0 : i32, i32, i32
  }
  func.func @transform_4(%arg0: i32) -> (i32, i32, i32) {
    %c0_i32 = arith.constant 0 : i32
    %c0_i32_0 = arith.constant 0 : i32
    %c0_i32_1 = arith.constant 0 : i32
    return %arg0, %c0_i32, %c0_i32_0 : i32, i32, i32
  }
  func.func @transform_5(%arg0: i32) -> (i32, i32, i32) {
    %c0_i32 = arith.constant 0 : i32
    %c0_i32_0 = arith.constant 0 : i32
    %c0_i32_1 = arith.constant 0 : i32
    return %arg0, %c0_i32, %c0_i32_0 : i32, i32, i32
  }
  func.func @transform_6(%arg0: i32) -> (i32, i32, i32) {
    %c0_i32 = arith.constant 0 : i32
    %c0_i32_0 = arith.constant 0 : i32
    %c0_i32_1 = arith.constant 0 : i32
    return %arg0, %c0_i32, %c0_i32_0 : i32, i32, i32
  }
  func.func @transform_7(%arg0: i32) -> (i32, i32, i32) {
    %c0_i32 = arith.constant 0 : i32
    %c0_i32_0 = arith.constant 0 : i32
    %c0_i32_1 = arith.constant 0 : i32
    return %arg0, %c0_i32, %c0_i32_0 : i32, i32, i32
  }
  func.func @transform_8(%arg0: i32) -> (i32, i32) {
    %c0_i32 = arith.constant 0 : i32
    %c0_i32_0 = arith.constant 0 : i32
    %c0_i32_1 = arith.constant 0 : i32
    return %c0_i32, %c0_i32_0 : i32, i32
  }
}

</mosaic_0001>

<bundles_post_ra>
// kernel: bert_classifier_forward.1
= control target key start
LH: loop header
LB: loop body
LE: loop exit
PB: predicated region body
PF: predicated region fallthrough
CT: control target
= control target key end

     0   :  { %s9644_s27 = smov 0   ;;  %s11557_s0 = inlined_call_operand.vmem [shape: f32[32,384], index: 0, kind: input, shape index: {}]   ;;  %s11558_s1 = inlined_call_operand.vmem [shape: f32[128,32], index: 1, kind: input, shape index: {}]   ;;  %s11559_s2 = inlined_call_operand.vmem [shape: f32[8,384], index: 2, kind: input, shape index: {}]   ;;  %s11560_s3 = inlined_call_operand.vmem [shape: bf16[2,384,1536], index: 3, kind: input, shape index: {}]   ;;  %s11561_s4 = inlined_call_operand.vmem [shape: bf16[2,512,384], index: 4, kind: input, shape index: {}]   ;;  %s11562_s5 = inlined_call_operand.vmem [shape: bf16[2,384,640], index: 5, kind: input, shape index: {}]   ;;  %s11563_s6 = inlined_call_operand.vmem [shape: bf16[2,640,384], index: 6, kind: input, shape index: {}]   ;;  %s11564_s7 = inlined_call_operand.vmem [shape: f32[2,8,1536], index: 7, kind: input, shape index: {}]   ;;  %s11565_s8 = inlined_call_operand.vmem [shape: f32[32,384], index: 8, kind: output, shape index: {}]  }
   0x1 LB: > { %s7430_s28 = sadd.s32 4294967295, %s9596_s27   ;;  %p7433_p0 = scmp.ge.s32.totalorder %s9596_s27, 1  ;;  %s9596_s27 = sphi %s9644_s27, %s18_s27  }
   0x2   : > { %p297_p1 = scmp.lt.s32.totalorder %s9596_s27, 3 }
   0x4   : > { %p298_p2 = pnand %p7433_p0, %p297_p1 }
   0x5   : > { %p346_p3 = scmp.lt.s32.totalorder (!%p298_p2), %s7430_s28, 1  ;;  %v9655_v0 = vld [vmem:[%s11559_s2] sm:$0xff] (!%p298_p2)  ;;  %v9660_v1 = vld [vmem:[%s11559_s2 + $0x8] sm:$0xff] (!%p298_p2)  ;;  %v9665_v2 = vld [vmem:[%s11559_s2 + $0x10] sm:$0xff] (!%p298_p2)  ;;  %p7439_p4 = scmp.ne.s32.totalorder (!%p298_p2), %s7430_s28, 0 }
   0x6   : > { %301 = sbr.rel (%p298_p2) target bundleno = 3066 (0xbfa), region = 52 }
   0xd   : > { %s347_s13 = scalar_select %p346_p3, %s7430_s28, 1 }
   0xe   : > { %378 = sbr.rel (%p7439_p4) target bundleno = 356 (0x164), region = 56  ;;  %v391_v3 = vlaneseq (!%p7439_p4)  ;;  %v379_v5 = vld [vmem:[%s11557_s0] sm:$0xff] (!%p7439_p4)  ;;  %v380_v6 = vld [vmem:[%s11557_s0 + $0x8] sm:$0xff] (!%p7439_p4)  ;;  %v381_v8 = vld [vmem:[%s11557_s0 + $0x10] sm:$0xff] (!%p7439_p4) }
   0xf   : > { %s8538_s14 = smul.u32 2304, %s347_s13  ;;  %v385_v9 = vld [vmem:[%s11557_s0 + $0x30] sm:$0xff] (!%p7439_p4)  ;;  %v386_v10 = vld [vmem:[%s11557_s0 + $0x38] sm:$0xff] (!%p7439_p4)  ;;  %v387_v14 = vld [vmem:[%s11557_s0 + $0x40] sm:$0xff] (!%p7439_p4) }
  0x10   : > { %s8539_s15 = smul.u32 768, %s347_s13  ;;  %v9692_v4 = vshrl.u32 (!%p7439_p4), %v391_v3, 7  ;;  %v382_v15 = vld [vmem:[%s11557_s0 + $0x18] sm:$0xff] (!%p7439_p4)  ;;  %v383_v16 = vld [vmem:[%s11557_s0 + $0x20] sm:$0xff] (!%p7439_p4)  ;;  %v9731_v17 = vld [vmem:[%s11557_s0 + $0x28] sm:$0xff] (!%p7439_p4) }
  0x11   : > { %s9670_s18 = scalar_lea.vmem %s11560_s3, %s8538_s14  ;;  %s8540_s19 = smul.u32 960, %s347_s13  ;;  %v388_v18 = vld [vmem:[%s11557_s0 + $0x48] sm:$0xff] (!%p7439_p4)  ;;  %v389_v19 = vld [vmem:[%s11557_s0 + $0x50] sm:$0xff] (!%p7439_p4)  ;;  %v9746_v24 = vld [vmem:[%s11557_s0 + $0x58] sm:$0xff] (!%p7439_p4) }
  0x12   : > { %s9675_s22 = scalar_lea.vmem %s11561_s4, %s8539_s15  ;;  %s8541_s23 = smul.u32 96, %s347_s13  ;;  %v393_v7 = vsub.s32 (!%p7439_p4), 0, %v9692_v4 }
  0x13   : > { %s9680_s26 = scalar_lea.vmem %s11562_s5, %s8540_s19  ;;  %s9685_s9 = scalar_lea.vmem %s11563_s6, %s8540_s19 }
  0x14   : > { %s9690_s12 = scalar_lea.vmem %s11564_s7, %s8541_s23  ;;  %v9711_v11 = vrot.slane (!%p7439_p4), %v9655_v0, %v393_v7  ;;  %v9714_v12 = vrot.slane (!%p7439_p4), %v9660_v1, %v393_v7  ;;  %v9717_v13 = vrot.slane (!%p7439_p4), %v9665_v2, %v393_v7 }
  0x16   : > { %v403_v20 = vmul.f32 %v9711_v11, %v379_v5  ;;  %v404_v21 = vmul.f32 %v9714_v12, %v380_v6  ;;  %v405_v22 = vmul.f32 %v9717_v13, %v381_v8  ;;  %v409_v23 = vmul.f32 %v9711_v11, %v385_v9 }
  0x17   : > { %v410_v25 = vmul.f32 %v9714_v12, %v386_v10  ;;  %v411_v26 = vmul.f32 %v9717_v13, %v387_v14  ;;  %v406_v27 = vmul.f32 %v9711_v11, %v382_v15  ;;  %v407_v28 = vmul.f32 %v9714_v12, %v383_v16 }
  0x18   : > { %v415_v29 = vadd.f32 %v404_v21, %v403_v20  ;;  %v408_v30 = vmul.f32 %v9717_v13, %v9731_v17  ;;  %v412_v31 = vmul.f32 %v9711_v11, %v388_v18  ;;  %v413_v32 = vmul.f32 %v9714_v12, %v389_v19 }
  0x19   : > { %v423_v33 = vadd.f32 %v410_v25, %v409_v23  ;;  %v419_v34 = vadd.f32 %v407_v28, %v406_v27  ;;  %v414_v35 = vmul.f32 %v9717_v13, %v9746_v24 }
  0x1a   : > { %v416_v36 = vadd.f32 %v415_v29, %v405_v22  ;;  %v427_v37 = vadd.f32 %v413_v32, %v412_v31 }
  0x1b   : > { %v424_v38 = vadd.f32 %v423_v33, %v411_v26  ;;  %v420_v39 = vadd.f32 %v419_v34, %v408_v30 }
  0x1c   : > { %417 = vadd.xlane.f32.xlu0 %v416_v36  ;;  %v428_v40 = vadd.f32 %v427_v37, %v414_v35 }
  0x1d   : > { %425 = vadd.xlane.f32.xlu1 %v424_v38 }
  0x20   : > { %421 = vadd.xlane.f32.xlu0 %v420_v39 }
  0x21   : > { %429 = vadd.xlane.f32.xlu1 %v428_v40 }
  0xa9   : > { %v418_v41 = vpop.xlane.xlu0 %417 }
  0xaa   : > { %v431_v42 = vmul.f32 0.0032051282, %v418_v41  ;;  %v426_v43 = vpop.xlane.xlu1 %425 }
  0xab   : > { %v433_v44 = vmul.f32 0.0032051282, %v426_v43 }
  0xac   : > { %v435_v45 = vsub.f32 %v379_v5, %v431_v42  ;;  %v436_v46 = vsub.f32 %v380_v6, %v431_v42  ;;  %v437_v47 = vsub.f32 %v381_v8, %v431_v42 }
  0xad   : > { %v441_v48 = vsub.f32 %v385_v9, %v433_v44  ;;  %v442_v49 = vsub.f32 %v386_v10, %v433_v44  ;;  %v443_v50 = vsub.f32 %v387_v14, %v433_v44  ;;  %v422_v51 = vpop.xlane.xlu0 %421  ;;  %v513_v44 = vsub.s32 1, %v9692_v4 }
  0xae   : > { %v9759_v52 = vmul.f32 %v435_v45, %v9711_v11  ;;  %v9762_v53 = vmul.f32 %v436_v46, %v9714_v12  ;;  %v432_v54 = vmul.f32 0.0032051282, %v422_v51  ;;  %v430_v55 = vpop.xlane.xlu1 %429  ;;  %v9765_v56 = vmul.f32 %v437_v47, %v9717_v13 }
  0xaf   : > { %v9768_v57 = vmul.f32 %v441_v48, %v9711_v11  ;;  %v9771_v58 = vmul.f32 %v442_v49, %v9714_v12  ;;  %v434_v59 = vmul.f32 0.0032051282, %v430_v55  ;;  %v9774_v60 = vmul.f32 %v443_v50, %v9717_v13 }
  0xb0   : > { %v438_v61 = vsub.f32 %v382_v15, %v432_v54  ;;  %v439_v62 = vsub.f32 %v383_v16, %v432_v54  ;;  %v440_v63 = vsub.f32 %v9731_v17, %v432_v54  ;;  %v459_v3 = vmul.f32 %v9759_v52, %v9759_v52 }
  0xb1   : > { %v444_v5 = vsub.f32 %v388_v18, %v434_v59  ;;  %v445_v6 = vsub.f32 %v389_v19, %v434_v59  ;;  %v446_v7 = vsub.f32 %v9746_v24, %v434_v59  ;;  %v460_v8 = vmul.f32 %v9762_v53, %v9762_v53 }
  0xb2   : > { %v450_v9 = vmul.f32 %v438_v61, %v9711_v11  ;;  %v451_v10 = vmul.f32 %v439_v62, %v9714_v12  ;;  %v461_v14 = vmul.f32 %v9765_v56, %v9765_v56  ;;  %v465_v15 = vmul.f32 %v9768_v57, %v9768_v57 }
  0xb3   : > { %v9789_v16 = vmul.f32 %v444_v5, %v9711_v11  ;;  %v9792_v17 = vmul.f32 %v445_v6, %v9714_v12  ;;  %v471_v18 = vadd.f32 %v460_v8, %v459_v3  ;;  %v466_v19 = vmul.f32 %v9771_v58, %v9771_v58 }
  0xb4   : > { %v467_v20 = vmul.f32 %v9774_v60, %v9774_v60  ;;  %v452_v21 = vmul.f32 %v440_v63, %v9717_v13  ;;  %v462_v22 = vmul.f32 %v450_v9, %v450_v9  ;;  %v463_v23 = vmul.f32 %v451_v10, %v451_v10 }
  0xb5   : > { %v472_v24 = vadd.f32 %v471_v18, %v461_v14  ;;  %v479_v25 = vadd.f32 %v466_v19, %v465_v15  ;;  %v9800_v26 = vmul.f32 %v446_v7, %v9717_v13  ;;  %v468_v11 = vmul.f32 %v9789_v16, %v9789_v16 }
  0xb6   : > { %v464_v12 = vmul.f32 %v452_v21, %v452_v21  ;;  %v475_v27 = vadd.f32 %v463_v23, %v462_v22  ;;  %v469_v28 = vmul.f32 %v9792_v17, %v9792_v17  ;;  %v537_v46 = vsub.s32 2, %v9692_v4 }
  0xb7   : > { %473 = vadd.xlane.f32.xlu0 %v472_v24  ;;  %v470_v30 = vmul.f32 %v9800_v26, %v9800_v26  ;;  %v480_v32 = vadd.f32 %v479_v25, %v467_v20  ;;  %v514_v47 = vrot.slane %v9655_v0, %v513_v44  ;;  %v518_v48 = vrot.slane %v9660_v1, %v513_v44 }
  0xb8   : > { %v476_v29 = vadd.f32 %v475_v27, %v464_v12  ;;  %v483_v31 = vadd.f32 %v469_v28, %v468_v11  ;;  %v522_v49 = vrot.slane %v9665_v2, %v513_v44  ;;  %v538_v51 = vrot.slane %v9655_v0, %v537_v46 }
  0xb9   : > { %v542_v54 = vrot.slane %v9660_v1, %v537_v46  ;;  %v546_v55 = vrot.slane %v9665_v2, %v537_v46 }
  0xba   : > { %477 = vadd.xlane.f32.xlu1 %v476_v29  ;;  %v484_v33 = vadd.f32 %v483_v31, %v470_v30 }
  0xbb   : > { %481 = vadd.xlane.f32.xlu0 %v480_v32 }
  0xbe   : > { %485 = vadd.xlane.f32.xlu1 %v484_v33 }
 0x144   : > { %v474_v13 = vpop.xlane.xlu0 %473 }
 0x145   : > { %v487_v34 = vmul.f32 0.0032051282, %v474_v13 }
 0x147   : > { %v491_v35 = vadd.f32 1e-12, %v487_v34  ;;  %v478_v36 = vpop.xlane.xlu1 %477 }
 0x148   : > { %v488_v37 = vmul.f32 0.0032051282, %v478_v36  ;;  %v482_v38 = vpop.xlane.xlu0 %481 }
 0x149   : > { %8551 = vrsqrt.f32 %v491_v35  ;;  %v489_v39 = vmul.f32 0.0032051282, %v482_v38 }
 0x14a   : > { %v492_v40 = vadd.f32 1e-12, %v488_v37 }
 0x14b   : > { %v493_v41 = vadd.f32 1e-12, %v489_v39  ;;  %v486_v42 = vpop.xlane.xlu1 %485 }
 0x14c   : > { %8553 = vrsqrt.f32 %v492_v40  ;;  %v490_v43 = vmul.f32 0.0032051282, %v486_v42 }
 0x14d   : > { %8555 = vrsqrt.f32 %v493_v41 }
 0x14e   : > { %v494_v45 = vadd.f32 1e-12, %v490_v43 }
 0x150   : > { %8557 = vrsqrt.f32 %v494_v45 }
 0x153   : > { %v8552_v50 = vpop.eup %8551 }
 0x154   : > { %v499_v59 = vmul.f32 %v8552_v50, %v9759_v52  ;;  %v500_v61 = vmul.f32 %v8552_v50, %v9762_v53  ;;  %v501_v4 = vmul.f32 %v8552_v50, %v9765_v56 }
 0x156   : > { %v8554_v62 = vpop.eup %8553  ;;  %v523_v63 = vmul.f32 %v514_v47, %v499_v59  ;;  %v524_v3 = vmul.f32 %v518_v48, %v500_v61  ;;  %v525_v5 = vmul.f32 %v522_v49, %v501_v4 }
 0x157   : > { %v8556_v6 = vpop.eup %8555  ;;  %v502_v7 = vmul.f32 %v8554_v62, %v450_v9  ;;  %v503_v8 = vmul.f32 %v8554_v62, %v451_v10  ;;  %v504_v14 = vmul.f32 %v8554_v62, %v452_v21 }
 0x158   : > { %v547_v15 = vadd.f32 %v538_v51, %v523_v63  ;;  %v548_v18 = vadd.f32 %v542_v54, %v524_v3  ;;  %v549_v19 = vadd.f32 %v546_v55, %v525_v5  ;;  %v505_v20 = vmul.f32 %v8556_v6, %v9768_v57 }
 0x159   : > { %v526_v22 = vmul.f32 %v514_v47, %v502_v7  ;;  %v527_v23 = vmul.f32 %v518_v48, %v503_v8  ;;  %v528_v52 = vmul.f32 %v522_v49, %v504_v14  ;;  %v506_v53 = vmul.f32 %v8556_v6, %v9771_v58 }
 0x15a   : > { %v8558_v24 = vpop.eup %8557  ;;  %559 = vst [vmem:[%s11565_s8] sm:$0xff] %v547_v15  ;;  %560 = vst [vmem:[%s11565_s8 + $0x8] sm:$0xff] %v548_v18  ;;  %v507_v56 = vmul.f32 %v8556_v6, %v9774_v60  ;;  %v529_v57 = vmul.f32 %v514_v47, %v505_v20 }
 0x15b   : > { %561 = vst [vmem:[%s11565_s8 + $0x10] sm:$0xff] %v549_v19  ;;  %v550_v9 = vadd.f32 %v538_v51, %v526_v22  ;;  %v551_v10 = vadd.f32 %v542_v54, %v527_v23  ;;  %v552_v21 = vadd.f32 %v546_v55, %v528_v52  ;;  %v530_v58 = vmul.f32 %v518_v48, %v506_v53 }
 0x15c   : > { %v531_v25 = vmul.f32 %v522_v49, %v507_v56  ;;  %v553_v11 = vadd.f32 %v538_v51, %v529_v57  ;;  %v508_v12 = vmul.f32 %v8558_v24, %v9789_v16  ;;  %v509_v27 = vmul.f32 %v8558_v24, %v9792_v17 }
 0x15d   : > { %562 = vst [vmem:[%s11565_s8 + $0x18] sm:$0xff] %v550_v9  ;;  %563 = vst [vmem:[%s11565_s8 + $0x20] sm:$0xff] %v551_v10  ;;  %v554_v60 = vadd.f32 %v542_v54, %v530_v58  ;;  %v510_v28 = vmul.f32 %v8558_v24, %v9800_v26 }
 0x15e   : > { %564 = vst [vmem:[%s11565_s8 + $0x28] sm:$0xff] %v552_v21  ;;  %v555_v29 = vadd.f32 %v546_v55, %v531_v25  ;;  %565 = vst [vmem:[%s11565_s8 + $0x30] sm:$0xff] %v553_v11  ;;  %v532_v16 = vmul.f32 %v514_v47, %v508_v12  ;;  %v533_v17 = vmul.f32 %v518_v48, %v509_v27 }
 0x15f   : > { %566 = vst [vmem:[%s11565_s8 + $0x38] sm:$0xff] %v554_v60  ;;  %v534_v30 = vmul.f32 %v522_v49, %v510_v28 }
 0x160   : > { %567 = vst [vmem:[%s11565_s8 + $0x40] sm:$0xff] %v555_v29  ;;  %v556_v31 = vadd.f32 %v538_v51, %v532_v16  ;;  %v557_v32 = vadd.f32 %v542_v54, %v533_v17 }
 0x161   : > { %v558_v33 = vadd.f32 %v546_v55, %v534_v30 }
 0x162   : > { %568 = vst [vmem:[%s11565_s8 + $0x48] sm:$0xff] %v556_v31  ;;  %569 = vst [vmem:[%s11565_s8 + $0x50] sm:$0xff] %v557_v32 }
 0x163   : > { %570 = vst [vmem:[%s11565_s8 + $0x58] sm:$0xff] %v558_v33 }
 0x164 PF: > { %v8559_v26 = vld [vmem:[%s9670_s18 + $0x4] ss:$48 sps:$4 sm:$0xff]   ;;  %v9598_v34 = vmov 0   ;;  %v8563_v35 = vld [vmem:[%s9670_s18] ss:$48 sps:$4 sm:$0xff]   ;;  %v572_v12 = vld [vmem:[%s11565_s8 + $0x8] sm:$0xff] }
 0x165   : > { %v8561_v13 = vld [vmem:[%s9670_s18 + $0x604] ss:$48 sps:$4 sm:$0xff]   ;;  %2462 = vmatprep.mubr.bf16.mxu1 %v9598_v34  ;;  %2377 = vmatprep.subr.bf16.mxu0 %v8559_v26  ;;  %v8564_v36 = vld [vmem:[%s9670_s18 + $0x600] ss:$48 sps:$4 sm:$0xff]   ;;  %v576_v18 = vld [vmem:[%s11565_s8 + $0x28] sm:$0xff]  ;;  %vm3086_vm0 = vcmask 261120  }
 0x166   : > { %2430 = vmatprep.subr.bf16.mxu1 %v8561_v13  ;;  %v8565_v37 = vld [vmem:[%s9670_s18 + $0x64] ss:$48 sps:$4 sm:$0xff]   ;;  %2378 = vmatpush1.bf16.msra.mxu0 %v8563_v35  ;;  %v8569_v39 = vld [vmem:[%s9670_s18 + $0x60] ss:$48 sps:$4 sm:$0xff]   ;;  %v8611_v20 = vld [vmem:[%s9670_s18 + $0xc] ss:$48 sps:$4 sm:$0xff]  }
 0x167   : > { %2431 = vmatpush1.bf16.msra.mxu1 %v8564_v36  ;;  %v8567_v38 = vld [vmem:[%s9670_s18 + $0x664] ss:$48 sps:$4 sm:$0xff]   ;;  %2379 = vmatprep.subr.bf16.mxu0 %v8565_v37  ;;  %v8570_v40 = vld [vmem:[%s9670_s18 + $0x660] ss:$48 sps:$4 sm:$0xff]   ;;  %v8609_v23 = vld [vmem:[%s9670_s18 + $0x8] ss:$48 sps:$4 sm:$0xff]  }
 0x168   : > { %2432 = vmatprep.subr.bf16.mxu1 %v8567_v38  ;;  %v8571_v41 = vld [vmem:[%s9670_s18 + $0xc4] ss:$48 sps:$4 sm:$0xff]   ;;  %v8575_v43 = vld [vmem:[%s9670_s18 + $0xc0] ss:$48 sps:$4 sm:$0xff]   ;;  %v8617_v24 = vld [vmem:[%s9670_s18 + $0x6c] ss:$48 sps:$4 sm:$0xff]  }
 0x169   : > { %v8573_v42 = vld [vmem:[%s9670_s18 + $0x6c4] ss:$48 sps:$4 sm:$0xff]   ;;  %v8576_v44 = vld [vmem:[%s9670_s18 + $0x6c0] ss:$48 sps:$4 sm:$0xff]   ;;  %v8615_v56 = vld [vmem:[%s9670_s18 + $0x68] ss:$48 sps:$4 sm:$0xff]  }
 0x16a   : > { %2380 = vmatpush1.bf16.msra.mxu0 %v8569_v39  ;;  %v8577_v45 = vld [vmem:[%s9670_s18 + $0x124] ss:$48 sps:$4 sm:$0xff]   ;;  %v8581_v47 = vld [vmem:[%s9670_s18 + $0x120] ss:$48 sps:$4 sm:$0xff]   ;;  %v8623_v10 = vld [vmem:[%s9670_s18 + $0xcc] ss:$48 sps:$4 sm:$0xff]  }
 0x16b   : > { %2433 = vmatpush1.bf16.msra.mxu1 %v8570_v40  ;;  %2381 = vmatprep.subr.bf16.mxu0 %v8571_v41  ;;  %v8579_v46 = vld [vmem:[%s9670_s18 + $0x724] ss:$48 sps:$4 sm:$0xff]   ;;  %v8582_v48 = vld [vmem:[%s9670_s18 + $0x720] ss:$48 sps:$4 sm:$0xff]   ;;  %v8621_v21 = vld [vmem:[%s9670_s18 + $0xc8] ss:$48 sps:$4 sm:$0xff]  }
 0x16c   : > { %2434 = vmatprep.subr.bf16.mxu1 %v8573_v42  ;;  %v8583_v49 = vld [vmem:[%s9670_s18 + $0x184] ss:$48 sps:$4 sm:$0xff]   ;;  %v8587_v51 = vld [vmem:[%s9670_s18 + $0x180] ss:$48 sps:$4 sm:$0xff]   ;;  %v8629_v11 = vld [vmem:[%s9670_s18 + $0x12c] ss:$48 sps:$4 sm:$0xff]  }
 0x16d   : > { %v8585_v50 = vld [vmem:[%s9670_s18 + $0x784] ss:$48 sps:$4 sm:$0xff]   ;;  %v8588_v54 = vld [vmem:[%s9670_s18 + $0x780] ss:$48 sps:$4 sm:$0xff]   ;;  %v8627_v60 = vld [vmem:[%s9670_s18 + $0x128] ss:$48 sps:$4 sm:$0xff]  }
 0x16e   : > { %2382 = vmatpush1.bf16.msra.mxu0 %v8575_v43  ;;  %v8589_v55 = vld [vmem:[%s9670_s18 + $0x1e4] ss:$48 sps:$4 sm:$0xff]   ;;  %v8593_v61 = vld [vmem:[%s9670_s18 + $0x1e0] ss:$48 sps:$4 sm:$0xff]   ;;  %v8635_v17 = vld [vmem:[%s9670_s18 + $0x18c] ss:$48 sps:$4 sm:$0xff]  }
 0x16f   : > { %2435 = vmatpush1.bf16.msra.mxu1 %v8576_v44  ;;  %2383 = vmatprep.subr.bf16.mxu0 %v8577_v45  ;;  %v8591_v59 = vld [vmem:[%s9670_s18 + $0x7e4] ss:$48 sps:$4 sm:$0xff]   ;;  %v8594_v4 = vld [vmem:[%s9670_s18 + $0x7e0] ss:$48 sps:$4 sm:$0xff]   ;;  %v8633_v30 = vld [vmem:[%s9670_s18 + $0x188] ss:$48 sps:$4 sm:$0xff]  }
 0x170   : > { %2436 = vmatprep.subr.bf16.mxu1 %v8579_v46  ;;  %v8595_v62 = vld [vmem:[%s9670_s18 + $0x244] ss:$48 sps:$4 sm:$0xff]   ;;  %v8599_v3 = vld [vmem:[%s9670_s18 + $0x240] ss:$48 sps:$4 sm:$0xff]   ;;  %v8641_v33 = vld [vmem:[%s9670_s18 + $0x1ec] ss:$48 sps:$4 sm:$0xff]  }
 0x171   : > { %v8597_v63 = vld [vmem:[%s9670_s18 + $0x844] ss:$48 sps:$4 sm:$0xff]   ;;  %v8600_v5 = vld [vmem:[%s9670_s18 + $0x840] ss:$48 sps:$4 sm:$0xff]   ;;  %v8639_v26 = vld [vmem:[%s9670_s18 + $0x1e8] ss:$48 sps:$4 sm:$0xff]  }
 0x172   : > { %2384 = vmatpush1.bf16.msra.mxu0 %v8581_v47  ;;  %v8601_v6 = vld [vmem:[%s9670_s18 + $0x2a4] ss:$48 sps:$4 sm:$0xff]   ;;  %v8605_v8 = vld [vmem:[%s9670_s18 + $0x2a0] ss:$48 sps:$4 sm:$0xff]   ;;  %v8647_v36 = vld [vmem:[%s9670_s18 + $0x24c] ss:$48 sps:$4 sm:$0xff]  }
 0x173   : > { %2437 = vmatpush1.bf16.msra.mxu1 %v8582_v48  ;;  %2385 = vmatprep.subr.bf16.mxu0 %v8583_v49  ;;  %v8603_v7 = vld [vmem:[%s9670_s18 + $0x8a4] ss:$48 sps:$4 sm:$0xff]   ;;  %v8606_v14 = vld [vmem:[%s9670_s18 + $0x8a0] ss:$48 sps:$4 sm:$0xff]   ;;  %v8645_v37 = vld [vmem:[%s9670_s18 + $0x248] ss:$48 sps:$4 sm:$0xff]  }
 0x174   : > { %2438 = vmatprep.subr.bf16.mxu1 %v8585_v50  ;;  %v573_v15 = vld [vmem:[%s11565_s8 + $0x10] sm:$0xff]  ;;  %v575_v27 = vld [vmem:[%s11565_s8 + $0x20] sm:$0xff]  ;;  %v8653_v40 = vld [vmem:[%s9670_s18 + $0x2ac] ss:$48 sps:$4 sm:$0xff]  }
 0x175   : > { %v8607_v19 = vld [vmem:[%s9670_s18 + $0x304] ss:$48 sps:$4 sm:$0xff]   ;;  %v9902_v22 = vpack.c.bf16 %v576_v18, %v573_v15  ;;  %v8612_v52 = vld [vmem:[%s9670_s18 + $0x300] ss:$48 sps:$4 sm:$0xff]   ;;  %v9926_v29 = vpack.c.bf16 %v575_v27, %v572_v12  ;;  %v8651_v41 = vld [vmem:[%s9670_s18 + $0x2a8] ss:$48 sps:$4 sm:$0xff]  }
 0x176   : > { %2386 = vmatpush1.bf16.msra.mxu0 %v8587_v51  ;;  %v8613_v53 = vld [vmem:[%s9670_s18 + $0x364] ss:$48 sps:$4 sm:$0xff]   ;;  %v8618_v57 = vld [vmem:[%s9670_s18 + $0x360] ss:$48 sps:$4 sm:$0xff]   ;;  %v574_v44 = vld [vmem:[%s11565_s8 + $0x18] sm:$0xff] }
 0x177   : > { %2439 = vmatpush1.bf16.msra.mxu1 %v8588_v54  ;;  %2387 = vmatprep.subr.bf16.mxu0 %v8589_v55  ;;  %v8619_v9 = vld [vmem:[%s9670_s18 + $0x3c4] ss:$48 sps:$4 sm:$0xff]   ;;  %v8624_v58 = vld [vmem:[%s9670_s18 + $0x3c0] ss:$48 sps:$4 sm:$0xff]   ;;  %v8657_v45 = vld [vmem:[%s9670_s18 + $0x30c] ss:$48 sps:$4 sm:$0xff]  }
 0x178   : > { %2440 = vmatprep.subr.bf16.mxu1 %v8591_v59  ;;  %v8625_v25 = vld [vmem:[%s9670_s18 + $0x424] ss:$48 sps:$4 sm:$0xff]   ;;  %v8630_v28 = vld [vmem:[%s9670_s18 + $0x420] ss:$48 sps:$4 sm:$0xff]   ;;  %2409 = vmatprep.mubr.bf16.mxu0 %v9926_v29  ;;  %v8655_v47 = vld [vmem:[%s9670_s18 + $0x308] ss:$48 sps:$4 sm:$0xff]  }
 0x179   : > { %v8631_v16 = vld [vmem:[%s9670_s18 + $0x484] ss:$48 sps:$4 sm:$0xff]   ;;  %v8636_v31 = vld [vmem:[%s9670_s18 + $0x480] ss:$48 sps:$4 sm:$0xff]   ;;  %v582_v50 = vld [vmem:[%s11565_s8 + $0x58] sm:$0xff] }
 0x17a   : > { %2388 = vmatpush1.bf16.msra.mxu0 %v8593_v61  ;;  %v8637_v32 = vld [vmem:[%s9670_s18 + $0x4e4] ss:$48 sps:$4 sm:$0xff]   ;;  %v8642_v13 = vld [vmem:[%s9670_s18 + $0x4e0] ss:$48 sps:$4 sm:$0xff]   ;;  %v578_v54 = vld [vmem:[%s11565_s8 + $0x38] sm:$0xff] }
 0x17b   : > { %2441 = vmatpush1.bf16.msra.mxu1 %v8594_v4  ;;  %2389 = vmatprep.subr.bf16.mxu0 %v8595_v62  ;;  %v8643_v35 = vld [vmem:[%s9670_s18 + $0x544] ss:$48 sps:$4 sm:$0xff]   ;;  %v8648_v38 = vld [vmem:[%s9670_s18 + $0x540] ss:$48 sps:$4 sm:$0xff]   ;;  %v8663_v61 = vld [vmem:[%s9670_s18 + $0x36c] ss:$48 sps:$4 sm:$0xff]  }
 0x17c   : > { %2442 = vmatprep.subr.bf16.mxu1 %v8597_v63  ;;  %v8649_v39 = vld [vmem:[%s9670_s18 + $0x5a4] ss:$48 sps:$4 sm:$0xff]   ;;  %v8654_v42 = vld [vmem:[%s9670_s18 + $0x5a0] ss:$48 sps:$4 sm:$0xff]   ;;  %v8661_v62 = vld [vmem:[%s9670_s18 + $0x368] ss:$48 sps:$4 sm:$0xff]  }
 0x17d   : > { %v571_v43 = vld [vmem:[%s11565_s8] sm:$0xff]  ;;  %v581_v55 = vld [vmem:[%s11565_s8 + $0x50] sm:$0xff]  ;;  %v8691_v12 = vld [vmem:[%s9670_s18 + $0x548] ss:$48 sps:$4 sm:$0xff]  }
 0x17e   : > { %2390 = vmatpush1.bf16.msra.mxu0 %v8599_v3  ;;  %v8660_v46 = vld [vmem:[%s9670_s18 + $0x14] ss:$48 sps:$4 sm:$0xff]   ;;  %v8658_v48 = vld [vmem:[%s9670_s18 + $0x10] ss:$48 sps:$4 sm:$0xff]   ;;  %v9961_v51 = vpack.c.bf16 %v574_v44, %v571_v43  ;;  %v9975_v3 = vpack.c.bf16 %v581_v55, %v578_v54  ;;  %v8721_v43 = vld [vmem:[%s9670_s18 + $0x728] ss:$48 sps:$4 sm:$0xff]  }
 0x17f   : > { %2443 = vmatpush1.bf16.msra.mxu1 %v8600_v5  ;;  %2391 = vmatprep.subr.bf16.mxu0 %v8601_v6  ;;  %v579_v49 = vld [vmem:[%s11565_s8 + $0x40] sm:$0xff]  ;;  %v8669_v5 = vld [vmem:[%s9670_s18 + $0x3cc] ss:$48 sps:$4 sm:$0xff]   ;;  %v577_v6 = vld [vmem:[%s11565_s8 + $0x30] sm:$0xff] }
 0x180   : > { %2444 = vmatprep.subr.bf16.mxu1 %v8603_v7  ;;  %v9969_v59 = vpack.c.bf16 %v582_v50, %v579_v49  ;;  %v8666_v4 = vld [vmem:[%s9670_s18 + $0x74] ss:$48 sps:$4 sm:$0xff]   ;;  %v8664_v63 = vld [vmem:[%s9670_s18 + $0x70] ss:$48 sps:$4 sm:$0xff]   ;;  %v580_v7 = vld [vmem:[%s11565_s8 + $0x48] sm:$0xff] }
 0x181   : > { %v8670_v15 = vld [vmem:[%s9670_s18 + $0xd0] ss:$48 sps:$4 sm:$0xff]   ;;  %v9991_v18 = vpack.c.bf16 %v580_v7, %v577_v6  ;;  %v8735_v49 = vld [vmem:[%s9670_s18 + $0x7ec] ss:$48 sps:$4 sm:$0xff]   ;;  %v8738_v50 = vld [vmem:[%s9670_s18 + $0x4f4] ss:$48 sps:$4 sm:$0xff]  }
 0x182   : > { %2392 = vmatpush1.bf16.msra.mxu0 %v8605_v8  ;;  %v8672_v8 = vld [vmem:[%s9670_s18 + $0xd4] ss:$48 sps:$4 sm:$0xff]   ;;  %v8694_v27 = vld [vmem:[%s9670_s18 + $0x250] ss:$48 sps:$4 sm:$0xff]   ;;  %v8733_v54 = vld [vmem:[%s9670_s18 + $0x7e8] ss:$48 sps:$4 sm:$0xff]  }
 0x183   : > { %2445 = vmatpush1.bf16.msra.mxu1 %v8606_v14  ;;  %2393 = vmatprep.subr.bf16.mxu0 %v8607_v19  ;;  %v8667_v14 = vld [vmem:[%s9670_s18 + $0x3c8] ss:$48 sps:$4 sm:$0xff]   ;;  %v8675_v19 = vld [vmem:[%s9670_s18 + $0x42c] ss:$48 sps:$4 sm:$0xff]   ;;  %v8724_v44 = vld [vmem:[%s9670_s18 + $0x430] ss:$48 sps:$4 sm:$0xff]  }
 0x184   : > { %2483 = vmatprep.subr.bf16.mxu1 %v8611_v20  ;;  %v8678_v20 = vld [vmem:[%s9670_s18 + $0x134] ss:$48 sps:$4 sm:$0xff]   ;;  %v8736_v55 = vld [vmem:[%s9670_s18 + $0x4f0] ss:$48 sps:$4 sm:$0xff]   ;;  %v8745_v7 = vld [vmem:[%s9670_s18 + $0x8a8] ss:$48 sps:$4 sm:$0xff]  }
 0x185   : > { %v8750_v6 = vld [vmem:[%s9670_s18 + $0x5b4] ss:$48 sps:$4 sm:$0xff]  }
 0x186   : > { %2463 = vmatmul.mubr.bf16.vlgmr.msra.gmra.mrb[0].mxu1 %v9902_v22  ;;  %2394 = vmatpush1.bf16.msra.mxu0 %v8612_v52  ;;  %v8676_v52 = vld [vmem:[%s9670_s18 + $0x130] ss:$48 sps:$4 sm:$0xff]  }
 0x187   : > { %2484 = vmatpush1.bf16.msra.mxu1 %v8609_v23  ;;  %2395 = vmatprep.subr.bf16.mxu0 %v8613_v53  ;;  %v8673_v23 = vld [vmem:[%s9670_s18 + $0x428] ss:$48 sps:$4 sm:$0xff]   ;;  %v8681_v53 = vld [vmem:[%s9670_s18 + $0x48c] ss:$48 sps:$4 sm:$0xff]  }
 0x188   : > { %2485 = vmatprep.subr.bf16.mxu1 %v8617_v24  ;;  %2472 = vmatprep.mubr.bf16.mxu1 %v9598_v34  ;;  %v8684_v24 = vld [vmem:[%s9670_s18 + $0x194] ss:$48 sps:$4 sm:$0xff]  }
 0x18a   : > { %2396 = vmatpush1.bf16.msra.mxu0 %v8618_v57  ;;  %v8682_v57 = vld [vmem:[%s9670_s18 + $0x190] ss:$48 sps:$4 sm:$0xff]  }
 0x18b   : > { %2486 = vmatpush1.bf16.msra.mxu1 %v8615_v56  ;;  %2397 = vmatprep.subr.bf16.mxu0 %v8619_v9  ;;  %v8679_v56 = vld [vmem:[%s9670_s18 + $0x488] ss:$48 sps:$4 sm:$0xff]   ;;  %v8687_v9 = vld [vmem:[%s9670_s18 + $0x4ec] ss:$48 sps:$4 sm:$0xff]  }
 0x18c   : > { %2487 = vmatprep.subr.bf16.mxu1 %v8623_v10  ;;  %v8690_v10 = vld [vmem:[%s9670_s18 + $0x1f4] ss:$48 sps:$4 sm:$0xff]  }
 0x18e   : > { %2398 = vmatpush1.bf16.msra.mxu0 %v8624_v58  ;;  %2473 = vmatmul.mubr.bf16.gmra.mrb[4].mxu1 %v9969_v59  ;;  %v8688_v58 = vld [vmem:[%s9670_s18 + $0x1f0] ss:$48 sps:$4 sm:$0xff]  }
 0x18f   : > { %2488 = vmatpush1.bf16.msra.mxu1 %v8621_v21  ;;  %2399 = vmatprep.subr.bf16.mxu0 %v8625_v25  ;;  %v8685_v21 = vld [vmem:[%s9670_s18 + $0x4e8] ss:$48 sps:$4 sm:$0xff]   ;;  %v8693_v25 = vld [vmem:[%s9670_s18 + $0x54c] ss:$48 sps:$4 sm:$0xff]  }
 0x190   : > { %2489 = vmatprep.subr.bf16.mxu1 %v8629_v11  ;;  %2515 = vmatprep.mubr.bf16.mxu1 %v9926_v29  ;;  %v8696_v11 = vld [vmem:[%s9670_s18 + $0x254] ss:$48 sps:$4 sm:$0xff]  }
 0x192   : > { %2400 = vmatpush1.bf16.msra.mxu0 %v8630_v28  ;;  %v8702_v28 = vld [vmem:[%s9670_s18 + $0x2b4] ss:$48 sps:$4 sm:$0xff]  }
 0x193   : > { %2490 = vmatpush1.bf16.msra.mxu1 %v8627_v60  ;;  %2401 = vmatprep.subr.bf16.mxu0 %v8631_v16  ;;  %v8699_v60 = vld [vmem:[%s9670_s18 + $0x5ac] ss:$48 sps:$4 sm:$0xff]   ;;  %v8697_v16 = vld [vmem:[%s9670_s18 + $0x5a8] ss:$48 sps:$4 sm:$0xff]  }
 0x194   : > { %2491 = vmatprep.subr.bf16.mxu1 %v8635_v17  ;;  %v8700_v17 = vld [vmem:[%s9670_s18 + $0x2b0] ss:$48 sps:$4 sm:$0xff]  }
 0x196   : > { %2402 = vmatpush1.bf16.msra.mxu0 %v8636_v31  ;;  %v8708_v31 = vld [vmem:[%s9670_s18 + $0x314] ss:$48 sps:$4 sm:$0xff]  }
 0x197   : > { %2492 = vmatpush1.bf16.msra.mxu1 %v8633_v30  ;;  %2403 = vmatprep.subr.bf16.mxu0 %v8637_v32  ;;  %v8705_v30 = vld [vmem:[%s9670_s18 + $0x60c] ss:$48 sps:$4 sm:$0xff]   ;;  %v8703_v32 = vld [vmem:[%s9670_s18 + $0x608] ss:$48 sps:$4 sm:$0xff]  }
 0x198   : > { %2493 = vmatprep.subr.bf16.mxu1 %v8641_v33  ;;  %v8706_v33 = vld [vmem:[%s9670_s18 + $0x310] ss:$48 sps:$4 sm:$0xff]  }
 0x19a   : > { %2404 = vmatpush1.bf16.msra.mxu0 %v8642_v13  ;;  %v8714_v13 = vld [vmem:[%s9670_s18 + $0x374] ss:$48 sps:$4 sm:$0xff]  }
 0x19b   : > { %2494 = vmatpush1.bf16.msra.mxu1 %v8639_v26  ;;  %2405 = vmatprep.subr.bf16.mxu0 %v8643_v35  ;;  %v8711_v26 = vld [vmem:[%s9670_s18 + $0x66c] ss:$48 sps:$4 sm:$0xff]   ;;  %v8709_v35 = vld [vmem:[%s9670_s18 + $0x668] ss:$48 sps:$4 sm:$0xff]  }
 0x19c   : > { %2495 = vmatprep.subr.bf16.mxu1 %v8647_v36  ;;  %v8712_v36 = vld [vmem:[%s9670_s18 + $0x370] ss:$48 sps:$4 sm:$0xff]  }
 0x19e   : > { %2406 = vmatpush1.bf16.msra.mxu0 %v8648_v38  ;;  %v8720_v38 = vld [vmem:[%s9670_s18 + $0x3d4] ss:$48 sps:$4 sm:$0xff]  }
 0x19f   : > { %2496 = vmatpush1.bf16.msra.mxu1 %v8645_v37  ;;  %2407 = vmatprep.subr.bf16.mxu0 %v8649_v39  ;;  %v8717_v37 = vld [vmem:[%s9670_s18 + $0x6cc] ss:$48 sps:$4 sm:$0xff]   ;;  %v8715_v39 = vld [vmem:[%s9670_s18 + $0x6c8] ss:$48 sps:$4 sm:$0xff]  }
 0x1a0   : > { %2497 = vmatprep.subr.bf16.mxu1 %v8653_v40  ;;  %v8718_v40 = vld [vmem:[%s9670_s18 + $0x3d0] ss:$48 sps:$4 sm:$0xff]  }
 0x1a2   : > { %2408 = vmatpush1.bf16.msra.mxu0 %v8654_v42  ;;  %v8726_v42 = vld [vmem:[%s9670_s18 + $0x434] ss:$48 sps:$4 sm:$0xff]  }
 0x1a3   : > { %2498 = vmatpush1.bf16.msra.mxu1 %v8651_v41  ;;  %2589 = vmatprep.subr.bf16.mxu0 %v8660_v46  ;;  %v8723_v41 = vld [vmem:[%s9670_s18 + $0x72c] ss:$48 sps:$4 sm:$0xff]   ;;  %v8732_v46 = vld [vmem:[%s9670_s18 + $0x494] ss:$48 sps:$4 sm:$0xff]  }
 0x1a4   : > { %2499 = vmatprep.subr.bf16.mxu1 %v8657_v45  ;;  %v8729_v45 = vld [vmem:[%s9670_s18 + $0x78c] ss:$48 sps:$4 sm:$0xff]  }
 0x1a5   : > { %2410 = vmatmul.mubr.bf16.vlgmr.msra.gmra.mrb[0].mxu0 %v9961_v51 }
 0x1a6   : > { %2590 = vmatpush1.bf16.msra.mxu0 %v8658_v48  ;;  %2419 = vmatprep.mubr.bf16.mxu0 %v9975_v3  ;;  %v8730_v48 = vld [vmem:[%s9670_s18 + $0x490] ss:$48 sps:$4 sm:$0xff]  }
 0x1a7   : > { %2500 = vmatpush1.bf16.msra.mxu1 %v8655_v47  ;;  %2591 = vmatprep.subr.bf16.mxu0 %v8666_v4  ;;  %v8727_v47 = vld [vmem:[%s9670_s18 + $0x788] ss:$48 sps:$4 sm:$0xff]   ;;  %v8744_v4 = vld [vmem:[%s9670_s18 + $0x554] ss:$48 sps:$4 sm:$0xff]  }
 0x1a8   : > { %2501 = vmatprep.subr.bf16.mxu1 %v8663_v61  ;;  %v8741_v61 = vld [vmem:[%s9670_s18 + $0x84c] ss:$48 sps:$4 sm:$0xff]  }
 0x1aa   : > { %2592 = vmatpush1.bf16.msra.mxu0 %v8664_v63  ;;  %v8742_v63 = vld [vmem:[%s9670_s18 + $0x550] ss:$48 sps:$4 sm:$0xff]  }
 0x1ab   : > { %2502 = vmatpush1.bf16.msra.mxu1 %v8661_v62  ;;  %2593 = vmatprep.subr.bf16.mxu0 %v8672_v8  ;;  %v8739_v62 = vld [vmem:[%s9670_s18 + $0x848] ss:$48 sps:$4 sm:$0xff]   ;;  %v8748_v8 = vld [vmem:[%s9670_s18 + $0x5b0] ss:$48 sps:$4 sm:$0xff]  }
 0x1ac   : > { %2503 = vmatprep.subr.bf16.mxu1 %v8669_v5  ;;  %v8747_v5 = vld [vmem:[%s9670_s18 + $0x8ac] ss:$48 sps:$4 sm:$0xff]  }
 0x1ad   : > { %2420 = vmatmul.mubr.bf16.gmra.mrb[4].mxu0 %v9991_v18 }
 0x1ae   : > { %2594 = vmatpush1.bf16.msra.mxu0 %v8670_v15  ;;  %2621 = vmatprep.mubr.bf16.mxu0 %v9926_v29  ;;  %v8756_v15 = vld [vmem:[%s9670_s18 + $0x1c] ss:$48 sps:$4 sm:$0xff]  }
 0x1af   : > { %2504 = vmatpush1.bf16.msra.mxu1 %v8667_v14  ;;  %2595 = vmatprep.subr.bf16.mxu0 %v8678_v20  ;;  %v8753_v14 = vld [vmem:[%s9670_s18 + $0x614] ss:$48 sps:$4 sm:$0xff]   ;;  %v8754_v20 = vld [vmem:[%s9670_s18 + $0x18] ss:$48 sps:$4 sm:$0xff]  }
 0x1b0   : > { %2505 = vmatprep.subr.bf16.mxu1 %v8675_v19  ;;  %v8751_v19 = vld [vmem:[%s9670_s18 + $0x610] ss:$48 sps:$4 sm:$0xff]  }
 0x1b2   : > { %2596 = vmatpush1.bf16.msra.mxu0 %v8676_v52  ;;  %v8762_v52 = vld [vmem:[%s9670_s18 + $0x7c] ss:$48 sps:$4 sm:$0xff]  }
 0x1b3   : > { %2506 = vmatpush1.bf16.msra.mxu1 %v8673_v23  ;;  %2597 = vmatprep.subr.bf16.mxu0 %v8684_v24  ;;  %v8759_v23 = vld [vmem:[%s9670_s18 + $0x674] ss:$48 sps:$4 sm:$0xff]   ;;  %v8760_v24 = vld [vmem:[%s9670_s18 + $0x78] ss:$48 sps:$4 sm:$0xff]  }
 0x1b4   : > { %2507 = vmatprep.subr.bf16.mxu1 %v8681_v53  ;;  %v8757_v53 = vld [vmem:[%s9670_s18 + $0x670] ss:$48 sps:$4 sm:$0xff]  }
 0x1b6   : > { %2598 = vmatpush1.bf16.msra.mxu0 %v8682_v57  ;;  %v8768_v57 = vld [vmem:[%s9670_s18 + $0xdc] ss:$48 sps:$4 sm:$0xff]  }
 0x1b7   : > { %2508 = vmatpush1.bf16.msra.mxu1 %v8679_v56  ;;  %2599 = vmatprep.subr.bf16.mxu0 %v8690_v10  ;;  %v8765_v56 = vld [vmem:[%s9670_s18 + $0x6d4] ss:$48 sps:$4 sm:$0xff]   ;;  %v8766_v10 = vld [vmem:[%s9670_s18 + $0xd8] ss:$48 sps:$4 sm:$0xff]  }
 0x1b8   : > { %2509 = vmatprep.subr.bf16.mxu1 %v8687_v9  ;;  %v8763_v9 = vld [vmem:[%s9670_s18 + $0x6d0] ss:$48 sps:$4 sm:$0xff]  }
 0x1ba   : > { %2600 = vmatpush1.bf16.msra.mxu0 %v8688_v58  ;;  %v8774_v58 = vld [vmem:[%s9670_s18 + $0x13c] ss:$48 sps:$4 sm:$0xff]  }
 0x1bb   : > { %2510 = vmatpush1.bf16.msra.mxu1 %v8685_v21  ;;  %2601 = vmatprep.subr.bf16.mxu0 %v8696_v11  ;;  %v8771_v21 = vld [vmem:[%s9670_s18 + $0x734] ss:$48 sps:$4 sm:$0xff]   ;;  %v8772_v11 = vld [vmem:[%s9670_s18 + $0x138] ss:$48 sps:$4 sm:$0xff]  }
 0x1bc   : > { %2511 = vmatprep.subr.bf16.mxu1 %v8693_v25  ;;  %v8769_v25 = vld [vmem:[%s9670_s18 + $0x730] ss:$48 sps:$4 sm:$0xff]  }
 0x1be   : > { %2602 = vmatpush1.bf16.msra.mxu0 %v8694_v27  ;;  %v8780_v27 = vld [vmem:[%s9670_s18 + $0x19c] ss:$48 sps:$4 sm:$0xff]  }
 0x1bf   : > { %2512 = vmatpush1.bf16.msra.mxu1 %v8691_v12  ;;  %2603 = vmatprep.subr.bf16.mxu0 %v8702_v28  ;;  %v8777_v12 = vld [vmem:[%s9670_s18 + $0x794] ss:$48 sps:$4 sm:$0xff]   ;;  %v8778_v28 = vld [vmem:[%s9670_s18 + $0x198] ss:$48 sps:$4 sm:$0xff]  }
 0x1c0   : > { %2513 = vmatprep.subr.bf16.mxu1 %v8699_v60  ;;  %v8775_v60 = vld [vmem:[%s9670_s18 + $0x790] ss:$48 sps:$4 sm:$0xff]  }
 0x1c2   : > { %2604 = vmatpush1.bf16.msra.mxu0 %v8700_v17  ;;  %v8786_v17 = vld [vmem:[%s9670_s18 + $0x1fc] ss:$48 sps:$4 sm:$0xff]  }
 0x1c3   : > { %2514 = vmatpush1.bf16.msra.mxu1 %v8697_v16  ;;  %2605 = vmatprep.subr.bf16.mxu0 %v8708_v31  ;;  %v8783_v16 = vld [vmem:[%s9670_s18 + $0x7f4] ss:$48 sps:$4 sm:$0xff]   ;;  %v8784_v31 = vld [vmem:[%s9670_s18 + $0x1f8] ss:$48 sps:$4 sm:$0xff]  }
 0x1c4   : > { %2536 = vmatprep.subr.bf16.mxu1 %v8705_v30  ;;  %v8781_v30 = vld [vmem:[%s9670_s18 + $0x7f0] ss:$48 sps:$4 sm:$0xff]  }
 0x1c6   : > { %2516 = vmatmul.mubr.bf16.vlgmr.msra.gmra.mrb[8].mxu1 %v9961_v51  ;;  %2606 = vmatpush1.bf16.msra.mxu0 %v8706_v33  ;;  %v8792_v33 = vld [vmem:[%s9670_s18 + $0x25c] ss:$48 sps:$4 sm:$0xff]  }
 0x1c7   : > { %2537 = vmatpush1.bf16.msra.mxu1 %v8703_v32  ;;  %2607 = vmatprep.subr.bf16.mxu0 %v8714_v13  ;;  %v8789_v32 = vld [vmem:[%s9670_s18 + $0x854] ss:$48 sps:$4 sm:$0xff]   ;;  %v8790_v13 = vld [vmem:[%s9670_s18 + $0x258] ss:$48 sps:$4 sm:$0xff]  }
 0x1c8   : > { %2538 = vmatprep.subr.bf16.mxu1 %v8711_v26  ;;  %2525 = vmatprep.mubr.bf16.mxu1 %v9975_v3  ;;  %v8787_v26 = vld [vmem:[%s9670_s18 + $0x850] ss:$48 sps:$4 sm:$0xff]  }
 0x1ca   : > { %2608 = vmatpush1.bf16.msra.mxu0 %v8712_v36  ;;  %v8798_v36 = vld [vmem:[%s9670_s18 + $0x2bc] ss:$48 sps:$4 sm:$0xff]  }
 0x1cb   : > { %2539 = vmatpush1.bf16.msra.mxu1 %v8709_v35  ;;  %2609 = vmatprep.subr.bf16.mxu0 %v8720_v38  ;;  %v8795_v35 = vld [vmem:[%s9670_s18 + $0x8b4] ss:$48 sps:$4 sm:$0xff]   ;;  %v8796_v38 = vld [vmem:[%s9670_s18 + $0x2b8] ss:$48 sps:$4 sm:$0xff]  }
 0x1cc   : > { %2540 = vmatprep.subr.bf16.mxu1 %v8717_v37  ;;  %v8793_v37 = vld [vmem:[%s9670_s18 + $0x8b0] ss:$48 sps:$4 sm:$0xff]  }
 0x1ce   : > { %2526 = vmatmul.mubr.bf16.gmra.mrb[12].mxu1 %v9991_v18  ;;  %2610 = vmatpush1.bf16.msra.mxu0 %v8718_v40  ;;  %v8816_v40 = vld [vmem:[%s9670_s18 + $0x24] ss:$48 sps:$4 sm:$0xff]  }
 0x1cf   : > { %2541 = vmatpush1.bf16.msra.mxu1 %v8715_v39  ;;  %2611 = vmatprep.subr.bf16.mxu0 %v8726_v42  ;;  %v8801_v39 = vld [vmem:[%s9670_s18 + $0x31c] ss:$48 sps:$4 sm:$0xff]  }
 0x1d0   : > { %2542 = vmatprep.subr.bf16.mxu1 %v8723_v41  ;;  %2568 = vmatprep.mubr.bf16.mxu1 %v9598_v34  ;;  %v8799_v41 = vld [vmem:[%s9670_s18 + $0x318] ss:$48 sps:$4 sm:$0xff]   ;;  %v8804_v42 = vld [vmem:[%s9670_s18 + $0x37c] ss:$48 sps:$4 sm:$0xff]  }
 0x1d2   : > { %2612 = vmatpush1.bf16.msra.mxu0 %v8724_v44  ;;  %v8822_v44 = vld [vmem:[%s9670_s18 + $0x84] ss:$48 sps:$4 sm:$0xff]  }
 0x1d3   : > { %2543 = vmatpush1.bf16.msra.mxu1 %v8721_v43  ;;  %2613 = vmatprep.subr.bf16.mxu0 %v8732_v46  ;;  %v8814_v43 = vld [vmem:[%s9670_s18 + $0x20] ss:$48 sps:$4 sm:$0xff]   ;;  %v8807_v46 = vld [vmem:[%s9670_s18 + $0x3dc] ss:$48 sps:$4 sm:$0xff]  }
 0x1d4   : > { %2544 = vmatprep.subr.bf16.mxu1 %v8729_v45  ;;  %v8802_v45 = vld [vmem:[%s9670_s18 + $0x378] ss:$48 sps:$4 sm:$0xff]  }
 0x1d6   : > { %2614 = vmatpush1.bf16.msra.mxu0 %v8730_v48  ;;  %v8828_v48 = vld [vmem:[%s9670_s18 + $0xe4] ss:$48 sps:$4 sm:$0xff]  }
 0x1d7   : > { %2545 = vmatpush1.bf16.msra.mxu1 %v8727_v47  ;;  %2615 = vmatprep.subr.bf16.mxu0 %v8738_v50  ;;  %v8820_v47 = vld [vmem:[%s9670_s18 + $0x80] ss:$48 sps:$4 sm:$0xff]   ;;  %v8810_v50 = vld [vmem:[%s9670_s18 + $0x43c] ss:$48 sps:$4 sm:$0xff]  }
 0x1d8   : > { %2546 = vmatprep.subr.bf16.mxu1 %v8735_v49  ;;  %v8805_v49 = vld [vmem:[%s9670_s18 + $0x3d8] ss:$48 sps:$4 sm:$0xff]  }
 0x1da   : > { %2616 = vmatpush1.bf16.msra.mxu0 %v8736_v55  ;;  %v8834_v55 = vld [vmem:[%s9670_s18 + $0x144] ss:$48 sps:$4 sm:$0xff]  }
 0x1db   : > { %2547 = vmatpush1.bf16.msra.mxu1 %v8733_v54  ;;  %2617 = vmatprep.subr.bf16.mxu0 %v8744_v4  ;;  %v8826_v54 = vld [vmem:[%s9670_s18 + $0xe0] ss:$48 sps:$4 sm:$0xff]   ;;  %v8813_v4 = vld [vmem:[%s9670_s18 + $0x49c] ss:$48 sps:$4 sm:$0xff]  }
 0x1dc   : > { %2548 = vmatprep.subr.bf16.mxu1 %v8741_v61  ;;  %v8808_v61 = vld [vmem:[%s9670_s18 + $0x438] ss:$48 sps:$4 sm:$0xff]  }
 0x1de   : > { %2618 = vmatpush1.bf16.msra.mxu0 %v8742_v63  ;;  %v8840_v63 = vld [vmem:[%s9670_s18 + $0x1a4] ss:$48 sps:$4 sm:$0xff]  }
 0x1df   : > { %2549 = vmatpush1.bf16.msra.mxu1 %v8739_v62  ;;  %2619 = vmatprep.subr.bf16.mxu0 %v8750_v6  ;;  %v8832_v62 = vld [vmem:[%s9670_s18 + $0x140] ss:$48 sps:$4 sm:$0xff]   ;;  %v8819_v6 = vld [vmem:[%s9670_s18 + $0x4fc] ss:$48 sps:$4 sm:$0xff]  }
 0x1e0   : > { %2550 = vmatprep.subr.bf16.mxu1 %v8747_v5  ;;  %v8811_v5 = vld [vmem:[%s9670_s18 + $0x498] ss:$48 sps:$4 sm:$0xff]  }
 0x1e2   : > { %2620 = vmatpush1.bf16.msra.mxu0 %v8748_v8  ;;  %v8846_v8 = vld [vmem:[%s9670_s18 + $0x204] ss:$48 sps:$4 sm:$0xff]  }
 0x1e3   : > { %2551 = vmatpush1.bf16.msra.mxu1 %v8745_v7  ;;  %2642 = vmatprep.subr.bf16.mxu0 %v8753_v14  ;;  %v8838_v7 = vld [vmem:[%s9670_s18 + $0x1a0] ss:$48 sps:$4 sm:$0xff]   ;;  %v8817_v14 = vld [vmem:[%s9670_s18 + $0x4f8] ss:$48 sps:$4 sm:$0xff]  }
 0x1e4   : > { %2695 = vmatprep.subr.bf16.mxu1 %v8756_v15  ;;  %v8825_v15 = vld [vmem:[%s9670_s18 + $0x55c] ss:$48 sps:$4 sm:$0xff]  }
 0x1e5   : > { %2622 = vmatmul.mubr.bf16.vlgmr.msra.gmra.mrb[8].mxu0 %v9961_v51 }
 0x1e6   : > { %2569 = vmatmul.mubr.bf16.vlgmr.msra.gmra.mrb[8].mxu1 %v9902_v22  ;;  %2643 = vmatpush1.bf16.msra.mxu0 %v8751_v19  ;;  %v8844_v19 = vld [vmem:[%s9670_s18 + $0x200] ss:$48 sps:$4 sm:$0xff]  }
 0x1e7   : > { %2696 = vmatpush1.bf16.msra.mxu1 %v8754_v20  ;;  %2644 = vmatprep.subr.bf16.mxu0 %v8759_v23  ;;  %v8852_v20 = vld [vmem:[%s9670_s18 + $0x264] ss:$48 sps:$4 sm:$0xff]   ;;  %v8823_v23 = vld [vmem:[%s9670_s18 + $0x558] ss:$48 sps:$4 sm:$0xff]  }
 0x1e8   : > { %2697 = vmatprep.subr.bf16.mxu1 %v8762_v52  ;;  %2578 = vmatprep.mubr.bf16.mxu1 %v9598_v34  ;;  %v8831_v52 = vld [vmem:[%s9670_s18 + $0x5bc] ss:$48 sps:$4 sm:$0xff]  }
 0x1e9   : > { %2631 = vmatprep.mubr.bf16.mxu0 %v9975_v3 }
 0x1ea   : > { %2645 = vmatpush1.bf16.msra.mxu0 %v8757_v53  ;;  %v8850_v53 = vld [vmem:[%s9670_s18 + $0x260] ss:$48 sps:$4 sm:$0xff]  }
 0x1eb   : > { %2698 = vmatpush1.bf16.msra.mxu1 %v8760_v24  ;;  %2646 = vmatprep.subr.bf16.mxu0 %v8765_v56  ;;  %v8858_v24 = vld [vmem:[%s9670_s18 + $0x2c4] ss:$48 sps:$4 sm:$0xff]   ;;  %v8829_v56 = vld [vmem:[%s9670_s18 + $0x5b8] ss:$48 sps:$4 sm:$0xff]  }
 0x1ec   : > { %2699 = vmatprep.subr.bf16.mxu1 %v8768_v57  ;;  %v8837_v57 = vld [vmem:[%s9670_s18 + $0x61c] ss:$48 sps:$4 sm:$0xff]  }
 0x1ed   : > { %2632 = vmatmul.mubr.bf16.gmra.mrb[12].mxu0 %v9991_v18 }
 0x1ee   : > { %2579 = vmatmul.mubr.bf16.gmra.mrb[12].mxu1 %v9969_v59  ;;  %2647 = vmatpush1.bf16.msra.mxu0 %v8763_v9  ;;  %v8856_v9 = vld [vmem:[%s9670_s18 + $0x2c0] ss:$48 sps:$4 sm:$0xff]  }
 0x1ef   : > { %2700 = vmatpush1.bf16.msra.mxu1 %v8766_v10  ;;  %2648 = vmatprep.subr.bf16.mxu0 %v8771_v21  ;;  %v8864_v10 = vld [vmem:[%s9670_s18 + $0x324] ss:$48 sps:$4 sm:$0xff]   ;;  %v8835_v21 = vld [vmem:[%s9670_s18 + $0x618] ss:$48 sps:$4 sm:$0xff]  }
 0x1f0   : > { %2701 = vmatprep.subr.bf16.mxu1 %v8774_v58  ;;  %2674 = vmatprep.mubr.bf16.mxu0 %v9598_v34  ;;  %v8843_v58 = vld [vmem:[%s9670_s18 + $0x67c] ss:$48 sps:$4 sm:$0xff]  }
 0x1f1   : > { %2727 = vmatprep.mubr.bf16.mxu1 %v9926_v29 }
 0x1f2   : > { %2649 = vmatpush1.bf16.msra.mxu0 %v8769_v25  ;;  %v8862_v25 = vld [vmem:[%s9670_s18 + $0x320] ss:$48 sps:$4 sm:$0xff]  }
 0x1f3   : > { %2702 = vmatpush1.bf16.msra.mxu1 %v8772_v11  ;;  %2650 = vmatprep.subr.bf16.mxu0 %v8777_v12  ;;  %v8841_v11 = vld [vmem:[%s9670_s18 + $0x678] ss:$48 sps:$4 sm:$0xff]   ;;  %v8870_v12 = vld [vmem:[%s9670_s18 + $0x384] ss:$48 sps:$4 sm:$0xff]  }
 0x1f4   : > { %2703 = vmatprep.subr.bf16.mxu1 %v8780_v27  ;;  %v8849_v27 = vld [vmem:[%s9670_s18 + $0x6dc] ss:$48 sps:$4 sm:$0xff]  }
 0x1f6   : > { %2651 = vmatpush1.bf16.msra.mxu0 %v8775_v60  ;;  %v8868_v60 = vld [vmem:[%s9670_s18 + $0x380] ss:$48 sps:$4 sm:$0xff]  }
 0x1f7   : > { %2704 = vmatpush1.bf16.msra.mxu1 %v8778_v28  ;;  %2652 = vmatprep.subr.bf16.mxu0 %v8783_v16  ;;  %v8876_v28 = vld [vmem:[%s9670_s18 + $0x3e4] ss:$48 sps:$4 sm:$0xff]   ;;  %v8847_v16 = vld [vmem:[%s9670_s18 + $0x6d8] ss:$48 sps:$4 sm:$0xff]  }
 0x1f8   : > { %2705 = vmatprep.subr.bf16.mxu1 %v8786_v17  ;;  %v8855_v17 = vld [vmem:[%s9670_s18 + $0x73c] ss:$48 sps:$4 sm:$0xff]  }
 0x1fa   : > { %2653 = vmatpush1.bf16.msra.mxu0 %v8781_v30  ;;  %v8874_v30 = vld [vmem:[%s9670_s18 + $0x3e0] ss:$48 sps:$4 sm:$0xff]  }
 0x1fb   : > { %2706 = vmatpush1.bf16.msra.mxu1 %v8784_v31  ;;  %2654 = vmatprep.subr.bf16.mxu0 %v8789_v32  ;;  %v8882_v31 = vld [vmem:[%s9670_s18 + $0x444] ss:$48 sps:$4 sm:$0xff]   ;;  %v8853_v32 = vld [vmem:[%s9670_s18 + $0x738] ss:$48 sps:$4 sm:$0xff]  }
 0x1fc   : > { %2707 = vmatprep.subr.bf16.mxu1 %v8792_v33  ;;  %v8861_v33 = vld [vmem:[%s9670_s18 + $0x79c] ss:$48 sps:$4 sm:$0xff]  }
 0x1fe   : > { %2655 = vmatpush1.bf16.msra.mxu0 %v8787_v26  ;;  %v8880_v26 = vld [vmem:[%s9670_s18 + $0x440] ss:$48 sps:$4 sm:$0xff]  }
 0x1ff   : > { %2708 = vmatpush1.bf16.msra.mxu1 %v8790_v13  ;;  %2656 = vmatprep.subr.bf16.mxu0 %v8795_v35  ;;  %v8888_v13 = vld [vmem:[%s9670_s18 + $0x4a4] ss:$48 sps:$4 sm:$0xff]   ;;  %v8859_v35 = vld [vmem:[%s9670_s18 + $0x798] ss:$48 sps:$4 sm:$0xff]  }
 0x200   : > { %2709 = vmatprep.subr.bf16.mxu1 %v8798_v36  ;;  %v8867_v36 = vld [vmem:[%s9670_s18 + $0x7fc] ss:$48 sps:$4 sm:$0xff]  }
 0x202   : > { %2657 = vmatpush1.bf16.msra.mxu0 %v8793_v37  ;;  %v8886_v37 = vld [vmem:[%s9670_s18 + $0x4a0] ss:$48 sps:$4 sm:$0xff]  }
 0x203   : > { %2710 = vmatpush1.bf16.msra.mxu1 %v8796_v38  ;;  %2801 = vmatprep.subr.bf16.mxu0 %v8816_v40  ;;  %v8894_v38 = vld [vmem:[%s9670_s18 + $0x504] ss:$48 sps:$4 sm:$0xff]   ;;  %v8873_v40 = vld [vmem:[%s9670_s18 + $0x85c] ss:$48 sps:$4 sm:$0xff]  }
 0x204   : > { %2711 = vmatprep.subr.bf16.mxu1 %v8801_v39  ;;  %v8865_v39 = vld [vmem:[%s9670_s18 + $0x7f8] ss:$48 sps:$4 sm:$0xff]  }
 0x205   : > { %2675 = vmatmul.mubr.bf16.vlgmr.msra.gmra.mrb[8].mxu0 %v9902_v22 }
 0x206   : > { %2684 = vmatprep.mubr.bf16.mxu0 %v9598_v34  ;;  %2802 = vmatpush1.bf16.msra.mxu0 %v8814_v43  ;;  %v8871_v43 = vld [vmem:[%s9670_s18 + $0x858] ss:$48 sps:$4 sm:$0xff]  }
 0x207   : > { %2712 = vmatpush1.bf16.msra.mxu1 %v8799_v41  ;;  %2803 = vmatprep.subr.bf16.mxu0 %v8822_v44  ;;  %v8892_v41 = vld [vmem:[%s9670_s18 + $0x500] ss:$48 sps:$4 sm:$0xff]   ;;  %v8879_v44 = vld [vmem:[%s9670_s18 + $0x8bc] ss:$48 sps:$4 sm:$0xff]  }
 0x208   : > { %2713 = vmatprep.subr.bf16.mxu1 %v8804_v42  ;;  %v8900_v42 = vld [vmem:[%s9670_s18 + $0x564] ss:$48 sps:$4 sm:$0xff]  }
 0x20a   : > { %2804 = vmatpush1.bf16.msra.mxu0 %v8820_v47  ;;  %v8877_v47 = vld [vmem:[%s9670_s18 + $0x8b8] ss:$48 sps:$4 sm:$0xff]  }
 0x20b   : > { %2714 = vmatpush1.bf16.msra.mxu1 %v8802_v45  ;;  %2805 = vmatprep.subr.bf16.mxu0 %v8828_v48  ;;  %v8898_v45 = vld [vmem:[%s9670_s18 + $0x560] ss:$48 sps:$4 sm:$0xff]   ;;  %v8885_v48 = vld [vmem:[%s9670_s18 + $0x2c] ss:$48 sps:$4 sm:$0xff]  }
 0x20c   : > { %2715 = vmatprep.subr.bf16.mxu1 %v8807_v46  ;;  %v8906_v46 = vld [vmem:[%s9670_s18 + $0x5c4] ss:$48 sps:$4 sm:$0xff]  }
 0x20d   : > { %2685 = vmatmul.mubr.bf16.gmra.mrb[12].mxu0 %v9969_v59 }
 0x20e   : > { %2833 = vmatprep.mubr.bf16.mxu0 %v9926_v29  ;;  %2806 = vmatpush1.bf16.msra.mxu0 %v8826_v54  ;;  %v8883_v54 = vld [vmem:[%s9670_s18 + $0x28] ss:$48 sps:$4 sm:$0xff]  }
 0x20f   : > { %2716 = vmatpush1.bf16.msra.mxu1 %v8805_v49  ;;  %2807 = vmatprep.subr.bf16.mxu0 %v8834_v55  ;;  %v8904_v49 = vld [vmem:[%s9670_s18 + $0x5c0] ss:$48 sps:$4 sm:$0xff]   ;;  %v8891_v55 = vld [vmem:[%s9670_s18 + $0x8c] ss:$48 sps:$4 sm:$0xff]  }
 0x210   : > { %2717 = vmatprep.subr.bf16.mxu1 %v8810_v50  ;;  %v8912_v50 = vld [vmem:[%s9670_s18 + $0x624] ss:$48 sps:$4 sm:$0xff]  }
 0x212   : > { %2808 = vmatpush1.bf16.msra.mxu0 %v8832_v62  ;;  %v8889_v62 = vld [vmem:[%s9670_s18 + $0x88] ss:$48 sps:$4 sm:$0xff]  }
 0x213   : > { %2718 = vmatpush1.bf16.msra.mxu1 %v8808_v61  ;;  %2809 = vmatprep.subr.bf16.mxu0 %v8840_v63  ;;  %v8910_v61 = vld [vmem:[%s9670_s18 + $0x620] ss:$48 sps:$4 sm:$0xff]   ;;  %v8897_v63 = vld [vmem:[%s9670_s18 + $0xec] ss:$48 sps:$4 sm:$0xff]  }
 0x214   : > { %2719 = vmatprep.subr.bf16.mxu1 %v8813_v4  ;;  %v8918_v4 = vld [vmem:[%s9670_s18 + $0x684] ss:$48 sps:$4 sm:$0xff]  }
 0x216   : > { %2810 = vmatpush1.bf16.msra.mxu0 %v8838_v7  ;;  %v8895_v7 = vld [vmem:[%s9670_s18 + $0xe8] ss:$48 sps:$4 sm:$0xff]  }
 0x217   : > { %2720 = vmatpush1.bf16.msra.mxu1 %v8811_v5  ;;  %2811 = vmatprep.subr.bf16.mxu0 %v8846_v8  ;;  %v8916_v5 = vld [vmem:[%s9670_s18 + $0x680] ss:$48 sps:$4 sm:$0xff]   ;;  %v8903_v8 = vld [vmem:[%s9670_s18 + $0x14c] ss:$48 sps:$4 sm:$0xff]  }
 0x218   : > { %2721 = vmatprep.subr.bf16.mxu1 %v8819_v6  ;;  %v8924_v6 = vld [vmem:[%s9670_s18 + $0x6e4] ss:$48 sps:$4 sm:$0xff]  }
 0x21a   : > { %2812 = vmatpush1.bf16.msra.mxu0 %v8844_v19  ;;  %v8901_v19 = vld [vmem:[%s9670_s18 + $0x148] ss:$48 sps:$4 sm:$0xff]  }
 0x21b   : > { %2722 = vmatpush1.bf16.msra.mxu1 %v8817_v14  ;;  %2813 = vmatprep.subr.bf16.mxu0 %v8852_v20  ;;  %v8922_v14 = vld [vmem:[%s9670_s18 + $0x6e0] ss:$48 sps:$4 sm:$0xff]   ;;  %v8909_v20 = vld [vmem:[%s9670_s18 + $0x1ac] ss:$48 sps:$4 sm:$0xff]  }
 0x21c   : > { %2723 = vmatprep.subr.bf16.mxu1 %v8825_v15  ;;  %v8930_v15 = vld [vmem:[%s9670_s18 + $0x744] ss:$48 sps:$4 sm:$0xff]  }
 0x21e   : > { %2814 = vmatpush1.bf16.msra.mxu0 %v8850_v53  ;;  %v8907_v53 = vld [vmem:[%s9670_s18 + $0x1a8] ss:$48 sps:$4 sm:$0xff]  }
 0x21f   : > { %2724 = vmatpush1.bf16.msra.mxu1 %v8823_v23  ;;  %2815 = vmatprep.subr.bf16.mxu0 %v8858_v24  ;;  %v8928_v23 = vld [vmem:[%s9670_s18 + $0x740] ss:$48 sps:$4 sm:$0xff]   ;;  %v8915_v24 = vld [vmem:[%s9670_s18 + $0x20c] ss:$48 sps:$4 sm:$0xff]  }
 0x220   : > { %2725 = vmatprep.subr.bf16.mxu1 %v8831_v52  ;;  %v8936_v52 = vld [vmem:[%s9670_s18 + $0x7a4] ss:$48 sps:$4 sm:$0xff]  }
 0x222   : > { %2816 = vmatpush1.bf16.msra.mxu0 %v8856_v9  ;;  %v8913_v9 = vld [vmem:[%s9670_s18 + $0x208] ss:$48 sps:$4 sm:$0xff]  }
 0x223   : > { %2726 = vmatpush1.bf16.msra.mxu1 %v8829_v56  ;;  %2817 = vmatprep.subr.bf16.mxu0 %v8864_v10  ;;  %v8934_v56 = vld [vmem:[%s9670_s18 + $0x7a0] ss:$48 sps:$4 sm:$0xff]  }
 0x224   : > { %2748 = vmatprep.subr.bf16.mxu1 %v8837_v57  ;;  %v8942_v57 = vld [vmem:[%s9670_s18 + $0x804] ss:$48 sps:$4 sm:$0xff]   ;;  %v8940_v10 = vld [vmem:[%s9670_s18 + $0x800] ss:$48 sps:$4 sm:$0xff]  }
 0x226   : > { %2728 = vmatmul.mubr.bf16.vlgmr.msra.gmra.mrb[16].mxu1 %v9961_v51  ;;  %2818 = vmatpush1.bf16.msra.mxu0 %v8862_v25  ;;  %v8919_v25 = vld [vmem:[%s9670_s18 + $0x268] ss:$48 sps:$4 sm:$0xff]  }
 0x227   : > { %2749 = vmatpush1.bf16.msra.mxu1 %v8835_v21  ;;  %2737 = vmatprep.mubr.bf16.mxu1 %v9975_v3  ;;  %v8948_v21 = vld [vmem:[%s9670_s18 + $0x864] ss:$48 sps:$4 sm:$0xff]  }
 0x228   : > { %2750 = vmatprep.subr.bf16.mxu1 %v8843_v58  ;;  %2819 = vmatprep.subr.bf16.mxu0 %v8870_v12  ;;  %v8927_v12 = vld [vmem:[%s9670_s18 + $0x2cc] ss:$48 sps:$4 sm:$0xff]  }
 0x22a   : > { %2820 = vmatpush1.bf16.msra.mxu0 %v8868_v60  ;;  %v8946_v60 = vld [vmem:[%s9670_s18 + $0x860] ss:$48 sps:$4 sm:$0xff]  }
 0x22b   : > { %2751 = vmatpush1.bf16.msra.mxu1 %v8841_v11  ;;  %2821 = vmatprep.subr.bf16.mxu0 %v8876_v28 }
 0x22c   : > { %2752 = vmatprep.subr.bf16.mxu1 %v8849_v27 }
 0x22e   : > { %2738 = vmatmul.mubr.bf16.gmra.mrb[20].mxu1 %v9991_v18  ;;  %2822 = vmatpush1.bf16.msra.mxu0 %v8874_v30  ;;  %v8933_v30 = vld [vmem:[%s9670_s18 + $0x32c] ss:$48 sps:$4 sm:$0xff]  }
 0x22f   : > { %2753 = vmatpush1.bf16.msra.mxu1 %v8847_v16  ;;  %2780 = vmatprep.mubr.bf16.mxu1 %v9598_v34  ;;  %v8954_v16 = vld [vmem:[%s9670_s18 + $0x8c4] ss:$48 sps:$4 sm:$0xff]  }
 0x230   : > { %2754 = vmatprep.subr.bf16.mxu1 %v8855_v17  ;;  %2823 = vmatprep.subr.bf16.mxu0 %v8882_v31  ;;  %v8925_v17 = vld [vmem:[%s9670_s18 + $0x2c8] ss:$48 sps:$4 sm:$0xff]   ;;  %v8952_v31 = vld [vmem:[%s9670_s18 + $0x8c0] ss:$48 sps:$4 sm:$0xff]  }
 0x232   : > { %2824 = vmatpush1.bf16.msra.mxu0 %v8880_v26  ;;  %v8937_v26 = vld [vmem:[%s9670_s18 + $0x388] ss:$48 sps:$4 sm:$0xff]  }
 0x233   : > { %2755 = vmatpush1.bf16.msra.mxu1 %v8853_v32  ;;  %2825 = vmatprep.subr.bf16.mxu0 %v8888_v13  ;;  %v8931_v32 = vld [vmem:[%s9670_s18 + $0x328] ss:$48 sps:$4 sm:$0xff]   ;;  %v8945_v13 = vld [vmem:[%s9670_s18 + $0x3ec] ss:$48 sps:$4 sm:$0xff]  }
 0x234   : > { %2756 = vmatprep.subr.bf16.mxu1 %v8861_v33  ;;  %v8939_v33 = vld [vmem:[%s9670_s18 + $0x38c] ss:$48 sps:$4 sm:$0xff]  }
 0x236   : > { %2826 = vmatpush1.bf16.msra.mxu0 %v8886_v37  ;;  %v889_v37 = vlaneseq }
 0x237   : > { %2757 = vmatpush1.bf16.msra.mxu1 %v8859_v35  ;;  %2827 = vmatprep.subr.bf16.mxu0 %v8894_v38  ;;  %v8943_v35 = vld [vmem:[%s9670_s18 + $0x3e8] ss:$48 sps:$4 sm:$0xff]  }
 0x238   : > { %2758 = vmatprep.subr.bf16.mxu1 %v8867_v36  ;;  %v8951_v36 = vld [vmem:[%s9670_s18 + $0x44c] ss:$48 sps:$4 sm:$0xff]   ;;  %v8949_v38 = vld [vmem:[%s9670_s18 + $0x448] ss:$48 sps:$4 sm:$0xff]  }
 0x23a   : > { %2828 = vmatpush1.bf16.msra.mxu0 %v8892_v41  ;;  %v8955_v41 = vld [vmem:[%s9670_s18 + $0x4a8] ss:$48 sps:$4 sm:$0xff]  }
 0x23b   : > { %2759 = vmatpush1.bf16.msra.mxu1 %v8865_v39  ;;  %2829 = vmatprep.subr.bf16.mxu0 %v8900_v42  ;;  %v8957_v39 = vld [vmem:[%s9670_s18 + $0x4ac] ss:$48 sps:$4 sm:$0xff]   ;;  %v589_v42 = vld [vmem:[%s9690_s12] sm:$0xff] }
 0x23c   : > { %2760 = vmatprep.subr.bf16.mxu1 %v8873_v40  ;;  %v10222_v40 = vshrl.u32 %v889_v37, 7  ;;  %v8981_v37 = vld [vmem:[%s9670_s18 + $0x7ac] ss:$48 sps:$4 sm:$0xff]  }
 0x23e   : > { %2830 = vmatpush1.bf16.msra.mxu0 %v8898_v45  ;;  %v8960_v45 = vld [vmem:[%s9670_s18 + $0x50c] ss:$48 sps:$4 sm:$0xff]  }
 0x23f   : > { %2761 = vmatpush1.bf16.msra.mxu1 %v8871_v43  ;;  %2831 = vmatprep.subr.bf16.mxu0 %v8906_v46  ;;  %v10228_v43 = vsub.s32 0, %v10222_v40  ;;  %v8958_v46 = vld [vmem:[%s9670_s18 + $0x508] ss:$48 sps:$4 sm:$0xff]  }
 0x240   : > { %2762 = vmatprep.subr.bf16.mxu1 %v8879_v44  ;;  %v590_v44 = vld [vmem:[%s9690_s12 + $0x8] sm:$0xff] }
 0x242   : > { %2832 = vmatpush1.bf16.msra.mxu0 %v8904_v49  ;;  %v896_v49 = vrot.slane %v590_v44, %v10228_v43  ;;  %v8990_v44 = vld [vmem:[%s9670_s18 + $0x8cc] ss:$48 sps:$4 sm:$0xff]  }
 0x243   : > { %2763 = vmatpush1.bf16.msra.mxu1 %v8877_v47  ;;  %2854 = vmatprep.subr.bf16.mxu0 %v8912_v50  ;;  %v892_v47 = vrot.slane %v589_v42, %v10228_v43  ;;  %v8985_v42 = vld [vmem:[%s9670_s18 + $0x868] ss:$48 sps:$4 sm:$0xff]  }
 0x244   : > { %2907 = vmatprep.subr.bf16.mxu1 %v8885_v48  ;;  %v8963_v48 = vld [vmem:[%s9670_s18 + $0x56c] ss:$48 sps:$4 sm:$0xff]  }
 0x245   : > { %2834 = vmatmul.mubr.bf16.vlgmr.msra.gmra.mrb[16].mxu0 %v9961_v51 }
 0x246   : > { %2781 = vmatmul.mubr.bf16.vlgmr.msra.gmra.mrb[16].mxu1 %v9902_v22  ;;  %2855 = vmatpush1.bf16.msra.mxu0 %v8910_v61 }
 0x247   : > { %2908 = vmatpush1.bf16.msra.mxu1 %v8883_v54  ;;  %2790 = vmatprep.mubr.bf16.mxu1 %v9598_v34 }
 0x248   : > { %2909 = vmatprep.subr.bf16.mxu1 %v8891_v55  ;;  %2843 = vmatprep.mubr.bf16.mxu0 %v9975_v3  ;;  %v8961_v55 = vld [vmem:[%s9670_s18 + $0x568] ss:$48 sps:$4 sm:$0xff]  }
 0x249   : > { %2856 = vmatprep.subr.bf16.mxu0 %v8918_v4 }
 0x24a   : > { %2857 = vmatpush1.bf16.msra.mxu0 %v8916_v5 }
 0x24b   : > { %2910 = vmatpush1.bf16.msra.mxu1 %v8889_v62  ;;  %2858 = vmatprep.subr.bf16.mxu0 %v8924_v6 }
 0x24c   : > { %2911 = vmatprep.subr.bf16.mxu1 %v8897_v63  ;;  %v8966_v63 = vld [vmem:[%s9670_s18 + $0x5cc] ss:$48 sps:$4 sm:$0xff]  }
 0x24d   : > { %2844 = vmatmul.mubr.bf16.gmra.mrb[20].mxu0 %v9991_v18 }
 0x24e   : > { %2791 = vmatmul.mubr.bf16.gmra.mrb[20].mxu1 %v9969_v59  ;;  %2859 = vmatpush1.bf16.msra.mxu0 %v8922_v14 }
 0x24f   : > { %2912 = vmatpush1.bf16.msra.mxu1 %v8895_v7  ;;  %2939 = vmatprep.mubr.bf16.mxu1 %v9926_v29  ;;  %v8921_v29 = vld [vmem:[%s9670_s18 + $0x26c] ss:$48 sps:$4 sm:$0xff]  }
 0x250   : > { %2913 = vmatprep.subr.bf16.mxu1 %v8903_v8  ;;  %2886 = vmatprep.mubr.bf16.mxu0 %v9598_v34 }
 0x251   : > { %2860 = vmatprep.subr.bf16.mxu0 %v8930_v15 }
 0x252   : > { %2861 = vmatpush1.bf16.msra.mxu0 %v8928_v23 }
 0x253   : > { %2914 = vmatpush1.bf16.msra.mxu1 %v8901_v19  ;;  %2862 = vmatprep.subr.bf16.mxu0 %v8936_v52  ;;  %v8964_v52 = vld [vmem:[%s9670_s18 + $0x5c8] ss:$48 sps:$4 sm:$0xff]  }
 0x254   : > { %2915 = vmatprep.subr.bf16.mxu1 %v8909_v20 }
 0x256   : > { %2863 = vmatpush1.bf16.msra.mxu0 %v8934_v56 }
 0x257   : > { %2916 = vmatpush1.bf16.msra.mxu1 %v8907_v53  ;;  %2864 = vmatprep.subr.bf16.mxu0 %v8942_v57 }
 0x258   : > { %2917 = vmatprep.subr.bf16.mxu1 %v8915_v24  ;;  %v8969_v24 = vld [vmem:[%s9670_s18 + $0x62c] ss:$48 sps:$4 sm:$0xff]  }
 0x259   : > { %v10197_v58 = vpop.f32.mrb[0].mxu1 }
 0x25a   : > { %v10200_v11 = vpop.f32.mrb[1].mxu1  ;;  %2865 = vmatpush1.bf16.msra.mxu0 %v8940_v10 }
 0x25b   : > { %v10203_v27 = vpop.f32.mrb[2].mxu1  ;;  %2918 = vmatpush1.bf16.msra.mxu1 %v8913_v9  ;;  %2866 = vmatprep.subr.bf16.mxu0 %v8948_v21  ;;  %v8967_v9 = vld [vmem:[%s9670_s18 + $0x628] ss:$48 sps:$4 sm:$0xff]   ;;  %v8972_v21 = vld [vmem:[%s9670_s18 + $0x68c] ss:$48 sps:$4 sm:$0xff]  }
 0x25c   : > { %v10206_v28 = vpop.f32.mrb[3].mxu1  ;;  %2919 = vmatprep.subr.bf16.mxu1 %v8921_v29 }
 0x25e   : > { %2867 = vmatpush1.bf16.msra.mxu0 %v8946_v60 }
 0x25f   : > { %2920 = vmatpush1.bf16.msra.mxu1 %v8919_v25  ;;  %2868 = vmatprep.subr.bf16.mxu0 %v8954_v16  ;;  %v8970_v16 = vld [vmem:[%s9670_s18 + $0x688] ss:$48 sps:$4 sm:$0xff]  }
 0x260   : > { %2921 = vmatprep.subr.bf16.mxu1 %v8927_v12 }
 0x261   : > { %v2474_v50 = vpop.f32.mrb[4].mxu1 }
 0x262   : > { %2869 = vmatpush1.bf16.msra.mxu0 %v8952_v31  ;;  %v2476_v61 = vpop.f32.mrb[5].mxu1  ;;  %v8975_v31 = vld [vmem:[%s9670_s18 + $0x6ec] ss:$48 sps:$4 sm:$0xff]  }
 0x263   : > { %2922 = vmatpush1.bf16.msra.mxu1 %v8925_v17  ;;  %v2478_v5 = vpop.f32.mrb[6].mxu1 }
 0x264   : > { %2923 = vmatprep.subr.bf16.mxu1 %v8933_v30  ;;  %v2480_v8 = vpop.f32.mrb[7].mxu1 }
 0x265   : > { %2887 = vmatmul.mubr.bf16.vlgmr.msra.gmra.mrb[16].mxu0 %v9902_v22 }
 0x266   : > { %2896 = vmatprep.mubr.bf16.mxu0 %v9598_v34 }
 0x267   : > { %2924 = vmatpush1.bf16.msra.mxu1 %v8931_v32 }
 0x268   : > { %2925 = vmatprep.subr.bf16.mxu1 %v8939_v33 }
 0x26b   : > { %2926 = vmatpush1.bf16.msra.mxu1 %v8937_v26 }
 0x26c   : > { %2927 = vmatprep.subr.bf16.mxu1 %v8945_v13  ;;  %v8973_v13 = vld [vmem:[%s9670_s18 + $0x6e8] ss:$48 sps:$4 sm:$0xff]  }
 0x26d   : > { %2897 = vmatmul.mubr.bf16.gmra.mrb[20].mxu0 %v9969_v59 }
 0x26f   : > { %2928 = vmatpush1.bf16.msra.mxu1 %v8943_v35 }
 0x270   : > { %2929 = vmatprep.subr.bf16.mxu1 %v8951_v36  ;;  %v8976_v36 = vld [vmem:[%s9670_s18 + $0x748] ss:$48 sps:$4 sm:$0xff]  }
 0x273   : > { %2930 = vmatpush1.bf16.msra.mxu1 %v8949_v38  ;;  %v8984_v38 = vld [vmem:[%s9670_s18 + $0x80c] ss:$48 sps:$4 sm:$0xff]  }
 0x274   : > { %2931 = vmatprep.subr.bf16.mxu1 %v8957_v39  ;;  %v8982_v39 = vld [vmem:[%s9670_s18 + $0x808] ss:$48 sps:$4 sm:$0xff]  }
 0x277   : > { %2932 = vmatpush1.bf16.msra.mxu1 %v8955_v41  ;;  %v8987_v41 = vld [vmem:[%s9670_s18 + $0x86c] ss:$48 sps:$4 sm:$0xff]  }
 0x278   : > { %2933 = vmatprep.subr.bf16.mxu1 %v8960_v45  ;;  %v2411_v54 = vpop.f32.mrb[0].mxu0  ;;  %v591_v45 = vld [vmem:[%s9690_s12 + $0x10] sm:$0xff] }
 0x279   : > { %v2412_v4 = vadd.f32 %v2411_v54, %v892_v47  ;;  %v2413_v62 = vpop.f32.mrb[1].mxu0 }
 0x27a   : > { %v2414_v6 = vadd.f32 %v2413_v62, %v896_v49  ;;  %v2415_v7 = vpop.f32.mrb[2].mxu0 }
 0x27b   : > { %2934 = vmatpush1.bf16.msra.mxu1 %v8958_v46  ;;  %v2465_v14 = vadd.f32 %v10197_v58, %v2412_v4  ;;  %v2416_v15 = vadd.f32 %v2415_v7, %v892_v47  ;;  %v2417_v19 = vpop.f32.mrb[3].mxu0  ;;  %v592_v46 = vld [vmem:[%s9690_s12 + $0x18] sm:$0xff] }
 0x27c   : > { %2935 = vmatprep.subr.bf16.mxu1 %v8963_v48  ;;  %v10240_v20 = vadd.f32 %v10200_v11, %v2414_v6  ;;  %v2418_v23 = vadd.f32 %v2417_v19, %v896_v49 }
 0x27d   : > { %v2469_v53 = vadd.f32 %v10203_v27, %v2416_v15 }
 0x27e   : > { %v2471_v56 = vadd.f32 %v10206_v28, %v2418_v23 }
 0x27f   : > { %2936 = vmatpush1.bf16.msra.mxu1 %v8961_v55  ;;  %v3013_v57 = vpack.c.bf16 %v2469_v53, %v2465_v14  ;;  %v593_v53 = vld [vmem:[%s9690_s12 + $0x20] sm:$0xff] }
 0x280   : > { %2937 = vmatprep.subr.bf16.mxu1 %v8966_v63  ;;  %v2421_v29 = vpop.f32.mrb[4].mxu0  ;;  %v3014_v10 = vpack.c.bf16 %v2471_v56, %v10240_v20  ;;  %v908_v56 = vrot.slane %v593_v53, %v10228_v43 }
 0x281   : > { %8270 = vmatprep.mubr.bf16.mxu0 %v3013_v57  ;;  %v2422_v58 = vadd.f32 %v2421_v29, %v892_v47  ;;  %v2423_v25 = vpop.f32.mrb[5].mxu0 }
 0x282   : > { %v2424_v11 = vadd.f32 %v2423_v25, %v896_v49  ;;  %v2425_v12 = vpop.f32.mrb[6].mxu0 }
 0x283   : > { %2938 = vmatpush1.bf16.msra.mxu1 %v8964_v52  ;;  %v2426_v27 = vadd.f32 %v2425_v12, %v892_v47  ;;  %v10249_v60 = vadd.f32 %v2474_v50, %v2422_v58  ;;  %v2427_v28 = vpop.f32.mrb[7].mxu0  ;;  %v900_v47 = vrot.slane %v591_v45, %v10228_v43 }
 0x284   : > { %2960 = vmatprep.subr.bf16.mxu1 %v8969_v24  ;;  %v2428_v17 = vadd.f32 %v2427_v28, %v896_v49  ;;  %v10252_v30 = vadd.f32 %v2476_v61, %v2424_v11  ;;  %v904_v49 = vrot.slane %v592_v46, %v10228_v43  ;;  %v594_v24 = vld [vmem:[%s9690_s12 + $0x28] sm:$0xff] }
 0x285   : > { %v10256_v32 = vadd.f32 %v2478_v5, %v2426_v27 }
 0x286   : > { %2940 = vmatmul.mubr.bf16.vlgmr.msra.gmra.mrb[24].mxu1 %v9961_v51  ;;  %v10258_v33 = vadd.f32 %v2480_v8, %v2428_v17  ;;  %v8978_v51 = vld [vmem:[%s9670_s18 + $0x74c] ss:$48 sps:$4 sm:$0xff]  }
 0x287   : > { %2961 = vmatpush1.bf16.msra.mxu1 %v8967_v9  ;;  %2949 = vmatprep.mubr.bf16.mxu1 %v9975_v3  ;;  %v3025_v26 = vpack.c.bf16 %v10256_v32, %v10249_v60  ;;  %v8979_v3 = vld [vmem:[%s9670_s18 + $0x7a8] ss:$48 sps:$4 sm:$0xff]   ;;  %v912_v9 = vrot.slane %v594_v24, %v10228_v43 }
 0x288   : > { %2962 = vmatprep.subr.bf16.mxu1 %v8972_v21  ;;  %v3026_v35 = vpack.c.bf16 %v10258_v33, %v10252_v30 }
 0x28b   : > { %2963 = vmatpush1.bf16.msra.mxu1 %v8970_v16 }
 0x28c   : > { %2964 = vmatprep.subr.bf16.mxu1 %v8975_v31 }
 0x28e   : > { %2950 = vmatmul.mubr.bf16.gmra.mrb[28].mxu1 %v9991_v18  ;;  %v8988_v18 = vld [vmem:[%s9670_s18 + $0x8c8] ss:$48 sps:$4 sm:$0xff]  }
 0x28f   : > { %2965 = vmatpush1.bf16.msra.mxu1 %v8973_v13  ;;  %2992 = vmatprep.mubr.bf16.mxu1 %v9598_v34 }
 0x290   : > { %2966 = vmatprep.subr.bf16.mxu1 %v8978_v51 }
 0x293   : > { %2967 = vmatpush1.bf16.msra.mxu1 %v8976_v36 }
 0x294   : > { %2968 = vmatprep.subr.bf16.mxu1 %v8981_v37 }
 0x297   : > { %2969 = vmatpush1.bf16.msra.mxu1 %v8979_v3 }
 0x298   : > { %2970 = vmatprep.subr.bf16.mxu1 %v8984_v38 }
 0x29b   : > { %2971 = vmatpush1.bf16.msra.mxu1 %v8982_v39 }
 0x29c   : > { %2972 = vmatprep.subr.bf16.mxu1 %v8987_v41  ;;  %v595_v41 = vld [vmem:[%s9690_s12 + $0x30] sm:$0xff] }
 0x29f   : > { %2973 = vmatpush1.bf16.msra.mxu1 %v8985_v42  ;;  %v596_v42 = vld [vmem:[%s9690_s12 + $0x38] sm:$0xff] }
 0x2a0   : > { %2974 = vmatprep.subr.bf16.mxu1 %v8990_v44  ;;  %v916_v44 = vrot.slane %v595_v41, %v10228_v43  ;;  %v920_v45 = vrot.slane %v596_v42, %v10228_v43 }
 0x2a3   : > { %2975 = vmatpush1.bf16.msra.mxu1 %v8988_v18 }
 0x2a6   : > { %2993 = vmatmul.mubr.bf16.vlgmr.msra.gmra.mrb[24].mxu1 %v9902_v22 }
 0x2a7   : > { %3002 = vmatprep.mubr.bf16.mxu1 %v9598_v34 }
 0x2ae   : > { %3003 = vmatmul.mubr.bf16.gmra.mrb[28].mxu1 %v9969_v59 }
 0x2af   : > { %8278 = vmatprep.mubr.bf16.mxu1 %v3014_v10 }
 0x2b9   : > { %v2570_v48 = vpop.f32.mrb[8].mxu1 }
 0x2ba   : > { %v2572_v50 = vpop.f32.mrb[9].mxu1  ;;  %v8386_v55 = vadd.f32 %v2570_v48, %v900_v47 }
 0x2bb   : > { %v2574_v54 = vpop.f32.mrb[10].mxu1  ;;  %v8387_v22 = vadd.f32 %v2572_v50, %v904_v49 }
 0x2bc   : > { %v8388_v61 = vadd.f32 %v2574_v54, %v900_v47  ;;  %v2576_v4 = vpop.f32.mrb[11].mxu1 }
 0x2bd   : > { %v8389_v62 = vadd.f32 %v2576_v4, %v904_v49 }
 0x2be   : > { %v3015_v63 = vpack.c.bf16 %v8388_v61, %v8386_v55 }
 0x2bf   : > { %v3016_v5 = vpack.c.bf16 %v8389_v62, %v8387_v22 }
 0x2c1   : > { %v2580_v59 = vpop.f32.mrb[12].mxu1 }
 0x2c2   : > { %v10285_v6 = vadd.f32 %v2580_v59, %v900_v47  ;;  %v2582_v7 = vpop.f32.mrb[13].mxu1  ;;  %v597_v59 = vld [vmem:[%s9690_s12 + $0x40] sm:$0xff] }
 0x2c3   : > { %v10287_v8 = vadd.f32 %v2582_v7, %v904_v49  ;;  %v2584_v14 = vpop.f32.mrb[14].mxu1  ;;  %v598_v7 = vld [vmem:[%s9690_s12 + $0x48] sm:$0xff] }
 0x2c4   : > { %v10289_v15 = vadd.f32 %v2584_v14, %v900_v47  ;;  %v2586_v19 = vpop.f32.mrb[15].mxu1  ;;  %v924_v14 = vrot.slane %v597_v59, %v10228_v43  ;;  %v3270_v59 = vld [vmem:[%s11558_s1 + $0x20] sm:$0xff] }
 0x2c5   : > { %v10291_v20 = vadd.f32 %v2586_v19, %v904_v49  ;;  %v928_v19 = vrot.slane %v598_v7, %v10228_v43 }
 0x2c6   : > { %v3027_v23 = vpack.c.bf16 %v10289_v15, %v10285_v6 }
 0x2c7   : > { %v3028_v52 = vpack.c.bf16 %v10291_v20, %v10287_v8 }
 0x2d8   : > { %v2676_v57 = vpop.f32.mrb[8].mxu0 }
 0x2d9   : > { %v2678_v29 = vpop.f32.mrb[9].mxu0  ;;  %v8394_v21 = vadd.f32 %v2676_v57, %v908_v56 }
 0x2da   : > { %v2680_v10 = vpop.f32.mrb[10].mxu0  ;;  %v8395_v11 = vadd.f32 %v2678_v29, %v912_v9 }
 0x2db   : > { %v8396_v58 = vadd.f32 %v2680_v10, %v908_v56  ;;  %v2682_v25 = vpop.f32.mrb[11].mxu0 }
 0x2dc   : > { %v8397_v12 = vadd.f32 %v2682_v25, %v912_v9 }
 0x2dd   : > { %v3017_v27 = vpack.c.bf16 %v8396_v58, %v8394_v21 }
 0x2de   : > { %v3018_v28 = vpack.c.bf16 %v8397_v12, %v8395_v11 }
 0x2df   : > { %8266 = vmatprep.subr.bf16.mxu0 %v3017_v27 }
 0x2e0   : > { %v2686_v16 = vpop.f32.mrb[12].mxu0  ;;  %8267 = vmatpush3.bf16.xpose.msra.mxu0 %v3017_v27  ;;  %8274 = vmatprep.subr.bf16.mxu1 %v3018_v28 }
 0x2e1   : > { %v2688_v17 = vpop.f32.mrb[13].mxu0  ;;  %8275 = vmatpush3.bf16.xpose.msra.mxu1 %v3018_v28  ;;  %v8398_v13 = vadd.f32 %v2686_v16, %v908_v56  ;;  %v599_v16 = vld [vmem:[%s9690_s12 + $0x50] sm:$0xff] }
 0x2e2   : > { %v2690_v31 = vpop.f32.mrb[14].mxu0  ;;  %v8399_v37 = vadd.f32 %v2688_v17, %v912_v9  ;;  %v600_v17 = vld [vmem:[%s9690_s12 + $0x58] sm:$0xff] }
 0x2e3   : > { %v8400_v51 = vadd.f32 %v2690_v31, %v908_v56  ;;  %v2692_v36 = vpop.f32.mrb[15].mxu0  ;;  %v932_v31 = vrot.slane %v599_v16, %v10228_v43 }
 0x2e4   : > { %v8401_v3 = vadd.f32 %v2692_v36, %v912_v9 }
 0x2e5   : > { %v3029_v38 = vpack.c.bf16 %v8400_v51, %v8398_v13  ;;  %v936_v13 = vrot.slane %v600_v17, %v10228_v43 }
 0x2e6   : > { %v3030_v39 = vpack.c.bf16 %v8401_v3, %v8399_v37 }
 0x2e7   : > { %8268 = vmatprep.subr.bf16.mxu0 %v3029_v38 }
 0x2e8   : > { %8269 = vmatpush3.bf16.xpose.msra.mxu0 %v3029_v38  ;;  %8276 = vmatprep.subr.bf16.mxu1 %v3030_v39 }
 0x2e9   : > { %8277 = vmatpush3.bf16.xpose.msra.mxu1 %v3030_v39 }
 0x2ef   : > { %8271 = vmatmul.mubr.bf16.vlgmr.msra.gmra.mrb[24].mxu0 %v3025_v26 }
 0x2f0   : > { %8279 = vmatmul.mubr.bf16.vlgmr.msra.gmra.mrb[32].mxu1 %v3026_v35  ;;  %8286 = vmatprep.mubr.bf16.mxu0 %v3015_v63 }
 0x2f1   : > { %8294 = vmatprep.mubr.bf16.mxu1 %v3016_v5 }
 0x319   : > { %v2782_v18 = vpop.f32.mrb[16].mxu1 }
 0x31a   : > { %v2784_v46 = vpop.f32.mrb[17].mxu1  ;;  %v8402_v48 = vadd.f32 %v2782_v18, %v916_v44 }
 0x31b   : > { %v2786_v47 = vpop.f32.mrb[18].mxu1  ;;  %v8403_v60 = vadd.f32 %v2784_v46, %v920_v45 }
 0x31c   : > { %v8404_v49 = vadd.f32 %v2786_v47, %v916_v44  ;;  %v2788_v50 = vpop.f32.mrb[19].mxu1 }
 0x31d   : > { %v8405_v32 = vadd.f32 %v2788_v50, %v920_v45 }
 0x31e   : > { %v3019_v26 = vpack.c.bf16 %v8404_v49, %v8402_v48 }
 0x31f   : > { %v3020_v54 = vpack.c.bf16 %v8405_v32, %v8403_v60 }
 0x320   : > { %8282 = vmatprep.subr.bf16.mxu0 %v3019_v26 }
 0x321   : > { %v2792_v30 = vpop.f32.mrb[20].mxu1  ;;  %8283 = vmatpush3.bf16.xpose.msra.mxu0 %v3019_v26  ;;  %8290 = vmatprep.subr.bf16.mxu1 %v3020_v54 }
 0x322   : > { %v2794_v33 = vpop.f32.mrb[21].mxu1  ;;  %8291 = vmatpush3.bf16.xpose.msra.mxu1 %v3020_v54  ;;  %v8406_v55 = vadd.f32 %v2792_v30, %v916_v44 }
 0x323   : > { %v2796_v35 = vpop.f32.mrb[22].mxu1  ;;  %v8407_v22 = vadd.f32 %v2794_v33, %v920_v45 }
 0x324   : > { %v8408_v61 = vadd.f32 %v2796_v35, %v916_v44  ;;  %v2798_v4 = vpop.f32.mrb[23].mxu1 }
 0x325   : > { %v8409_v62 = vadd.f32 %v2798_v4, %v920_v45 }
 0x326   : > { %v3031_v63 = vpack.c.bf16 %v8408_v61, %v8406_v55 }
 0x327   : > { %v3032_v5 = vpack.c.bf16 %v8409_v62, %v8407_v22 }
 0x328   : > { %8284 = vmatprep.subr.bf16.mxu0 %v3031_v63 }
 0x329   : > { %8285 = vmatpush3.bf16.xpose.msra.mxu0 %v3031_v63  ;;  %8292 = vmatprep.subr.bf16.mxu1 %v3032_v5  ;;  %v3272_v63 = vld [vmem:[%s11558_s1 + $0x30] sm:$0xff] }
 0x32a   : > { %8293 = vmatpush3.bf16.xpose.msra.mxu1 %v3032_v5  ;;  %v3266_v5 = vld [vmem:[%s11558_s1] sm:$0xff] }
 0x330   : > { %8287 = vmatmul.mubr.bf16.vlgmr.msra.gmra.mrb[28].mxu0 %v3027_v23 }
 0x331   : > { %8295 = vmatmul.mubr.bf16.vlgmr.msra.gmra.mrb[36].mxu1 %v3028_v52 }
 0x338   : > { %v2888_v53 = vpop.f32.mrb[16].mxu0 }
 0x339   : > { %v8410_v24 = vadd.f32 %v2888_v53, %v924_v14  ;;  %v2890_v56 = vpop.f32.mrb[17].mxu0 }
 0x33a   : > { %v8411_v57 = vadd.f32 %v2890_v56, %v928_v19  ;;  %v2892_v9 = vpop.f32.mrb[18].mxu0 }
 0x33b   : > { %v8412_v29 = vadd.f32 %v2892_v9, %v924_v14  ;;  %v2894_v10 = vpop.f32.mrb[19].mxu0 }
 0x33c   : > { %v8413_v21 = vadd.f32 %v2894_v10, %v928_v19 }
 0x33d   : > { %v3021_v6 = vpack.c.bf16 %v8412_v29, %v8410_v24 }
 0x33e   : > { %v3022_v15 = vpack.c.bf16 %v8413_v21, %v8411_v57 }
 0x33f   : > { %8298 = vmatprep.subr.bf16.mxu0 %v3021_v6 }
 0x340   : > { %v2898_v23 = vpop.f32.mrb[20].mxu0  ;;  %8306 = vmatprep.subr.bf16.mxu1 %v3022_v15  ;;  %8299 = vmatpush3.bf16.msra.mxu0 %v3021_v6  ;;  %v3273_v6 = vld [vmem:[%s11558_s1 + $0x38] sm:$0xff] }
 0x341   : > { %v8414_v8 = vadd.f32 %v2898_v23, %v924_v14  ;;  %v2900_v20 = vpop.f32.mrb[21].mxu0  ;;  %8307 = vmatpush3.bf16.msra.mxu1 %v3022_v15  ;;  %v3271_v23 = vld [vmem:[%s11558_s1 + $0x28] sm:$0xff] }
 0x342   : > { %v8415_v52 = vadd.f32 %v2900_v20, %v928_v19  ;;  %v2902_v58 = vpop.f32.mrb[22].mxu0 }
 0x343   : > { %v8416_v25 = vadd.f32 %v2902_v58, %v924_v14  ;;  %v2904_v11 = vpop.f32.mrb[23].mxu0 }
 0x344   : > { %v8417_v12 = vadd.f32 %v2904_v11, %v928_v19  ;;  %v3267_v19 = vld [vmem:[%s11558_s1 + $0x8] sm:$0xff]  ;;  %v3268_v11 = vld [vmem:[%s11558_s1 + $0x10] sm:$0xff] }
 0x345   : > { %v3033_v27 = vpack.c.bf16 %v8416_v25, %v8414_v8 }
 0x346   : > { %v3034_v28 = vpack.c.bf16 %v8417_v12, %v8415_v52 }
 0x347   : > { %8300 = vmatprep.subr.bf16.mxu0 %v3033_v27 }
 0x348   : > { %8308 = vmatprep.subr.bf16.mxu1 %v3034_v28  ;;  %8301 = vmatpush3.bf16.msra.mxu0 %v3033_v27 }
 0x349   : > { %8309 = vmatpush3.bf16.msra.mxu1 %v3034_v28  ;;  %v3269_v28 = vld [vmem:[%s11558_s1 + $0x18] sm:$0xff] }
 0x379   : > { %v2994_v51 = vpop.f32.mrb[24].mxu1 }
 0x37a   : > { %v8418_v36 = vadd.f32 %v2994_v51, %v932_v31  ;;  %v2996_v37 = vpop.f32.mrb[25].mxu1 }
 0x37b   : > { %v8419_v3 = vadd.f32 %v2996_v37, %v936_v13  ;;  %v2998_v38 = vpop.f32.mrb[26].mxu1 }
 0x37c   : > { %v8420_v39 = vadd.f32 %v2998_v38, %v932_v31  ;;  %v3000_v41 = vpop.f32.mrb[27].mxu1 }
 0x37d   : > { %v8421_v42 = vadd.f32 %v3000_v41, %v936_v13 }
 0x37e   : > { %v10325_v44 = vpack.c.bf16 %v8420_v39, %v8418_v36 }
 0x37f   : > { %v10327_v18 = vpack.c.bf16 %v8421_v42, %v8419_v3 }
 0x380   : > { %8314 = vmatprep.subr.bf16.mxu0 %v10325_v44 }
 0x381   : > { %8322 = vmatprep.subr.bf16.mxu1 %v10327_v18  ;;  %v3004_v45 = vpop.f32.mrb[28].mxu1 }
 0x382   : > { %v8422_v46 = vadd.f32 %v3004_v45, %v932_v31  ;;  %v3006_v47 = vpop.f32.mrb[29].mxu1 }
 0x383   : > { %v8423_v48 = vadd.f32 %v3006_v47, %v936_v13  ;;  %v3008_v49 = vpop.f32.mrb[30].mxu1  ;;  %v3274_v47 = vld [vmem:[%s11558_s1 + $0x40] sm:$0xff] }
 0x384   : > { %v8424_v50 = vadd.f32 %v3008_v49, %v932_v31  ;;  %v3010_v60 = vpop.f32.mrb[31].mxu1 }
 0x385   : > { %v8425_v32 = vadd.f32 %v3010_v60, %v936_v13 }
 0x386   : > { %v10331_v26 = vpack.c.bf16 %v8424_v50, %v8422_v46  ;;  %v3275_v50 = vld [vmem:[%s11558_s1 + $0x48] sm:$0xff] }
 0x387   : > { %v10333_v54 = vpack.c.bf16 %v8425_v32, %v8423_v48  ;;  %v3280_v48 = vld [vmem:[%s11558_s1 + $0x70] sm:$0xff] }
 0x3c2   : > { %v8272_v30 = vpop.f32.mrb[24].mxu0 }
 0x3c3   : > { %3089 = vst.msk [vmem:[#allocation3 + $0x10] sm:$0xff] %vm3086_vm0, %v8272_v30  ;;  %v3071_v33 = vpop.f32.mrb[25].mxu0  ;;  %v8280_v35 = vpop.f32.mrb[32].mxu1 }
 0x3c4   : > { %3087 = vst.msk [vmem:[#allocation3] sm:$0xff] %vm3086_vm0, %v3071_v33  ;;  %3142 = vst.msk [vmem:[#allocation3 + $0x30] sm:$0xff] %vm3086_vm0, %v8280_v35  ;;  %v8273_v55 = vpop.f32.mrb[26].mxu0  ;;  %v3125_v61 = vpop.f32.mrb[33].mxu1  ;;  %v3281_v35 = vld [vmem:[%s11558_s1 + $0x78] sm:$0xff] }
 0x3c5   : > { %3090 = vst.msk [vmem:[#allocation3 + $0x18] sm:$0xff] %vm3086_vm0, %v8273_v55  ;;  %3140 = vst.msk [vmem:[#allocation3 + $0x20] sm:$0xff] %vm3086_vm0, %v3125_v61  ;;  %v3074_v4 = vpop.f32.mrb[27].mxu0  ;;  %v8281_v22 = vpop.f32.mrb[34].mxu1 }
 0x3c6   : > { %3088 = vst.msk [vmem:[#allocation3 + $0x8] sm:$0xff] %vm3086_vm0, %v3074_v4  ;;  %3143 = vst.msk [vmem:[#allocation3 + $0x38] sm:$0xff] %vm3086_vm0, %v8281_v22  ;;  %v3128_v62 = vpop.f32.mrb[35].mxu1 }
 0x3c7   : > { %3141 = vst.msk [vmem:[#allocation3 + $0x28] sm:$0xff] %vm3086_vm0, %v3128_v62  ;;  %v3278_v62 = vld [vmem:[%s11558_s1 + $0x60] sm:$0xff] }
 0x3ca   : > { %v3252_v12 = vld [vmem:[#allocation3 + $0x10] sm:$0xff] }
 0x3cb   : > { %v3256_v7 = vld [vmem:[#allocation3 + $0x30] sm:$0xff]  ;;  %v3250_v14 = vld [vmem:[#allocation3] sm:$0xff]  ;;  %v10391_v31 = vadd.f32 %v3268_v11, %v3252_v12 }
 0x3cc   : > { %v10355_v53 = vadd.f32 %v3272_v63, %v3256_v7  ;;  %v10357_v24 = vadd.f32 %v3266_v5, %v3250_v14  ;;  %v3254_v56 = vld [vmem:[#allocation3 + $0x20] sm:$0xff]  ;;  %v3253_v27 = vld [vmem:[#allocation3 + $0x18] sm:$0xff]  ;;  %v3279_v7 = vld [vmem:[%s11558_s1 + $0x68] sm:$0xff] }
 0x3cd   : > { %v3251_v57 = vld [vmem:[#allocation3 + $0x8] sm:$0xff]  ;;  %v10363_v10 = vadd.f32 %v3270_v59, %v3254_v56  ;;  %v3257_v8 = vld [vmem:[#allocation3 + $0x38] sm:$0xff]  ;;  %v10393_v13 = vadd.f32 %v3269_v28, %v3253_v27  ;;  %v3304_v51 = vsel %vm3086_vm0, %v10391_v31, -inf }
 0x3ce   : > { %v3316_v9 = vsel %vm3086_vm0, %v10355_v53, -inf  ;;  %v3298_v29 = vsel %vm3086_vm0, %v10357_v24, -inf  ;;  %v10365_v21 = vadd.f32 %v3267_v19, %v3251_v57  ;;  %v3255_v15 = vld [vmem:[#allocation3 + $0x28] sm:$0xff]  ;;  %v10379_v25 = vadd.f32 %v3273_v6, %v3257_v8  ;;  %v3276_v57 = vld [vmem:[%s11558_s1 + $0x50] sm:$0xff] }
 0x3cf   : > { %3317 = vmax.xlane.f32.xlu0 %v3316_v9  ;;  %3299 = vmax.xlane.f32.xlu1 %v3298_v29  ;;  %v3310_v20 = vsel %vm3086_vm0, %v10363_v10, -inf  ;;  %v10377_v58 = vadd.f32 %v3271_v23, %v3255_v15  ;;  %v3307_v36 = vsel %vm3086_vm0, %v10393_v13, -inf  ;;  %v3277_v15 = vld [vmem:[%s11558_s1 + $0x58] sm:$0xff] }
 0x3d0   : > { %v3301_v52 = vsel %vm3086_vm0, %v10365_v21, -inf  ;;  %v3319_v17 = vsel %vm3086_vm0, %v10379_v25, -inf }
 0x3d1   : > { %v3313_v16 = vsel %vm3086_vm0, %v10377_v58, -inf }
 0x3d3   : > { %3311 = vmax.xlane.f32.xlu0 %v3310_v20  ;;  %3302 = vmax.xlane.f32.xlu1 %v3301_v52 }
 0x3d7   : > { %3314 = vmax.xlane.f32.xlu0 %v3313_v16  ;;  %3320 = vmax.xlane.f32.xlu1 %v3319_v17 }
 0x3db   : > { %3305 = vmax.xlane.f32.xlu0 %v3304_v51  ;;  %3308 = vmax.xlane.f32.xlu1 %v3307_v36 }
 0x403   : > { %v8288_v37 = vpop.f32.mrb[28].mxu0 }
 0x404   : > { %3195 = vst.msk [vmem:[#allocation3 + $0x50] sm:$0xff] %vm3086_vm0, %v8288_v37  ;;  %v3178_v3 = vpop.f32.mrb[29].mxu0  ;;  %v8296_v38 = vpop.f32.mrb[36].mxu1 }
 0x405   : > { %3193 = vst.msk [vmem:[#allocation3 + $0x40] sm:$0xff] %vm3086_vm0, %v3178_v3  ;;  %3248 = vst.msk [vmem:[#allocation3 + $0x70] sm:$0xff] %vm3086_vm0, %v8296_v38  ;;  %v8289_v39 = vpop.f32.mrb[30].mxu0  ;;  %v3231_v41 = vpop.f32.mrb[37].mxu1 }
 0x406   : > { %3196 = vst.msk [vmem:[#allocation3 + $0x58] sm:$0xff] %vm3086_vm0, %v8289_v39  ;;  %3246 = vst.msk [vmem:[#allocation3 + $0x60] sm:$0xff] %vm3086_vm0, %v3231_v41  ;;  %v3181_v42 = vpop.f32.mrb[31].mxu0  ;;  %v8297_v45 = vpop.f32.mrb[38].mxu1 }
 0x407   : > { %3194 = vst.msk [vmem:[#allocation3 + $0x48] sm:$0xff] %vm3086_vm0, %v3181_v42  ;;  %3249 = vst.msk [vmem:[#allocation3 + $0x78] sm:$0xff] %vm3086_vm0, %v8297_v45  ;;  %v3234_v46 = vpop.f32.mrb[39].mxu1 }
 0x408   : > { %3247 = vst.msk [vmem:[#allocation3 + $0x68] sm:$0xff] %vm3086_vm0, %v3234_v46 }
 0x40b   : > { %v3260_v56 = vld [vmem:[#allocation3 + $0x50] sm:$0xff] }
 0x40c   : > { %v3258_v49 = vld [vmem:[#allocation3 + $0x40] sm:$0xff]  ;;  %v3264_v60 = vld [vmem:[#allocation3 + $0x70] sm:$0xff]  ;;  %v10453_v8 = vadd.f32 %v3276_v57, %v3260_v56 }
 0x40d   : > { %v10416_v32 = vadd.f32 %v3274_v47, %v3258_v49  ;;  %v10425_v4 = vadd.f32 %v3280_v48, %v3264_v60  ;;  %v3262_v22 = vld [vmem:[#allocation3 + $0x60] sm:$0xff]  ;;  %v3261_v6 = vld [vmem:[#allocation3 + $0x58] sm:$0xff] }
 0x40e   : > { %v3259_v30 = vld [vmem:[#allocation3 + $0x48] sm:$0xff]  ;;  %v3265_v33 = vld [vmem:[#allocation3 + $0x78] sm:$0xff]  ;;  %v10439_v19 = vadd.f32 %v3278_v62, %v3262_v22  ;;  %v10457_v52 = vadd.f32 %v3277_v15, %v3261_v6  ;;  %v3328_v11 = vsel %vm3086_vm0, %v10453_v8, -inf }
 0x40f   : > { %v3322_v55 = vsel %vm3086_vm0, %v10416_v32, -inf  ;;  %v10423_v61 = vadd.f32 %v3275_v50, %v3259_v30  ;;  %v10432_v5 = vadd.f32 %v3281_v35, %v3265_v33  ;;  %v3263_v59 = vld [vmem:[#allocation3 + $0x68] sm:$0xff]  ;;  %v3340_v14 = vsel %vm3086_vm0, %v10425_v4, -inf }
 0x410   : > { %3323 = vmax.xlane.f32.xlu0 %v3322_v55  ;;  %v10446_v29 = vadd.f32 %v3279_v7, %v3263_v59  ;;  %v3334_v23 = vsel %vm3086_vm0, %v10439_v19, -inf  ;;  %v3331_v12 = vsel %vm3086_vm0, %v10457_v52, -inf }
 0x411   : > { %v3325_v63 = vsel %vm3086_vm0, %v10423_v61, -inf  ;;  %v3343_v9 = vsel %vm3086_vm0, %v10432_v5, -inf }
 0x412   : > { %3326 = vmax.xlane.f32.xlu1 %v3325_v63  ;;  %v3337_v20 = vsel %vm3086_vm0, %v10446_v29, -inf }
 0x414   : > { %3341 = vmax.xlane.f32.xlu0 %v3340_v14 }
 0x416   : > { %3344 = vmax.xlane.f32.xlu1 %v3343_v9 }
 0x418   : > { %3335 = vmax.xlane.f32.xlu0 %v3334_v23 }
 0x41a   : > { %3338 = vmax.xlane.f32.xlu1 %v3337_v20 }
 0x41c   : > { %3329 = vmax.xlane.f32.xlu0 %v3328_v11 }
 0x41e   : > { %3332 = vmax.xlane.f32.xlu1 %v3331_v12 }
 0x45c   : > { %v3318_v27 = vpop.xlane.xlu0 %3317  ;;  %v3300_v28 = vpop.xlane.xlu1 %3299 }
 0x45d   : > { %v3352_v16 = vsub.f32 %v10355_v53, %v3318_v27  ;;  %v3346_v17 = vsub.f32 %v10357_v24, %v3300_v28 }
 0x45f   : > { %v3362_v51 = vmul.f32 1.442695, %v3346_v17  ;;  %v3374_v36 = vmul.f32 1.442695, %v3352_v16 }
 0x460   : > { %v3312_v37 = vpop.xlane.xlu0 %3311  ;;  %v3303_v3 = vpop.xlane.xlu1 %3302 }
 0x461   : > { %v3350_v38 = vsub.f32 %v10363_v10, %v3312_v37  ;;  %v3347_v39 = vsub.f32 %v10365_v21, %v3303_v3  ;;  %9447 = vpow2.f32 %v3362_v51 }
 0x462   : > { %9449 = vpow2.f32 %v3374_v36 }
 0x463   : > { %v3364_v41 = vmul.f32 1.442695, %v3347_v39  ;;  %v3370_v42 = vmul.f32 1.442695, %v3350_v38 }
 0x464   : > { %v3315_v45 = vpop.xlane.xlu0 %3314  ;;  %v3321_v46 = vpop.xlane.xlu1 %3320 }
 0x465   : > { %v3351_v47 = vsub.f32 %v10377_v58, %v3315_v45  ;;  %v3353_v53 = vsub.f32 %v10379_v25, %v3321_v46  ;;  %9451 = vpow2.f32 %v3364_v41 }
 0x466   : > { %9453 = vpow2.f32 %v3370_v42 }
 0x467   : > { %v3376_v24 = vmul.f32 1.442695, %v3353_v53  ;;  %v3372_v48 = vmul.f32 1.442695, %v3351_v47 }
 0x468   : > { %v3306_v49 = vpop.xlane.xlu0 %3305  ;;  %v3309_v50 = vpop.xlane.xlu1 %3308 }
 0x469   : > { %v3348_v10 = vsub.f32 %v10391_v31, %v3306_v49  ;;  %v3349_v21 = vsub.f32 %v10393_v13, %v3309_v50  ;;  %9455 = vpow2.f32 %v3376_v24 }
 0x46a   : > { %9457 = vpow2.f32 %v3372_v48 }
 0x46b   : > { %v3366_v60 = vmul.f32 1.442695, %v3348_v10  ;;  %v10471_v30 = vpop.eup %9447  ;;  %v3368_v33 = vmul.f32 1.442695, %v3349_v21 }
 0x46c   : > { %v3394_v58 = vsel %vm3086_vm0, %v10471_v30, 0.0  ;;  %v10475_v25 = vpop.eup %9449 }
 0x46d   : > { %9459 = vpow2.f32 %v3366_v60  ;;  %3395 = vadd.xlane.f32.xlu0 %v3394_v58  ;;  %v3412_v31 = vsel %vm3086_vm0, %v10475_v25, 0.0 }
 0x46e   : > { %9461 = vpow2.f32 %v3368_v33 }
 0x46f   : > { %v10477_v35 = vpop.eup %9451 }
 0x470   : > { %v3397_v13 = vsel %vm3086_vm0, %v10477_v35, 0.0  ;;  %v10483_v55 = vpop.eup %9453 }
 0x471   : > { %3413 = vadd.xlane.f32.xlu0 %v3412_v31  ;;  %3398 = vadd.xlane.f32.xlu1 %v3397_v13  ;;  %v3406_v62 = vsel %vm3086_vm0, %v10483_v55, 0.0 }
 0x473   : > { %v10485_v22 = vpop.eup %9455 }
 0x474   : > { %v3415_v63 = vsel %vm3086_vm0, %v10485_v22, 0.0  ;;  %v10491_v59 = vpop.eup %9457 }
 0x475   : > { %3407 = vadd.xlane.f32.xlu0 %v3406_v62  ;;  %3416 = vadd.xlane.f32.xlu1 %v3415_v63  ;;  %v3409_v56 = vsel %vm3086_vm0, %v10491_v59, 0.0 }
 0x477   : > { %v10493_v7 = vpop.eup %9459 }
 0x478   : > { %v3400_v14 = vsel %vm3086_vm0, %v10493_v7, 0.0  ;;  %v10499_v57 = vpop.eup %9461 }
 0x479   : > { %3401 = vadd.xlane.f32.xlu0 %v3400_v14  ;;  %3410 = vadd.xlane.f32.xlu1 %v3409_v56  ;;  %v3403_v9 = vsel %vm3086_vm0, %v10499_v57, 0.0 }
 0x47d   : > { %3404 = vadd.xlane.f32.xlu1 %v3403_v9 }
 0x49d   : > { %v3324_v6 = vpop.xlane.xlu0 %3323 }
 0x49e   : > { %v3354_v15 = vsub.f32 %v10416_v32, %v3324_v6 }
 0x49f   : > { %v3327_v23 = vpop.xlane.xlu1 %3326 }
 0x4a0   : > { %v3378_v20 = vmul.f32 1.442695, %v3354_v15  ;;  %v3355_v11 = vsub.f32 %v10423_v61, %v3327_v23 }
 0x4a1   : > { %v3342_v12 = vpop.xlane.xlu0 %3341 }
 0x4a2   : > { %9463 = vpow2.f32 %v3378_v20  ;;  %v3380_v27 = vmul.f32 1.442695, %v3355_v11  ;;  %v3360_v28 = vsub.f32 %v10425_v4, %v3342_v12 }
 0x4a3   : > { %v3345_v16 = vpop.xlane.xlu1 %3344 }
 0x4a4   : > { %9465 = vpow2.f32 %v3380_v27  ;;  %v3390_v17 = vmul.f32 1.442695, %v3360_v28  ;;  %v3361_v51 = vsub.f32 %v10432_v5, %v3345_v16 }
 0x4a5   : > { %v3336_v36 = vpop.xlane.xlu0 %3335 }
 0x4a6   : > { %9467 = vpow2.f32 %v3390_v17  ;;  %v3392_v37 = vmul.f32 1.442695, %v3361_v51  ;;  %v3358_v3 = vsub.f32 %v10439_v19, %v3336_v36 }
 0x4a7   : > { %v3339_v32 = vpop.xlane.xlu1 %3338 }
 0x4a8   : > { %9469 = vpow2.f32 %v3392_v37  ;;  %v3386_v38 = vmul.f32 1.442695, %v3358_v3  ;;  %v3359_v61 = vsub.f32 %v10446_v29, %v3339_v32 }
 0x4a9   : > { %v3330_v39 = vpop.xlane.xlu0 %3329 }
 0x4aa   : > { %9471 = vpow2.f32 %v3386_v38  ;;  %v3388_v41 = vmul.f32 1.442695, %v3359_v61  ;;  %v3356_v4 = vsub.f32 %v10453_v8, %v3330_v39 }
 0x4ab   : > { %v3333_v42 = vpop.xlane.xlu1 %3332 }
 0x4ac   : > { %v10510_v45 = vpop.eup %9463  ;;  %9473 = vpow2.f32 %v3388_v41  ;;  %v3382_v5 = vmul.f32 1.442695, %v3356_v4  ;;  %v3357_v46 = vsub.f32 %v10457_v52, %v3333_v42 }
 0x4ad   : > { %v3418_v19 = vsel %vm3086_vm0, %v10510_v45, 0.0 }
 0x4ae   : > { %v10515_v47 = vpop.eup %9465  ;;  %9475 = vpow2.f32 %v3382_v5  ;;  %v3384_v53 = vmul.f32 1.442695, %v3357_v46  ;;  %3419 = vadd.xlane.f32.xlu0 %v3418_v19 }
 0x4af   : > { %v3421_v29 = vsel %vm3086_vm0, %v10515_v47, 0.0 }
 0x4b0   : > { %v10519_v24 = vpop.eup %9467  ;;  %9477 = vpow2.f32 %v3384_v53  ;;  %3422 = vadd.xlane.f32.xlu1 %v3421_v29 }
 0x4b1   : > { %v3436_v8 = vsel %vm3086_vm0, %v10519_v24, 0.0 }
 0x4b2   : > { %v10523_v48 = vpop.eup %9469  ;;  %3437 = vadd.xlane.f32.xlu0 %v3436_v8 }
 0x4b3   : > { %v3439_v52 = vsel %vm3086_vm0, %v10523_v48, 0.0 }
 0x4b4   : > { %v10527_v49 = vpop.eup %9471  ;;  %3440 = vadd.xlane.f32.xlu1 %v3439_v52 }
 0x4b5   : > { %v3430_v50 = vsel %vm3086_vm0, %v10527_v49, 0.0 }
 0x4b6   : > { %v10531_v10 = vpop.eup %9473  ;;  %3431 = vadd.xlane.f32.xlu0 %v3430_v50 }
 0x4b7   : > { %v3433_v21 = vsel %vm3086_vm0, %v10531_v10, 0.0 }
 0x4b8   : > { %v10535_v60 = vpop.eup %9475  ;;  %3434 = vadd.xlane.f32.xlu1 %v3433_v21 }
 0x4b9   : > { %v3424_v33 = vsel %vm3086_vm0, %v10535_v60, 0.0 }
 0x4ba   : > { %v10539_v58 = vpop.eup %9477  ;;  %3425 = vadd.xlane.f32.xlu0 %v3424_v33 }
 0x4bb   : > { %v3427_v31 = vsel %vm3086_vm0, %v10539_v58, 0.0 }
 0x4bc   : > { %3428 = vadd.xlane.f32.xlu1 %v3427_v31 }
 0x4fa   : > { %v3396_v13 = vpop.xlane.xlu0 %3395 }
 0x4fb   : > { %9479 = vrcp.f32 %v3396_v13 }
 0x4fe   : > { %v3414_v62 = vpop.xlane.xlu0 %3413  ;;  %v3399_v63 = vpop.xlane.xlu1 %3398 }
 0x4ff   : > { %9481 = vrcp.f32 %v3399_v63 }
 0x502   : > { %v3408_v14 = vpop.xlane.xlu0 %3407  ;;  %v3417_v56 = vpop.xlane.xlu1 %3416 }
 0x503   : > { %9483 = vrcp.f32 %v3417_v56  ;;  %v9023_v56 = vld [vmem:[%s9675_s22 + $0xe0] ss:$12 sps:$4 sm:$0xff]  }
 0x504   : > { %9485 = vrcp.f32 %v3408_v14 }
 0x505   : > { %9487 = vrcp.f32 %v3414_v62  ;;  %v9480_v15 = vpop.eup %9479  ;;  %v9019_v62 = vld [vmem:[%s9675_s22 + $0x8] ss:$12 sps:$4 sm:$0xff]  }
 0x506   : > { %v3402_v9 = vpop.xlane.xlu0 %3401  ;;  %v3411_v6 = vpop.xlane.xlu1 %3410  ;;  %v3458_v11 = vmul.f32 %v9480_v15, %v10471_v30  ;;  %v9028_v15 = vld [vmem:[%s9675_s22 + $0xf8] ss:$12 sps:$4 sm:$0xff]  }
 0x507   : > { %9489 = vrcp.f32 %v3411_v6  ;;  %v9024_v6 = vld [vmem:[%s9675_s22 + $0x20] ss:$12 sps:$4 sm:$0xff]  }
 0x508   : > { %9491 = vrcp.f32 %v3402_v9 }
 0x509   : > { %v9482_v23 = vpop.eup %9481 }
 0x50a   : > { %v3405_v20 = vpop.xlane.xlu1 %3404  ;;  %v3459_v12 = vmul.f32 %v9482_v23, %v10477_v35  ;;  %v9029_v23 = vld [vmem:[%s9675_s22 + $0x38] ss:$12 sps:$4 sm:$0xff]  }
 0x50b   : > { %9493 = vrcp.f32 %v3405_v20  ;;  %v9033_v20 = vld [vmem:[%s9675_s22 + $0x110] ss:$12 sps:$4 sm:$0xff]  }
 0x50c   : > { %v3474_v27 = vpack.c.bf16 %v3459_v12, %v3458_v11  ;;  %v8997_v11 = vld [vmem:[%s9675_s22 + $0x30] ss:$12 sps:$4 sm:$0xff]   ;;  %v9002_v12 = vld [vmem:[%s9675_s22 + $0x4c] ss:$12 sps:$4 sm:$0xff]  }
 0x50d   : > { %v9484_v28 = vpop.eup %9483 }
 0x50e   : > { %8302 = vmatprep.mubr.msk.bf16.mxu0 %vm3086_vm0, %v3474_v27  ;;  %v9486_v16 = vpop.eup %9485  ;;  %v3465_v36 = vmul.f32 %v9484_v28, %v10485_v22  ;;  %v9034_v27 = vld [vmem:[%s9675_s22 + $0x50] ss:$12 sps:$4 sm:$0xff]   ;;  %v9038_v28 = vld [vmem:[%s9675_s22 + $0x128] ss:$12 sps:$4 sm:$0xff]  }
 0x50f   : > { %v9488_v17 = vpop.eup %9487  ;;  %v3462_v3 = vmul.f32 %v9486_v16, %v10483_v55  ;;  %v9018_v55 = vld [vmem:[%s9675_s22 + $0xc8] ss:$12 sps:$4 sm:$0xff]  }
 0x510   : > { %v3464_v30 = vmul.f32 %v9488_v17, %v10475_v25  ;;  %v8993_v25 = vld [vmem:[%s9675_s22 + $0x4] ss:$12 sps:$4 sm:$0xff]   ;;  %v9000_v16 = vld [vmem:[%s9675_s22 + $0x48] ss:$12 sps:$4 sm:$0xff]  }
 0x511   : > { %v9490_v51 = vpop.eup %9489  ;;  %v9005_v17 = vld [vmem:[%s9675_s22 + $0x64] ss:$12 sps:$4 sm:$0xff]  }
 0x512   : > { %v9492_v37 = vpop.eup %9491  ;;  %v3463_v32 = vmul.f32 %v9490_v51, %v10491_v59  ;;  %v3477_v41 = vpack.c.bf16 %v3465_v36, %v3464_v30  ;;  %v9039_v51 = vld [vmem:[%s9675_s22 + $0x68] ss:$12 sps:$4 sm:$0xff]   ;;  %v9043_v36 = vld [vmem:[%s9675_s22 + $0x140] ss:$12 sps:$4 sm:$0xff]   ;;  %v9006_v30 = vld [vmem:[%s9675_s22 + $0x78] ss:$12 sps:$4 sm:$0xff]  }
 0x513   : > { %v3460_v61 = vmul.f32 %v9492_v37, %v10493_v7  ;;  %v9003_v37 = vld [vmem:[%s9675_s22 + $0x60] ss:$12 sps:$4 sm:$0xff]  }
 0x514   : > { %v3476_v35 = vpack.c.bf16 %v3463_v32, %v3462_v3  ;;  %v9008_v3 = vld [vmem:[%s9675_s22 + $0x7c] ss:$12 sps:$4 sm:$0xff]   ;;  %v9044_v32 = vld [vmem:[%s9675_s22 + $0x80] ss:$12 sps:$4 sm:$0xff]  }
 0x515   : > { %v9494_v38 = vpop.eup %9493 }
 0x516   : > { %v3461_v39 = vmul.f32 %v9494_v38, %v10499_v57  ;;  %8310 = vmatprep.mubr.msk.bf16.mxu1 %vm3086_vm0, %v3476_v35  ;;  %v9011_v38 = vld [vmem:[%s9675_s22 + $0x94] ss:$12 sps:$4 sm:$0xff]   ;;  %v9048_v35 = vld [vmem:[%s9675_s22 + $0x158] ss:$12 sps:$4 sm:$0xff]  }
 0x517   : > { %8311 = vmatmul.mubr.msk.bf16.vlgmr.msra.gmra.mrb[40].mxu1 %vm3086_vm0, %v3477_v41  ;;  %v9014_v41 = vld [vmem:[%s9675_s22 + $0xac] ss:$12 sps:$4 sm:$0xff]  }
 0x518   : > { %v3475_v22 = vpack.c.bf16 %v3461_v39, %v3460_v61  ;;  %8323 = vmatpush3.bf16.msra.mxu1 %v10327_v18  ;;  %v9009_v61 = vld [vmem:[%s9675_s22 + $0x90] ss:$12 sps:$4 sm:$0xff]   ;;  %v9049_v39 = vld [vmem:[%s9675_s22 + $0x98] ss:$12 sps:$4 sm:$0xff]  }
 0x519   : > { %8324 = vmatprep.subr.bf16.mxu1 %v10333_v54 }
 0x51a   : > { %8303 = vmatmul.mubr.msk.bf16.vlgmr.msra.gmra.mrb[32].mxu0 %vm3086_vm0, %v3475_v22  ;;  %v9053_v22 = vld [vmem:[%s9675_s22 + $0x170] ss:$12 sps:$4 sm:$0xff]  }
 0x51b   : > { %8315 = vmatpush3.bf16.msra.mxu0 %v10325_v44 }
 0x51c   : > { %8316 = vmatprep.subr.bf16.mxu0 %v10331_v26  ;;  %8325 = vmatpush3.bf16.msra.mxu1 %v10333_v54 }
 0x51d   : > { %8106 = vmatprep.subr.bf16.mxu1 %v9018_v55  ;;  %v9012_v55 = vld [vmem:[%s9675_s22 + $0xa8] ss:$12 sps:$4 sm:$0xff]  }
 0x51f   : > { %8317 = vmatpush3.bf16.msra.mxu0 %v10331_v26 }
 0x520   : > { %4378 = vmatprep.subr.bf16.mxu0 %v8993_v25  ;;  %v9054_v25 = vld [vmem:[%s9675_s22 + $0xb0] ss:$12 sps:$4 sm:$0xff]  }
 0x53b   : > { %v3420_v59 = vpop.xlane.xlu0 %3419 }
 0x53c   : > { %9495 = vrcp.f32 %v3420_v59  ;;  %v9017_v59 = vld [vmem:[%s9675_s22 + $0xc4] ss:$12 sps:$4 sm:$0xff]  }
 0x53d   : > { %v3423_v7 = vpop.xlane.xlu1 %3422 }
 0x53e   : > { %9497 = vrcp.f32 %v3423_v7  ;;  %v9015_v7 = vld [vmem:[%s9675_s22 + $0xc0] ss:$12 sps:$4 sm:$0xff]  }
 0x53f   : > { %v3438_v18 = vpop.xlane.xlu0 %3437 }
 0x541   : > { %v3441_v57 = vpop.xlane.xlu1 %3440 }
 0x542   : > { %9499 = vrcp.f32 %v3441_v57  ;;  %v9020_v57 = vld [vmem:[%s9675_s22 + $0xd8] ss:$12 sps:$4 sm:$0xff]  }
 0x543   : > { %v3432_v4 = vpop.xlane.xlu0 %3431 }
 0x544   : > { %9501 = vrcp.f32 %v3432_v4  ;;  %v9027_v4 = vld [vmem:[%s9675_s22 + $0xf4] ss:$12 sps:$4 sm:$0xff]  }
 0x545   : > { %9503 = vrcp.f32 %v3438_v18  ;;  %v3435_v44 = vpop.xlane.xlu1 %3434  ;;  %v9022_v18 = vld [vmem:[%s9675_s22 + $0xdc] ss:$12 sps:$4 sm:$0xff]  }
 0x546   : > { %v9496_v42 = vpop.eup %9495  ;;  %9505 = vrcp.f32 %v3435_v44  ;;  %v9025_v44 = vld [vmem:[%s9675_s22 + $0xf0] ss:$12 sps:$4 sm:$0xff]  }
 0x547   : > { %v3426_v5 = vpop.xlane.xlu0 %3425  ;;  %v3466_v26 = vmul.f32 %v9496_v42, %v10510_v45  ;;  %v9032_v42 = vld [vmem:[%s9675_s22 + $0x10c] ss:$12 sps:$4 sm:$0xff]  }
 0x548   : > { %v9498_v46 = vpop.eup %9497  ;;  %9507 = vrcp.f32 %v3426_v5  ;;  %v9030_v5 = vld [vmem:[%s9675_s22 + $0x108] ss:$12 sps:$4 sm:$0xff]  }
 0x549   : > { %v3429_v54 = vpop.xlane.xlu1 %3428  ;;  %v3467_v19 = vmul.f32 %v9498_v46, %v10515_v47  ;;  %v9037_v46 = vld [vmem:[%s9675_s22 + $0x124] ss:$12 sps:$4 sm:$0xff]  }
 0x54a   : > { %9509 = vrcp.f32 %v3429_v54  ;;  %v9035_v54 = vld [vmem:[%s9675_s22 + $0x120] ss:$12 sps:$4 sm:$0xff]  }
 0x54b   : > { %v3478_v53 = vpack.c.bf16 %v3467_v19, %v3466_v26  ;;  %v9042_v26 = vld [vmem:[%s9675_s22 + $0x13c] ss:$12 sps:$4 sm:$0xff]   ;;  %v9040_v19 = vld [vmem:[%s9675_s22 + $0x138] ss:$12 sps:$4 sm:$0xff]  }
 0x54c   : > { %v9500_v29 = vpop.eup %9499 }
 0x54d   : > { %8318 = vmatprep.mubr.msk.bf16.mxu0 %vm3086_vm0, %v3478_v53  ;;  %v3473_v21 = vmul.f32 %v9500_v29, %v10523_v48  ;;  %v9047_v53 = vld [vmem:[%s9675_s22 + $0x154] ss:$12 sps:$4 sm:$0xff]   ;;  %v9045_v29 = vld [vmem:[%s9675_s22 + $0x150] ss:$12 sps:$4 sm:$0xff]  }
 0x54e   : > { %v9502_v8 = vpop.eup %9501 }
 0x54f   : > { %v9504_v52 = vpop.eup %9503  ;;  %v3470_v33 = vmul.f32 %v9502_v8, %v10527_v49  ;;  %v8991_v49 = vld [vmem:[%s9675_s22] ss:$12 sps:$4 sm:$0xff]  }
 0x550   : > { %v9506_v50 = vpop.eup %9505  ;;  %v3472_v47 = vmul.f32 %v9504_v52, %v10519_v24  ;;  %v9052_v8 = vld [vmem:[%s9675_s22 + $0x16c] ss:$12 sps:$4 sm:$0xff]   ;;  %v9050_v52 = vld [vmem:[%s9675_s22 + $0x168] ss:$12 sps:$4 sm:$0xff]  }
 0x551   : > { %v3471_v31 = vmul.f32 %v9506_v50, %v10531_v10  ;;  %v8996_v10 = vld [vmem:[%s9675_s22 + $0x1c] ss:$12 sps:$4 sm:$0xff]  }
 0x552   : > { %v9508_v45 = vpop.eup %9507  ;;  %v3481_v14 = vpack.c.bf16 %v3473_v21, %v3472_v47  ;;  %v9079_v50 = vld [vmem:[%s9675_s22 + $0x248] ss:$12 sps:$4 sm:$0xff]   ;;  %v9057_v21 = vld [vmem:[%s9675_s22 + $0x184] ss:$12 sps:$4 sm:$0xff]  }
 0x553   : > { %v3480_v13 = vpack.c.bf16 %v3471_v31, %v3470_v33  ;;  %v3468_v9 = vmul.f32 %v9508_v45, %v10535_v60  ;;  %v8994_v60 = vld [vmem:[%s9675_s22 + $0x18] ss:$12 sps:$4 sm:$0xff]  }
 0x554   : > { %v9510_v63 = vpop.eup %9509 }
 0x555   : > { %v3469_v48 = vmul.f32 %v9510_v63, %v10539_v58  ;;  %8326 = vmatprep.mubr.msk.bf16.mxu1 %vm3086_vm0, %v3480_v13  ;;  %v8999_v58 = vld [vmem:[%s9675_s22 + $0x34] ss:$12 sps:$4 sm:$0xff]  }
 0x556   : > { %8327 = vmatmul.mubr.msk.bf16.vlgmr.msra.gmra.mrb[44].mxu1 %vm3086_vm0, %v3481_v14 }
 0x557   : > { %v3479_v24 = vpack.c.bf16 %v3469_v48, %v3468_v9  ;;  %8107 = vmatpush3.bf16.msra.mxu1 %v9019_v62 }
 0x558   : > { %8108 = vmatprep.subr.bf16.mxu1 %v9023_v56 }
 0x559   : > { %8319 = vmatmul.mubr.msk.bf16.vlgmr.msra.gmra.mrb[36].mxu0 %vm3086_vm0, %v3479_v24 }
 0x55a   : > { %4379 = vmatpush1.bf16.msra.mxu0 %v8991_v49  ;;  %v9055_v49 = vld [vmem:[%s9675_s22 + $0x180] ss:$12 sps:$4 sm:$0xff]  }
 0x55b   : > { %4380 = vmatprep.subr.bf16.mxu0 %v8996_v10  ;;  %8109 = vmatpush3.bf16.msra.mxu1 %v9024_v6  ;;  %v9060_v10 = vld [vmem:[%s9675_s22 + $0x19c] ss:$12 sps:$4 sm:$0xff]  }
 0x55c   : > { %8110 = vmatprep.subr.bf16.mxu1 %v9028_v15  ;;  %v9083_v6 = vld [vmem:[%s9675_s22 + $0x188] ss:$12 sps:$4 sm:$0xff]   ;;  %v9084_v15 = vld [vmem:[%s9675_s22 + $0x260] ss:$12 sps:$4 sm:$0xff]  }
 0x55e   : > { %4381 = vmatpush1.bf16.msra.mxu0 %v8994_v60  ;;  %v9058_v60 = vld [vmem:[%s9675_s22 + $0x198] ss:$12 sps:$4 sm:$0xff]  }
 0x55f   : > { %4382 = vmatprep.subr.bf16.mxu0 %v8999_v58  ;;  %8111 = vmatpush3.bf16.msra.mxu1 %v9029_v23  ;;  %v9063_v58 = vld [vmem:[%s9675_s22 + $0x1b4] ss:$12 sps:$4 sm:$0xff]  }
 0x560   : > { %8112 = vmatprep.subr.bf16.mxu1 %v9033_v20  ;;  %v9088_v23 = vld [vmem:[%s9675_s22 + $0x1a0] ss:$12 sps:$4 sm:$0xff]   ;;  %v9061_v20 = vld [vmem:[%s9675_s22 + $0x1b0] ss:$12 sps:$4 sm:$0xff]  }
 0x562   : > { %4383 = vmatpush1.bf16.msra.mxu0 %v8997_v11  ;;  %v9089_v11 = vld [vmem:[%s9675_s22 + $0x278] ss:$12 sps:$4 sm:$0xff]  }
 0x563   : > { %4384 = vmatprep.subr.bf16.mxu0 %v9002_v12  ;;  %8113 = vmatpush3.bf16.msra.mxu1 %v9034_v27  ;;  %v9066_v12 = vld [vmem:[%s9675_s22 + $0x1cc] ss:$12 sps:$4 sm:$0xff]  }
 0x564   : > { %8114 = vmatprep.subr.bf16.mxu1 %v9038_v28  ;;  %v9093_v27 = vld [vmem:[%s9675_s22 + $0x1b8] ss:$12 sps:$4 sm:$0xff]   ;;  %v9094_v28 = vld [vmem:[%s9675_s22 + $0x290] ss:$12 sps:$4 sm:$0xff]  }
 0x566   : > { %4385 = vmatpush1.bf16.msra.mxu0 %v9000_v16  ;;  %v9064_v16 = vld [vmem:[%s9675_s22 + $0x1c8] ss:$12 sps:$4 sm:$0xff]  }
 0x567   : > { %4386 = vmatprep.subr.bf16.mxu0 %v9005_v17  ;;  %8115 = vmatpush3.bf16.msra.mxu1 %v9039_v51  ;;  %v9069_v17 = vld [vmem:[%s9675_s22 + $0x1e4] ss:$12 sps:$4 sm:$0xff]  }
 0x568   : > { %8116 = vmatprep.subr.bf16.mxu1 %v9043_v36  ;;  %v9098_v51 = vld [vmem:[%s9675_s22 + $0x1d0] ss:$12 sps:$4 sm:$0xff]   ;;  %v9099_v36 = vld [vmem:[%s9675_s22 + $0x2a8] ss:$12 sps:$4 sm:$0xff]  }
 0x56a   : > { %4387 = vmatpush1.bf16.msra.mxu0 %v9003_v37  ;;  %v9067_v37 = vld [vmem:[%s9675_s22 + $0x1e0] ss:$12 sps:$4 sm:$0xff]  }
 0x56b   : > { %4388 = vmatprep.subr.bf16.mxu0 %v9008_v3  ;;  %8117 = vmatpush3.bf16.msra.mxu1 %v9044_v32  ;;  %v9072_v3 = vld [vmem:[%s9675_s22 + $0x1fc] ss:$12 sps:$4 sm:$0xff]  }
 0x56c   : > { %8118 = vmatprep.subr.bf16.mxu1 %v9048_v35  ;;  %v9103_v32 = vld [vmem:[%s9675_s22 + $0x1e8] ss:$12 sps:$4 sm:$0xff]  }
 0x56d   : > { %v9075_v35 = vld [vmem:[%s9675_s22 + $0x214] ss:$12 sps:$4 sm:$0xff]  }
 0x56e   : > { %4389 = vmatpush1.bf16.msra.mxu0 %v9006_v30  ;;  %v9104_v30 = vld [vmem:[%s9675_s22 + $0x2c0] ss:$12 sps:$4 sm:$0xff]  }
 0x56f   : > { %4390 = vmatprep.subr.bf16.mxu0 %v9011_v38  ;;  %8119 = vmatpush3.bf16.msra.mxu1 %v9049_v39  ;;  %v9070_v38 = vld [vmem:[%s9675_s22 + $0x1f8] ss:$12 sps:$4 sm:$0xff]  }
 0x570   : > { %8120 = vmatprep.subr.bf16.mxu1 %v9053_v22  ;;  %v9109_v39 = vld [vmem:[%s9675_s22 + $0x2d8] ss:$12 sps:$4 sm:$0xff]  }
 0x571   : > { %v9078_v22 = vld [vmem:[%s9675_s22 + $0x22c] ss:$12 sps:$4 sm:$0xff]  }
 0x572   : > { %4391 = vmatpush1.bf16.msra.mxu0 %v9009_v61  ;;  %v9108_v61 = vld [vmem:[%s9675_s22 + $0x200] ss:$12 sps:$4 sm:$0xff]  }
 0x573   : > { %4392 = vmatprep.subr.bf16.mxu0 %v9014_v41  ;;  %8121 = vmatpush3.bf16.msra.mxu1 %v9054_v25  ;;  %v9073_v41 = vld [vmem:[%s9675_s22 + $0x210] ss:$12 sps:$4 sm:$0xff]  }
 0x574   : > { %8134 = vmatprep.subr.bf16.mxu1 %v9079_v50  ;;  %v9114_v25 = vld [vmem:[%s9675_s22 + $0x2f0] ss:$12 sps:$4 sm:$0xff]  }
 0x576   : > { %4393 = vmatpush1.bf16.msra.mxu0 %v9012_v55  ;;  %v9113_v55 = vld [vmem:[%s9675_s22 + $0x218] ss:$12 sps:$4 sm:$0xff]  }
 0x577   : > { %4394 = vmatprep.subr.bf16.mxu0 %v9017_v59  ;;  %v9076_v59 = vld [vmem:[%s9675_s22 + $0x228] ss:$12 sps:$4 sm:$0xff]  }
 0x57a   : > { %4395 = vmatpush1.bf16.msra.mxu0 %v9015_v7  ;;  %v9082_v7 = vld [vmem:[%s9675_s22 + $0x244] ss:$12 sps:$4 sm:$0xff]  }
 0x57b   : > { %4396 = vmatprep.subr.bf16.mxu0 %v9022_v18  ;;  %v9118_v18 = vld [vmem:[%s9675_s22 + $0x230] ss:$12 sps:$4 sm:$0xff]  }
 0x57e   : > { %4397 = vmatpush1.bf16.msra.mxu0 %v9020_v57  ;;  %v9080_v57 = vld [vmem:[%s9675_s22 + $0x240] ss:$12 sps:$4 sm:$0xff]  }
 0x57f   : > { %4398 = vmatprep.subr.bf16.mxu0 %v9027_v4  ;;  %v9087_v4 = vld [vmem:[%s9675_s22 + $0x25c] ss:$12 sps:$4 sm:$0xff]  }
 0x582   : > { %4399 = vmatpush1.bf16.msra.mxu0 %v9025_v44  ;;  %v9085_v44 = vld [vmem:[%s9675_s22 + $0x258] ss:$12 sps:$4 sm:$0xff]  }
 0x583   : > { %4400 = vmatprep.subr.bf16.mxu0 %v9032_v42  ;;  %v9092_v42 = vld [vmem:[%s9675_s22 + $0x274] ss:$12 sps:$4 sm:$0xff]  }
 0x586   : > { %4401 = vmatpush1.bf16.msra.mxu0 %v9030_v5  ;;  %v9090_v5 = vld [vmem:[%s9675_s22 + $0x270] ss:$12 sps:$4 sm:$0xff]  }
 0x587   : > { %4402 = vmatprep.subr.bf16.mxu0 %v9037_v46  ;;  %v9097_v46 = vld [vmem:[%s9675_s22 + $0x28c] ss:$12 sps:$4 sm:$0xff]  }
 0x58a   : > { %4403 = vmatpush1.bf16.msra.mxu0 %v9035_v54  ;;  %v9095_v54 = vld [vmem:[%s9675_s22 + $0x288] ss:$12 sps:$4 sm:$0xff]  }
 0x58b   : > { %4404 = vmatprep.subr.bf16.mxu0 %v9042_v26  ;;  %v9102_v26 = vld [vmem:[%s9675_s22 + $0x2a4] ss:$12 sps:$4 sm:$0xff]  }
 0x58e   : > { %4405 = vmatpush1.bf16.msra.mxu0 %v9040_v19  ;;  %v9100_v19 = vld [vmem:[%s9675_s22 + $0x2a0] ss:$12 sps:$4 sm:$0xff]  }
 0x58f   : > { %4406 = vmatprep.subr.bf16.mxu0 %v9047_v53  ;;  %v9107_v53 = vld [vmem:[%s9675_s22 + $0x2bc] ss:$12 sps:$4 sm:$0xff]  }
 0x592   : > { %4407 = vmatpush1.bf16.msra.mxu0 %v9045_v29  ;;  %v9105_v29 = vld [vmem:[%s9675_s22 + $0x2b8] ss:$12 sps:$4 sm:$0xff]  }
 0x593   : > { %4408 = vmatprep.subr.bf16.mxu0 %v9052_v8  ;;  %v9112_v8 = vld [vmem:[%s9675_s22 + $0x2d4] ss:$12 sps:$4 sm:$0xff]  }
 0x596   : > { %4409 = vmatpush1.bf16.msra.mxu0 %v9050_v52 }
 0x597   : > { %4431 = vmatprep.subr.bf16.mxu0 %v9057_v21  ;;  %v9110_v21 = vld [vmem:[%s9675_s22 + $0x2d0] ss:$12 sps:$4 sm:$0xff]  }
 0x5ea   : > { %v8312_v33 = vpop.f32.mrb[40].mxu1 }
 0x5eb   : > { %v3581_v31 = vpop.f32.mrb[41].mxu1 }
 0x5ec   : > { %v8313_v45 = vpop.f32.mrb[42].mxu1 }
 0x5ed   : > { %v8304_v47 = vpop.f32.mrb[32].mxu0  ;;  %v3597_v13 = vpack.c.bf16 %v8313_v45, %v8312_v33  ;;  %v3584_v62 = vpop.f32.mrb[43].mxu1 }
 0x5ee   : > { %v3522_v63 = vpop.f32.mrb[33].mxu0  ;;  %v3596_v14 = vpack.c.bf16 %v3584_v62, %v3581_v31  ;;  %v9117_v31 = vld [vmem:[%s9675_s22 + $0x2ec] ss:$12 sps:$4 sm:$0xff]  }
 0x5ef   : > { %v8305_v56 = vpop.f32.mrb[34].mxu0 }
 0x5f0   : > { %v3538_v9 = vpack.c.bf16 %v8305_v56, %v8304_v47  ;;  %v3525_v48 = vpop.f32.mrb[35].mxu0  ;;  %4410 = vmatprep.mubr.bf16.mxu0 %v3596_v14  ;;  %4516 = vmatprep.mubr.bf16.mxu1 %v3596_v14  ;;  %v9115_v56 = vld [vmem:[%s9675_s22 + $0x2e8] ss:$12 sps:$4 sm:$0xff]  }
 0x5f1   : > { %v3537_v24 = vpack.c.bf16 %v3525_v48, %v3522_v63 }
 0x5f3   : > { %4411 = vmatmul.mubr.bf16.vlgmr.msra.gmra.mrb[40].mxu0 %v3537_v24  ;;  %4517 = vmatmul.mubr.bf16.vlgmr.msra.gmra.mrb[48].mxu1 %v3537_v24 }
 0x5f4   : > { %4432 = vmatpush1.bf16.msra.mxu0 %v9055_v49  ;;  %4420 = vmatprep.mubr.bf16.mxu0 %v3597_v13 }
 0x5f5   : > { %4524 = vmatprep.mubr.bf16.mxu1 %v3597_v13  ;;  %4433 = vmatprep.subr.bf16.mxu0 %v9060_v10 }
 0x5f6   : > { %8135 = vmatpush3.bf16.msra.mxu1 %v9083_v6 }
 0x5f7   : > { %8136 = vmatprep.subr.bf16.mxu1 %v9084_v15 }
 0x5f8   : > { %4434 = vmatpush1.bf16.msra.mxu0 %v9058_v60 }
 0x5f9   : > { %4435 = vmatprep.subr.bf16.mxu0 %v9063_v58 }
 0x5fa   : > { %8137 = vmatpush3.bf16.msra.mxu1 %v9088_v23 }
 0x5fb   : > { %4421 = vmatmul.mubr.bf16.gmra.mrb[44].mxu0 %v3538_v9  ;;  %4525 = vmatmul.mubr.bf16.gmra.mrb[52].mxu1 %v3538_v9 }
 0x5fc   : > { %4436 = vmatpush1.bf16.msra.mxu0 %v9061_v20  ;;  %8138 = vmatprep.subr.bf16.mxu1 %v9089_v11 }
 0x5fd   : > { %4437 = vmatprep.subr.bf16.mxu0 %v9066_v12 }
 0x5fe   : > { %8139 = vmatpush3.bf16.msra.mxu1 %v9093_v27 }
 0x5ff   : > { %8140 = vmatprep.subr.bf16.mxu1 %v9094_v28 }
 0x600   : > { %4438 = vmatpush1.bf16.msra.mxu0 %v9064_v16  ;;  %v3856_v16 = vsub.s32 1, %v10222_v40 }
 0x601   : > { %4439 = vmatprep.subr.bf16.mxu0 %v9069_v17  ;;  %v10671_v17 = vld [vmem:[%s9690_s12 + $0x10] sm:$0xff] }
 0x602   : > { %8141 = vmatpush3.bf16.msra.mxu1 %v9098_v51  ;;  %v3865_v51 = vrot.slane %v10671_v17, %v3856_v16 }
 0x603   : > { %8142 = vmatprep.subr.bf16.mxu1 %v9099_v36 }
 0x604   : > { %4440 = vmatpush1.bf16.msra.mxu0 %v9067_v37  ;;  %v10675_v37 = vld [vmem:[%s9690_s12] sm:$0xff] }
 0x605   : > { %4441 = vmatprep.subr.bf16.mxu0 %v9072_v3  ;;  %v3857_v3 = vrot.slane %v10675_v37, %v3856_v16 }
 0x606   : > { %8143 = vmatpush3.bf16.msra.mxu1 %v9103_v32 }
 0x607   : > { %8144 = vmatprep.subr.bf16.mxu1 %v9104_v30  ;;  %v10679_v30 = vld [vmem:[%s9690_s12 + $0x8] sm:$0xff] }
 0x608   : > { %4442 = vmatpush1.bf16.msra.mxu0 %v9070_v38  ;;  %v10682_v38 = vrot.slane %v10679_v30, %v3856_v16 }
 0x609   : > { %4443 = vmatprep.subr.bf16.mxu0 %v9075_v35 }
 0x60a   : > { %8145 = vmatpush3.bf16.msra.mxu1 %v9108_v61 }
 0x60b   : > { %8146 = vmatprep.subr.bf16.mxu1 %v9109_v39 }
 0x60c   : > { %4444 = vmatpush1.bf16.msra.mxu0 %v9073_v41 }
 0x60d   : > { %4445 = vmatprep.subr.bf16.mxu0 %v9078_v22  ;;  %v10686_v22 = vrot.slane %v9655_v0, %v10228_v43  ;;  %v9570_v0 = vld [vmem:[%s11565_s8] sm:$0xff] }
 0x60e   : > { %8147 = vmatpush3.bf16.msra.mxu1 %v9113_v55 }
 0x60f   : > { %8148 = vmatprep.subr.bf16.mxu1 %v9114_v25 }
 0x610   : > { %4446 = vmatpush1.bf16.msra.mxu0 %v9076_v59 }
 0x611   : > { %4447 = vmatprep.subr.bf16.mxu0 %v9082_v7 }
 0x612   : > { %8149 = vmatpush3.bf16.msra.mxu1 %v9118_v18 }
 0x614   : > { %4448 = vmatpush1.bf16.msra.mxu0 %v9080_v57 }
 0x615   : > { %4449 = vmatprep.subr.bf16.mxu0 %v9087_v4 }
 0x618   : > { %4450 = vmatpush1.bf16.msra.mxu0 %v9085_v44  ;;  %v10691_v44 = vrot.slane %v9660_v1, %v10228_v43 }
 0x619   : > { %4451 = vmatprep.subr.bf16.mxu0 %v9092_v42 }
 0x61c   : > { %4452 = vmatpush1.bf16.msra.mxu0 %v9090_v5  ;;  %v10695_v5 = vrot.slane %v9665_v2, %v10228_v43  ;;  %v9572_v2 = vld [vmem:[%s11565_s8 + $0x8] sm:$0xff] }
 0x61d   : > { %4453 = vmatprep.subr.bf16.mxu0 %v9097_v46 }
 0x620   : > { %4454 = vmatpush1.bf16.msra.mxu0 %v9095_v54  ;;  %v9571_v54 = vld [vmem:[%s11565_s8 + $0x10] sm:$0xff] }
 0x621   : > { %4455 = vmatprep.subr.bf16.mxu0 %v9102_v26 }
 0x624   : > { %4456 = vmatpush1.bf16.msra.mxu0 %v9100_v19 }
 0x625   : > { %4457 = vmatprep.subr.bf16.mxu0 %v9107_v53 }
 0x628   : > { %4458 = vmatpush1.bf16.msra.mxu0 %v9105_v29 }
 0x629   : > { %v8328_v52 = vpop.f32.mrb[44].mxu1  ;;  %4459 = vmatprep.subr.bf16.mxu0 %v9112_v8 }
 0x62a   : > { %v3699_v50 = vpop.f32.mrb[45].mxu1 }
 0x62b   : > { %v8329_v33 = vpop.f32.mrb[46].mxu1 }
 0x62c   : > { %v3715_v45 = vpack.c.bf16 %v8329_v33, %v8328_v52  ;;  %v8320_v47 = vpop.f32.mrb[36].mxu0  ;;  %v3702_v13 = vpop.f32.mrb[47].mxu1  ;;  %4460 = vmatpush1.bf16.msra.mxu0 %v9110_v21  ;;  %v9573_v52 = vld [vmem:[%s11565_s8 + $0x18] sm:$0xff]  ;;  %v9574_v21 = vld [vmem:[%s11565_s8 + $0x28] sm:$0xff] }
 0x62d   : > { %v3714_v62 = vpack.c.bf16 %v3702_v13, %v3699_v50  ;;  %v3640_v63 = vpop.f32.mrb[37].mxu0  ;;  %4461 = vmatprep.subr.bf16.mxu0 %v9117_v31 }
 0x62e   : > { %v8321_v14 = vpop.f32.mrb[38].mxu0 }
 0x62f   : > { %v3656_v9 = vpack.c.bf16 %v8321_v14, %v8320_v47  ;;  %v3643_v48 = vpop.f32.mrb[39].mxu0  ;;  %4463 = vmatprep.mubr.bf16.mxu0 %v3714_v62  ;;  %4565 = vmatprep.mubr.bf16.mxu1 %v3714_v62  ;;  %v9575_v47 = vld [vmem:[%s11565_s8 + $0x20] sm:$0xff] }
 0x630   : > { %v3655_v49 = vpack.c.bf16 %v3643_v48, %v3640_v63  ;;  %4462 = vmatpush1.bf16.msra.mxu0 %v9115_v56 }
 0x632   : > { %4566 = vmatmul.mubr.bf16.vlgmr.msra.gmra.mrb[56].mxu1 %v3655_v49 }
 0x633   : > { %4573 = vmatprep.mubr.bf16.mxu1 %v3715_v45  ;;  %4464 = vmatmul.mubr.bf16.vlgmr.msra.gmra.mrb[40].mxu0 %v3655_v49 }
 0x634   : > { %4473 = vmatprep.mubr.bf16.mxu0 %v3715_v45 }
 0x63a   : > { %4574 = vmatmul.mubr.bf16.gmra.mrb[60].mxu1 %v3656_v9 }
 0x63b   : > { %4474 = vmatmul.mubr.bf16.gmra.mrb[44].mxu0 %v3656_v9 }
 0x6c6   : > { %v8122_v24 = vpop.f32.mrb[48].mxu1 }
 0x6c7   : > { %v8123_v10 = vpop.f32.mrb[49].mxu1 }
 0x6c8   : > { %v8124_v6 = vadd.f32 %v8123_v10, %v8122_v24  ;;  %v8125_v15 = vpop.f32.mrb[50].mxu1 }
 0x6c9   : > { %v8126_v60 = vpop.f32.mrb[51].mxu1 }
 0x6ca   : > { %v8127_v58 = vadd.f32 %v8126_v60, %v8125_v15  ;;  %v4519_v35 = vadd.f32 %v8124_v6, %v3865_v51 }
 0x6cc   : > { %v4522_v25 = vadd.f32 %v8127_v58, %v3865_v51 }
 0x6ce   : > { %v8128_v23 = vpop.f32.mrb[52].mxu1 }
 0x6cf   : > { %v8129_v20 = vpop.f32.mrb[53].mxu1 }
 0x6d0   : > { %v8130_v11 = vadd.f32 %v8129_v20, %v8128_v23  ;;  %v8131_v12 = vpop.f32.mrb[54].mxu1 }
 0x6d1   : > { %v8132_v27 = vpop.f32.mrb[55].mxu1 }
 0x6d2   : > { %v8133_v28 = vadd.f32 %v8132_v27, %v8131_v12  ;;  %v4527_v14 = vadd.f32 %v8130_v11, %v3865_v51 }
 0x6d4   : > { %v4530_v60 = vadd.f32 %v8133_v28, %v3865_v51 }
 0x705   : > { %v8150_v36 = vpop.f32.mrb[56].mxu1 }
 0x706   : > { %v8151_v32 = vpop.f32.mrb[57].mxu1  ;;  %v4465_v41 = vpop.f32.mrb[40].mxu0 }
 0x707   : > { %v8152_v61 = vadd.f32 %v8151_v32, %v8150_v36  ;;  %v8153_v39 = vpop.f32.mrb[58].mxu1  ;;  %v8426_v59 = vadd.f32 %v4465_v41, %v3857_v3  ;;  %v4467_v18 = vpop.f32.mrb[41].mxu0  ;;  %v9576_v32 = vld [vmem:[%s11565_s8 + $0x30] sm:$0xff] }
 0x708   : > { %v8154_v55 = vpop.f32.mrb[59].mxu1  ;;  %v8427_v4 = vadd.f32 %v4467_v18, %v10682_v38  ;;  %v4469_v42 = vpop.f32.mrb[42].mxu0 }
 0x709   : > { %v4568_v7 = vadd.f32 %v8152_v61, %v4519_v35  ;;  %v8155_v57 = vadd.f32 %v8154_v55, %v8153_v39  ;;  %v10700_v46 = vadd.f32 %v9570_v0, %v8426_v59  ;;  %v8428_v19 = vadd.f32 %v4469_v42, %v3857_v3  ;;  %v4471_v53 = vpop.f32.mrb[43].mxu0  ;;  %v9577_v61 = vld [vmem:[%s11565_s8 + $0x40] sm:$0xff]  ;;  %v9578_v55 = vld [vmem:[%s11565_s8 + $0x38] sm:$0xff]  ;;  %v9581_v0 = vld [vmem:[%s11565_s8 + $0x50] sm:$0xff] }
 0x70a   : > { %v10710_v43 = vadd.f32 %v9572_v2, %v8427_v4  ;;  %v8429_v29 = vadd.f32 %v4471_v53, %v10682_v38  ;;  %v9580_v4 = vld [vmem:[%s11565_s8 + $0x58] sm:$0xff] }
 0x70b   : > { %v10705_v26 = vadd.f32 %v9571_v54, %v4568_v7  ;;  %v4571_v1 = vadd.f32 %v8155_v57, %v4522_v25  ;;  %v4606_v8 = vmul.f32 %v10686_v22, %v10700_v46  ;;  %v10718_v50 = vadd.f32 %v9573_v52, %v8428_v19  ;;  %v9579_v57 = vld [vmem:[%s11565_s8 + $0x48] sm:$0xff] }
 0x70c   : > { %v4607_v45 = vmul.f32 %v10691_v44, %v10710_v43  ;;  %v10730_v13 = vadd.f32 %v9575_v47, %v8429_v29  ;;  %v9122_v47 = vld [vmem:[%s9680_s26 + $0x8] ss:$20 sps:$4 sm:$0xff]  }
 0x70d   : > { %v10723_v33 = vadd.f32 %v9574_v21, %v4571_v1  ;;  %v8156_v31 = vpop.f32.mrb[60].mxu1  ;;  %v4608_v63 = vmul.f32 %v10695_v5, %v10705_v26  ;;  %v4609_v56 = vmul.f32 %v10686_v22, %v10718_v50 }
 0x70e   : > { %v8157_v62 = vpop.f32.mrb[61].mxu1  ;;  %v4610_v49 = vmul.f32 %v10691_v44, %v10730_v13  ;;  %v4475_v24 = vpop.f32.mrb[44].mxu0  ;;  %v4618_v6 = vadd.f32 %v4607_v45, %v4606_v8  ;;  %v9121_v45 = vld [vmem:[%s9680_s26 + $0x4] ss:$20 sps:$4 sm:$0xff]  }
 0x70f   : > { %v8158_v9 = vadd.f32 %v8157_v62, %v8156_v31  ;;  %v8159_v48 = vpop.f32.mrb[62].mxu1  ;;  %v4611_v15 = vmul.f32 %v10695_v5, %v10723_v33  ;;  %v8430_v58 = vadd.f32 %v4475_v24, %v3857_v3  ;;  %v4477_v20 = vpop.f32.mrb[45].mxu0  ;;  %v9119_v31 = vld [vmem:[%s9680_s26] ss:$20 sps:$4 sm:$0xff]   ;;  %5556 = vmatprep.subr.bf16.mxu1 %v9121_v45  ;;  %v9131_v24 = vld [vmem:[%s9680_s26 + $0x50] ss:$20 sps:$4 sm:$0xff]  }
 0x710   : > { %v8160_v10 = vpop.f32.mrb[63].mxu1  ;;  %v8431_v11 = vadd.f32 %v4477_v20, %v10682_v38  ;;  %v4479_v27 = vpop.f32.mrb[46].mxu0  ;;  %v4619_v16 = vadd.f32 %v4618_v6, %v4608_v63  ;;  %v4622_v36 = vadd.f32 %v4610_v49, %v4609_v56  ;;  %v9124_v62 = vld [vmem:[%s9680_s26 + $0xc] ss:$20 sps:$4 sm:$0xff]   ;;  %5557 = vmatpush1.bf16.msra.mxu1 %v9119_v31  ;;  %v9125_v56 = vld [vmem:[%s9680_s26 + $0x28] ss:$20 sps:$4 sm:$0xff]  }
 0x711   : > { %v4576_v23 = vadd.f32 %v8158_v9, %v4527_v14  ;;  %v8161_v12 = vadd.f32 %v8160_v10, %v8159_v48  ;;  %v10744_v35 = vadd.f32 %v9576_v32, %v8430_v58  ;;  %v8432_v51 = vadd.f32 %v4479_v27, %v3857_v3  ;;  %v4481_v41 = vpop.f32.mrb[47].mxu0  ;;  %v9127_v63 = vld [vmem:[%s9680_s26 + $0x2c] ss:$20 sps:$4 sm:$0xff]   ;;  %v9130_v14 = vld [vmem:[%s9680_s26 + $0x34] ss:$20 sps:$4 sm:$0xff]   ;;  %5662 = vmatprep.subr.bf16.mxu0 %v9124_v62 }
 0x712   : > { %v10754_v25 = vadd.f32 %v9578_v55, %v8431_v11  ;;  %v8433_v59 = vadd.f32 %v4481_v41, %v10682_v38  ;;  %4620 = vadd.xlane.f32.xlu0 %v4619_v16  ;;  %v4623_v7 = vadd.f32 %v4622_v36, %v4611_v15  ;;  %5663 = vmatpush1.bf16.msra.mxu0 %v9122_v47  ;;  %v9128_v9 = vld [vmem:[%s9680_s26 + $0x30] ss:$20 sps:$4 sm:$0xff]   ;;  %v9133_v48 = vld [vmem:[%s9680_s26 + $0x54] ss:$20 sps:$4 sm:$0xff]   ;;  %v9134_v10 = vld [vmem:[%s9680_s26 + $0x58] ss:$20 sps:$4 sm:$0xff]  }
 0x713   : > { %v10749_v28 = vadd.f32 %v9577_v61, %v4576_v23  ;;  %v4579_v39 = vadd.f32 %v8161_v12, %v4530_v60  ;;  %v4612_v18 = vmul.f32 %v10686_v22, %v10744_v35  ;;  %v10762_v3 = vadd.f32 %v9579_v57, %v8432_v51  ;;  %5558 = vmatprep.subr.bf16.mxu1 %v9127_v63  ;;  %v9136_v49 = vld [vmem:[%s9680_s26 + $0x5c] ss:$20 sps:$4 sm:$0xff]   ;;  %v9142_v15 = vld [vmem:[%s9680_s26 + $0x84] ss:$20 sps:$4 sm:$0xff]   ;;  %v9140_v58 = vld [vmem:[%s9680_s26 + $0x80] ss:$20 sps:$4 sm:$0xff]  }
 0x714   : > { %v4613_v38 = vmul.f32 %v10691_v44, %v10754_v25  ;;  %v10774_v54 = vadd.f32 %v9581_v0, %v8433_v59  ;;  %4624 = vadd.xlane.f32.xlu1 %v4623_v7  ;;  %5664 = vmatprep.subr.bf16.mxu0 %v9130_v14  ;;  %v9139_v6 = vld [vmem:[%s9680_s26 + $0x7c] ss:$20 sps:$4 sm:$0xff]   ;;  %v9137_v60 = vld [vmem:[%s9680_s26 + $0x78] ss:$20 sps:$4 sm:$0xff]   ;;  %v9143_v12 = vld [vmem:[%s9680_s26 + $0xa0] ss:$20 sps:$4 sm:$0xff]  }
 0x715   : > { %v10767_v42 = vadd.f32 %v9580_v4, %v4579_v39  ;;  %v4614_v19 = vmul.f32 %v10695_v5, %v10749_v28  ;;  %v4615_v1 = vmul.f32 %v10686_v22, %v10762_v3  ;;  %5559 = vmatpush1.bf16.msra.mxu1 %v9125_v56  ;;  %v9145_v23 = vld [vmem:[%s9680_s26 + $0xa4] ss:$20 sps:$4 sm:$0xff]   ;;  %v9148_v20 = vld [vmem:[%s9680_s26 + $0xac] ss:$20 sps:$4 sm:$0xff]   ;;  %v9146_v11 = vld [vmem:[%s9680_s26 + $0xa8] ss:$20 sps:$4 sm:$0xff]  }
 0x716   : > { %v4616_v53 = vmul.f32 %v10691_v44, %v10774_v54  ;;  %v4626_v2 = vadd.f32 %v4613_v38, %v4612_v18  ;;  %5665 = vmatpush1.bf16.msra.mxu0 %v9128_v9  ;;  %5560 = vmatprep.subr.bf16.mxu1 %v9133_v48  ;;  %v9151_v27 = vld [vmem:[%s9680_s26 + $0xcc] ss:$20 sps:$4 sm:$0xff]   ;;  %v9154_v16 = vld [vmem:[%s9680_s26 + $0xd4] ss:$20 sps:$4 sm:$0xff]   ;;  %v9152_v32 = vld [vmem:[%s9680_s26 + $0xd0] ss:$20 sps:$4 sm:$0xff]  }
 0x717   : > { %v4617_v29 = vmul.f32 %v10695_v5, %v10767_v42  ;;  %5666 = vmatprep.subr.bf16.mxu0 %v9136_v49  ;;  %v9149_v36 = vld [vmem:[%s9680_s26 + $0xc8] ss:$20 sps:$4 sm:$0xff]   ;;  %v9155_v39 = vld [vmem:[%s9680_s26 + $0xf0] ss:$20 sps:$4 sm:$0xff]   ;;  %v9158_v41 = vld [vmem:[%s9680_s26 + $0xf8] ss:$20 sps:$4 sm:$0xff]  }
 0x718   : > { %v4627_v8 = vadd.f32 %v4626_v2, %v4614_v19  ;;  %v4630_v52 = vadd.f32 %v4616_v53, %v4615_v1  ;;  %v9157_v61 = vld [vmem:[%s9680_s26 + $0xf4] ss:$20 sps:$4 sm:$0xff]   ;;  %v9160_v51 = vld [vmem:[%s9680_s26 + $0xfc] ss:$20 sps:$4 sm:$0xff]   ;;  %v9166_v59 = vld [vmem:[%s9680_s26 + $0x124] ss:$20 sps:$4 sm:$0xff]  }
 0x719   : > { %5561 = vmatpush1.bf16.msra.mxu1 %v9131_v24  ;;  %v9163_v55 = vld [vmem:[%s9680_s26 + $0x11c] ss:$20 sps:$4 sm:$0xff]   ;;  %v9161_v7 = vld [vmem:[%s9680_s26 + $0x118] ss:$20 sps:$4 sm:$0xff]   ;;  %v9164_v18 = vld [vmem:[%s9680_s26 + $0x120] ss:$20 sps:$4 sm:$0xff]  }
 0x71a   : > { %4628 = vadd.xlane.f32.xlu0 %v4627_v8  ;;  %v4631_v21 = vadd.f32 %v4630_v52, %v4617_v29  ;;  %5667 = vmatpush1.bf16.msra.mxu0 %v9134_v10  ;;  %v9169_v57 = vld [vmem:[%s9680_s26 + $0x144] ss:$20 sps:$4 sm:$0xff]   ;;  %v9172_v4 = vld [vmem:[%s9680_s26 + $0x14c] ss:$20 sps:$4 sm:$0xff]   ;;  %v9170_v0 = vld [vmem:[%s9680_s26 + $0x148] ss:$20 sps:$4 sm:$0xff]  }
 0x71b   : > { %5562 = vmatprep.subr.bf16.mxu1 %v9139_v6  ;;  %5668 = vmatprep.subr.bf16.mxu0 %v9142_v15  ;;  %v9167_v38 = vld [vmem:[%s9680_s26 + $0x140] ss:$20 sps:$4 sm:$0xff]   ;;  %v9173_v53 = vld [vmem:[%s9680_s26 + $0x168] ss:$20 sps:$4 sm:$0xff]   ;;  %v9176_v2 = vld [vmem:[%s9680_s26 + $0x170] ss:$20 sps:$4 sm:$0xff]  }
 0x71c   : > { %4632 = vadd.xlane.f32.xlu1 %v4631_v21  ;;  %v9175_v19 = vld [vmem:[%s9680_s26 + $0x16c] ss:$20 sps:$4 sm:$0xff]   ;;  %v9178_v1 = vld [vmem:[%s9680_s26 + $0x174] ss:$20 sps:$4 sm:$0xff]  }
 0x71d   : > { %5563 = vmatpush1.bf16.msra.mxu1 %v9137_v60 }
 0x71e   : > { %5669 = vmatpush1.bf16.msra.mxu0 %v9140_v58  ;;  %5564 = vmatprep.subr.bf16.mxu1 %v9145_v23 }
 0x71f   : > { %5670 = vmatprep.subr.bf16.mxu0 %v9148_v20 }
 0x721   : > { %5565 = vmatpush1.bf16.msra.mxu1 %v9143_v12 }
 0x722   : > { %5671 = vmatpush1.bf16.msra.mxu0 %v9146_v11  ;;  %5566 = vmatprep.subr.bf16.mxu1 %v9151_v27 }
 0x723   : > { %5672 = vmatprep.subr.bf16.mxu0 %v9154_v16 }
 0x725   : > { %5567 = vmatpush1.bf16.msra.mxu1 %v9149_v36 }
 0x726   : > { %5673 = vmatpush1.bf16.msra.mxu0 %v9152_v32  ;;  %5568 = vmatprep.subr.bf16.mxu1 %v9157_v61 }
 0x727   : > { %5674 = vmatprep.subr.bf16.mxu0 %v9160_v51 }
 0x729   : > { %5569 = vmatpush1.bf16.msra.mxu1 %v9155_v39 }
 0x72a   : > { %5675 = vmatpush1.bf16.msra.mxu0 %v9158_v41  ;;  %5570 = vmatprep.subr.bf16.mxu1 %v9163_v55 }
 0x72b   : > { %5676 = vmatprep.subr.bf16.mxu0 %v9166_v59 }
 0x72d   : > { %5571 = vmatpush1.bf16.msra.mxu1 %v9161_v7 }
 0x72e   : > { %5677 = vmatpush1.bf16.msra.mxu0 %v9164_v18  ;;  %5572 = vmatprep.subr.bf16.mxu1 %v9169_v57 }
 0x72f   : > { %5678 = vmatprep.subr.bf16.mxu0 %v9172_v4 }
 0x731   : > { %5573 = vmatpush1.bf16.msra.mxu1 %v9167_v38 }
 0x732   : > { %5679 = vmatpush1.bf16.msra.mxu0 %v9170_v0  ;;  %5574 = vmatprep.subr.bf16.mxu1 %v9175_v19  ;;  %v9181_v19 = vld [vmem:[%s9680_s26 + $0x194] ss:$20 sps:$4 sm:$0xff]  }
 0x733   : > { %5680 = vmatprep.subr.bf16.mxu0 %v9178_v1  ;;  %v9184_v1 = vld [vmem:[%s9680_s26 + $0x19c] ss:$20 sps:$4 sm:$0xff]  }
 0x735   : > { %5575 = vmatpush1.bf16.msra.mxu1 %v9173_v53  ;;  %v9179_v53 = vld [vmem:[%s9680_s26 + $0x190] ss:$20 sps:$4 sm:$0xff]  }
 0x736   : > { %5681 = vmatpush1.bf16.msra.mxu0 %v9176_v2  ;;  %v9182_v2 = vld [vmem:[%s9680_s26 + $0x198] ss:$20 sps:$4 sm:$0xff]   ;;  %5576 = vmatprep.subr.bf16.mxu1 %v9181_v19 }
 0x737   : > { %5682 = vmatprep.subr.bf16.mxu0 %v9184_v1 }
 0x739   : > { %5577 = vmatpush1.bf16.msra.mxu1 %v9179_v53 }
 0x73a   : > { %5683 = vmatpush1.bf16.msra.mxu0 %v9182_v2 }
 0x79f   : > { %v4621_v29 = vpop.xlane.xlu0 %4620 }
 0x7a0   : > { %v4634_v8 = vmul.f32 0.0032051282, %v4621_v29  ;;  %v9187_v29 = vld [vmem:[%s9680_s26 + $0x1bc] ss:$20 sps:$4 sm:$0xff]  }
 0x7a1   : > { %v4625_v52 = vpop.xlane.xlu1 %4624  ;;  %5578 = vmatprep.subr.bf16.mxu1 %v9187_v29 }
 0x7a2   : > { %v4638_v21 = vsub.f32 %v10700_v46, %v4634_v8  ;;  %v4639_v31 = vsub.f32 %v10710_v43, %v4634_v8  ;;  %v4640_v45 = vsub.f32 %v10705_v26, %v4634_v8  ;;  %v4635_v47 = vmul.f32 0.0032051282, %v4625_v52  ;;  %v9190_v8 = vld [vmem:[%s9680_s26 + $0x1c4] ss:$20 sps:$4 sm:$0xff]  }
 0x7a3   : > { %v9185_v52 = vld [vmem:[%s9680_s26 + $0x1b8] ss:$20 sps:$4 sm:$0xff]   ;;  %5684 = vmatprep.subr.bf16.mxu0 %v9190_v8 }
 0x7a4   : > { %v10828_v62 = vmul.f32 %v4638_v21, %v10686_v22  ;;  %v10831_v63 = vmul.f32 %v4639_v31, %v10691_v44  ;;  %v4641_v14 = vsub.f32 %v10718_v50, %v4635_v47  ;;  %v4642_v56 = vsub.f32 %v10730_v13, %v4635_v47  ;;  %v9188_v21 = vld [vmem:[%s9680_s26 + $0x1c0] ss:$20 sps:$4 sm:$0xff]   ;;  %5579 = vmatpush1.bf16.msra.mxu1 %v9185_v52  ;;  %v9193_v31 = vld [vmem:[%s9680_s26 + $0x1e4] ss:$20 sps:$4 sm:$0xff]  }
 0x7a5   : > { %v4643_v9 = vsub.f32 %v10723_v33, %v4635_v47  ;;  %v10837_v48 = vmul.f32 %v4640_v45, %v10695_v5  ;;  %5685 = vmatpush1.bf16.msra.mxu0 %v9188_v21  ;;  %v9196_v45 = vld [vmem:[%s9680_s26 + $0x1ec] ss:$20 sps:$4 sm:$0xff]   ;;  %5580 = vmatprep.subr.bf16.mxu1 %v9193_v31 }
 0x7a6   : > { %v10840_v46 = vmul.f32 %v4641_v14, %v10686_v22  ;;  %v10843_v26 = vmul.f32 %v4642_v56, %v10691_v44  ;;  %v4662_v43 = vmul.f32 %v10828_v62, %v10828_v62  ;;  %v4663_v49 = vmul.f32 %v10831_v63, %v10831_v63  ;;  %v9191_v47 = vld [vmem:[%s9680_s26 + $0x1e0] ss:$20 sps:$4 sm:$0xff]   ;;  %v9194_v14 = vld [vmem:[%s9680_s26 + $0x1e8] ss:$20 sps:$4 sm:$0xff]   ;;  %5686 = vmatprep.subr.bf16.mxu0 %v9196_v45 }
 0x7a7   : > { %v4629_v50 = vpop.xlane.xlu0 %4628  ;;  %v10850_v13 = vmul.f32 %v4643_v9, %v10695_v5  ;;  %v4664_v60 = vmul.f32 %v10837_v48, %v10837_v48  ;;  %v9199_v56 = vld [vmem:[%s9680_s26 + $0x20c] ss:$20 sps:$4 sm:$0xff]   ;;  %v9202_v9 = vld [vmem:[%s9680_s26 + $0x214] ss:$20 sps:$4 sm:$0xff]  }
 0x7a8   : > { %v4636_v33 = vmul.f32 0.0032051282, %v4629_v50  ;;  %v4674_v24 = vadd.f32 %v4663_v49, %v4662_v43  ;;  %v4665_v10 = vmul.f32 %v10840_v46, %v10840_v46  ;;  %v4666_v6 = vmul.f32 %v10843_v26, %v10843_v26  ;;  %5581 = vmatpush1.bf16.msra.mxu1 %v9191_v47  ;;  %v9197_v43 = vld [vmem:[%s9680_s26 + $0x208] ss:$20 sps:$4 sm:$0xff]   ;;  %v9200_v49 = vld [vmem:[%s9680_s26 + $0x210] ss:$20 sps:$4 sm:$0xff]  }
 0x7a9   : > { %v4633_v15 = vpop.xlane.xlu1 %4632  ;;  %v4667_v27 = vmul.f32 %v10850_v13, %v10850_v13  ;;  %5687 = vmatpush1.bf16.msra.mxu0 %v9194_v14  ;;  %5582 = vmatprep.subr.bf16.mxu1 %v9199_v56  ;;  %v9205_v50 = vld [vmem:[%s9680_s26 + $0x234] ss:$20 sps:$4 sm:$0xff]  }
 0x7aa   : > { %v4644_v58 = vsub.f32 %v10744_v35, %v4636_v33  ;;  %v4645_v23 = vsub.f32 %v10754_v25, %v4636_v33  ;;  %v4646_v20 = vsub.f32 %v10749_v28, %v4636_v33  ;;  %v4637_v12 = vmul.f32 0.0032051282, %v4633_v15  ;;  %5688 = vmatprep.subr.bf16.mxu0 %v9202_v9  ;;  %v9203_v33 = vld [vmem:[%s9680_s26 + $0x230] ss:$20 sps:$4 sm:$0xff]   ;;  %v9215_v9 = vld [vmem:[%s9680_s26 + $0x280] ss:$20 sps:$4 sm:$0xff]  }
 0x7ab   : > { %v4675_v11 = vadd.f32 %v4674_v24, %v4664_v60  ;;  %v4678_v16 = vadd.f32 %v4666_v6, %v4665_v10  ;;  %v9206_v24 = vld [vmem:[%s9680_s26 + $0x238] ss:$20 sps:$4 sm:$0xff]   ;;  %v9208_v10 = vld [vmem:[%s9680_s26 + $0x23c] ss:$20 sps:$4 sm:$0xff]  }
 0x7ac   : > { %v10864_v36 = vmul.f32 %v4644_v58, %v10686_v22  ;;  %v10867_v32 = vmul.f32 %v4645_v23, %v10691_v44  ;;  %v4647_v61 = vsub.f32 %v10762_v3, %v4637_v12  ;;  %v4648_v35 = vsub.f32 %v10774_v54, %v4637_v12  ;;  %5583 = vmatpush1.bf16.msra.mxu1 %v9197_v43  ;;  %v9211_v6 = vld [vmem:[%s9680_s26 + $0x25c] ss:$20 sps:$4 sm:$0xff]   ;;  %v9214_v15 = vld [vmem:[%s9680_s26 + $0x264] ss:$20 sps:$4 sm:$0xff]   ;;  %v9212_v58 = vld [vmem:[%s9680_s26 + $0x260] ss:$20 sps:$4 sm:$0xff]  }
 0x7ad   : > { %v4649_v25 = vsub.f32 %v10767_v42, %v4637_v12  ;;  %4676 = vadd.xlane.f32.xlu0 %v4675_v11  ;;  %v4679_v28 = vadd.f32 %v4678_v16, %v4667_v27  ;;  %v10873_v51 = vmul.f32 %v4646_v20, %v10695_v5  ;;  %5689 = vmatpush1.bf16.msra.mxu0 %v9200_v49  ;;  %v9209_v60 = vld [vmem:[%s9680_s26 + $0x258] ss:$20 sps:$4 sm:$0xff]   ;;  %v9218_v43 = vld [vmem:[%s9680_s26 + $0x288] ss:$20 sps:$4 sm:$0xff]  }
 0x7ae   : > { %v10876_v39 = vmul.f32 %v4647_v61, %v10686_v22  ;;  %v10879_v41 = vmul.f32 %v4648_v35, %v10691_v44  ;;  %v4668_v3 = vmul.f32 %v10864_v36, %v10864_v36  ;;  %v4669_v42 = vmul.f32 %v10867_v32, %v10867_v32  ;;  %5584 = vmatprep.subr.bf16.mxu1 %v9205_v50  ;;  %v9217_v23 = vld [vmem:[%s9680_s26 + $0x284] ss:$20 sps:$4 sm:$0xff]   ;;  %v9220_v20 = vld [vmem:[%s9680_s26 + $0x28c] ss:$20 sps:$4 sm:$0xff]  }
 0x7af   : > { %4680 = vadd.xlane.f32.xlu1 %v4679_v28  ;;  %v10886_v54 = vmul.f32 %v4649_v25, %v10695_v5  ;;  %v4670_v55 = vmul.f32 %v10873_v51, %v10873_v51  ;;  %5690 = vmatprep.subr.bf16.mxu0 %v9208_v10  ;;  %v9223_v50 = vld [vmem:[%s9680_s26 + $0x2ac] ss:$20 sps:$4 sm:$0xff]  }
 0x7b0   : > { %v4682_v59 = vadd.f32 %v4669_v42, %v4668_v3  ;;  %v4671_v7 = vmul.f32 %v10876_v39, %v10876_v39  ;;  %v4672_v18 = vmul.f32 %v10879_v41, %v10879_v41  ;;  %5585 = vmatpush1.bf16.msra.mxu1 %v9203_v33  ;;  %v9226_v33 = vld [vmem:[%s9680_s26 + $0x2b4] ss:$20 sps:$4 sm:$0xff]  }
 0x7b1   : > { %v4673_v4 = vmul.f32 %v10886_v54, %v10886_v54  ;;  %5691 = vmatpush1.bf16.msra.mxu0 %v9206_v24  ;;  %5586 = vmatprep.subr.bf16.mxu1 %v9211_v6 }
 0x7b2   : > { %v4683_v57 = vadd.f32 %v4682_v59, %v4670_v55  ;;  %v4686_v38 = vadd.f32 %v4672_v18, %v4671_v7  ;;  %5692 = vmatprep.subr.bf16.mxu0 %v9214_v15  ;;  %v10923_v59 = vsub.s32 4, %v10222_v40  ;;  %v10926_v18 = vsub.s32 5, %v10222_v40 }
 0x7b4   : > { %4684 = vadd.xlane.f32.xlu0 %v4683_v57  ;;  %v4687_v0 = vadd.f32 %v4686_v38, %v4673_v4  ;;  %5587 = vmatpush1.bf16.msra.mxu1 %v9209_v60  ;;  %v4721_v57 = vrot.slane %v10679_v30, %v10923_v59  ;;  %v4717_v4 = vrot.slane %v10675_v37, %v10923_v59  ;;  %v9224_v60 = vld [vmem:[%s9680_s26 + $0x2b0] ss:$20 sps:$4 sm:$0xff]  }
 0x7b5   : > { %5693 = vmatpush1.bf16.msra.mxu0 %v9212_v58  ;;  %5609 = vmatprep.subr.bf16.mxu1 %v9217_v23  ;;  %v4745_v53 = vrot.slane %v10679_v30, %v10926_v18  ;;  %v4741_v2 = vrot.slane %v10675_v37, %v10926_v18  ;;  %v9229_v23 = vld [vmem:[%s9680_s26 + $0x2d4] ss:$20 sps:$4 sm:$0xff]  }
 0x7b6   : > { %4688 = vadd.xlane.f32.xlu1 %v4687_v0  ;;  %5715 = vmatprep.subr.bf16.mxu0 %v9220_v20 }
 0x83a   : > { %v4677_v12 = vpop.xlane.xlu0 %4676 }
 0x83b   : > { %v4690_v11 = vmul.f32 0.0032051282, %v4677_v12 }
 0x83c   : > { %v4681_v27 = vpop.xlane.xlu1 %4680 }
 0x83d   : > { %v4694_v16 = vadd.f32 1e-12, %v4690_v11  ;;  %v4691_v61 = vmul.f32 0.0032051282, %v4681_v27  ;;  %v9232_v11 = vld [vmem:[%s9680_s26 + $0x2dc] ss:$20 sps:$4 sm:$0xff]  }
 0x83f   : > { %9511 = vrsqrt.f32 %v4694_v16  ;;  %v4695_v35 = vadd.f32 1e-12, %v4691_v61  ;;  %v9227_v61 = vld [vmem:[%s9680_s26 + $0x2d0] ss:$20 sps:$4 sm:$0xff]  }
 0x841   : > { %9513 = vrsqrt.f32 %v4695_v35  ;;  %v4685_v25 = vpop.xlane.xlu0 %4684  ;;  %v9230_v35 = vld [vmem:[%s9680_s26 + $0x2d8] ss:$20 sps:$4 sm:$0xff]  }
 0x842   : > { %v4692_v28 = vmul.f32 0.0032051282, %v4685_v25  ;;  %v9235_v25 = vld [vmem:[%s9680_s26 + $0x2fc] ss:$20 sps:$4 sm:$0xff]  }
 0x843   : > { %v4689_v3 = vpop.xlane.xlu1 %4688 }
 0x844   : > { %v4696_v42 = vadd.f32 1e-12, %v4692_v28  ;;  %v4693_v55 = vmul.f32 0.0032051282, %v4689_v3  ;;  %v9238_v28 = vld [vmem:[%s9680_s26 + $0x304] ss:$20 sps:$4 sm:$0xff]  }
 0x845   : > { %v9233_v3 = vld [vmem:[%s9680_s26 + $0x2f8] ss:$20 sps:$4 sm:$0xff]  }
 0x846   : > { %9515 = vrsqrt.f32 %v4696_v42  ;;  %v4697_v7 = vadd.f32 1e-12, %v4693_v55  ;;  %v9236_v42 = vld [vmem:[%s9680_s26 + $0x300] ss:$20 sps:$4 sm:$0xff]   ;;  %v9241_v55 = vld [vmem:[%s9680_s26 + $0x324] ss:$20 sps:$4 sm:$0xff]  }
 0x848   : > { %9517 = vrsqrt.f32 %v4697_v7  ;;  %v9244_v7 = vld [vmem:[%s9680_s26 + $0x32c] ss:$20 sps:$4 sm:$0xff]  }
 0x849   : > { %v10932_v38 = vpop.eup %9511 }
 0x84a   : > { %v4703_v0 = vmul.f32 %v10932_v38, %v10831_v63  ;;  %v4702_v19 = vmul.f32 %v10932_v38, %v10828_v62 }
 0x84b   : > { %v10938_v1 = vpop.eup %9513 }
 0x84c   : > { %v4706_v29 = vmul.f32 %v10938_v1, %v10843_v26  ;;  %v4727_v8 = vmul.f32 %v4721_v57, %v4703_v0  ;;  %v4705_v63 = vmul.f32 %v10938_v1, %v10840_v46  ;;  %v4726_v52 = vmul.f32 %v4717_v4, %v4702_v19  ;;  %v9247_v0 = vld [vmem:[%s9680_s26 + $0x34c] ss:$20 sps:$4 sm:$0xff]   ;;  %v9250_v19 = vld [vmem:[%s9680_s26 + $0x354] ss:$20 sps:$4 sm:$0xff]  }
 0x84e   : > { %v4730_v62 = vmul.f32 %v4721_v57, %v4706_v29  ;;  %v4729_v21 = vmul.f32 %v4717_v4, %v4705_v63  ;;  %v10950_v30 = vadd.f32 %v4745_v53, %v4727_v8  ;;  %v10954_v37 = vadd.f32 %v4741_v2, %v4726_v52  ;;  %v9253_v29 = vld [vmem:[%s9680_s26 + $0x374] ss:$20 sps:$4 sm:$0xff]   ;;  %v9256_v8 = vld [vmem:[%s9680_s26 + $0x37c] ss:$20 sps:$4 sm:$0xff]  }
 0x84f   : > { %v4707_v63 = vmul.f32 %v10938_v1, %v10850_v13  ;;  %v4704_v52 = vmul.f32 %v10932_v38, %v10837_v48  ;;  %v4749_v48 = vrot.slane %v10671_v17, %v10926_v18  ;;  %v9260_v38 = vld [vmem:[%s9680_s26 + $0x3a0] ss:$20 sps:$4 sm:$0xff]   ;;  %v9264_v18 = vld [vmem:[%s9680_s26 + $0x10] ss:$20 sps:$4 sm:$0xff]  }
 0x850   : > { %v10948_v31 = vpop.eup %9515  ;;  %v10952_v45 = vadd.f32 %v4745_v53, %v4730_v62  ;;  %v10956_v47 = vadd.f32 %v4741_v2, %v4729_v21  ;;  %v4725_v62 = vrot.slane %v10671_v17, %v10923_v59  ;;  %v9251_v21 = vld [vmem:[%s9680_s26 + $0x370] ss:$20 sps:$4 sm:$0xff]   ;;  %v9257_v59 = vld [vmem:[%s9680_s26 + $0x398] ss:$20 sps:$4 sm:$0xff]  }
 0x851   : > { %v4709_v26 = vmul.f32 %v10948_v31, %v10867_v32  ;;  %v4708_v46 = vmul.f32 %v10948_v31, %v10864_v36  ;;  %v4710_v17 = vmul.f32 %v10948_v31, %v10873_v51  ;;  %v9292_v31 = vld [vmem:[%s9685_s9 + $0x1c] ss:$12 sps:$4 sm:$0xff]  }
 0x852   : > { %v10962_v14 = vpop.eup %9517  ;;  %v10966_v56 = vpack.c.bf16 %v10952_v45, %v10950_v30  ;;  %v10972_v49 = vpack.c.bf16 %v10956_v47, %v10954_v37  ;;  %v4728_v13 = vmul.f32 %v4725_v62, %v4704_v52  ;;  %v9277_v52 = vld [vmem:[%s9680_s26 + $0x268] ss:$20 sps:$4 sm:$0xff]  }
 0x853   : > { %v4712_v32 = vmul.f32 %v10962_v14, %v10879_v41  ;;  %v4733_v36 = vmul.f32 %v4721_v57, %v4709_v26  ;;  %v4711_v24 = vmul.f32 %v10962_v14, %v10876_v39  ;;  %v4732_v10 = vmul.f32 %v4717_v4, %v4708_v46  ;;  %v9221_v41 = vld [vmem:[%s9680_s26 + $0x2a8] ss:$20 sps:$4 sm:$0xff]   ;;  %v9254_v26 = vld [vmem:[%s9680_s26 + $0x378] ss:$20 sps:$4 sm:$0xff]  }
 0x854   : > { %5588 = vmatprep.mubr.bf16.mxu1 %v10966_v56  ;;  %5694 = vmatprep.mubr.bf16.mxu0 %v10966_v56  ;;  %v9259_v46 = vld [vmem:[%s9680_s26 + $0x39c] ss:$20 sps:$4 sm:$0xff]   ;;  %v4734_v51 = vmul.f32 %v4725_v62, %v4710_v17 }
 0x855   : > { %5589 = vmatmul.mubr.bf16.vlgmr.msra.gmra.mrb[64].mxu1 %v10972_v49  ;;  %5695 = vmatmul.mubr.bf16.vlgmr.msra.gmra.mrb[48].mxu0 %v10972_v49  ;;  %v4736_v6 = vmul.f32 %v4721_v57, %v4712_v32  ;;  %v4735_v15 = vmul.f32 %v4717_v4, %v4711_v24  ;;  %v10986_v39 = vadd.f32 %v4745_v53, %v4733_v36  ;;  %v9239_v57 = vld [vmem:[%s9680_s26 + $0x320] ss:$20 sps:$4 sm:$0xff]   ;;  %v9242_v4 = vld [vmem:[%s9680_s26 + $0x328] ss:$20 sps:$4 sm:$0xff]   ;;  %v9289_v32 = vld [vmem:[%s9685_s9 + $0x4] ss:$12 sps:$4 sm:$0xff]  }
 0x856   : > { %5610 = vmatpush1.bf16.msra.mxu1 %v9215_v9  ;;  %5716 = vmatpush1.bf16.msra.mxu0 %v9218_v43  ;;  %v10991_v20 = vadd.f32 %v4741_v2, %v4732_v10  ;;  %v9262_v9 = vld [vmem:[%s9680_s26 + $0x3a4] ss:$20 sps:$4 sm:$0xff]   ;;  %v4731_v43 = vmul.f32 %v4725_v62, %v4707_v63  ;;  %v11046_v36 = vadd.f32 %v4749_v48, %v4728_v13  ;;  %v9276_v63 = vld [vmem:[%s9680_s26 + $0x100] ss:$20 sps:$4 sm:$0xff]   ;;  %v9318_v17 = vld [vmem:[%s9685_s9 + $0xdc] ss:$12 sps:$4 sm:$0xff]  }
 0x857   : > { %5611 = vmatprep.subr.bf16.mxu1 %v9223_v50  ;;  %5717 = vmatprep.subr.bf16.mxu0 %v9226_v33  ;;  %v10988_v58 = vadd.f32 %v4745_v53, %v4736_v6  ;;  %v10993_v12 = vadd.f32 %v4741_v2, %v4735_v15  ;;  %v9245_v53 = vld [vmem:[%s9680_s26 + $0x348] ss:$20 sps:$4 sm:$0xff]   ;;  %v9248_v2 = vld [vmem:[%s9680_s26 + $0x350] ss:$20 sps:$4 sm:$0xff]   ;;  %v4713_v33 = vmul.f32 %v10962_v14, %v10886_v54  ;;  %v9265_v10 = vld [vmem:[%s9680_s26 + $0x178] ss:$20 sps:$4 sm:$0xff]  }
 0x858   : > { %v11040_v1 = vadd.f32 %v4749_v48, %v4731_v43  ;;  %v9263_v50 = vld [vmem:[%s9680_s26 + $0x150] ss:$20 sps:$4 sm:$0xff]   ;;  %v9287_v14 = vld [vmem:[%s9685_s9] ss:$12 sps:$4 sm:$0xff]  }
 0x859   : > { %v10998_v27 = vpack.c.bf16 %v10988_v58, %v10986_v39  ;;  %v11002_v16 = vpack.c.bf16 %v10993_v12, %v10991_v20  ;;  %v4737_v54 = vmul.f32 %v4725_v62, %v4713_v33  ;;  %v9266_v6 = vld [vmem:[%s9680_s26 + $0x38] ss:$20 sps:$4 sm:$0xff]   ;;  %v9305_v62 = vld [vmem:[%s9685_s9 + $0x90] ss:$12 sps:$4 sm:$0xff]   ;;  %v9281_v13 = vld [vmem:[%s9680_s26 + $0x2e0] ss:$20 sps:$4 sm:$0xff]  }
 0x85a   : > { %5612 = vmatpush1.bf16.msra.mxu1 %v9221_v41  ;;  %5718 = vmatpush1.bf16.msra.mxu0 %v9224_v60  ;;  %v11053_v24 = vpack.c.bf16 %v11040_v1, %v11046_v36  ;;  %v9267_v41 = vld [vmem:[%s9680_s26 + $0x1a0] ss:$20 sps:$4 sm:$0xff]   ;;  %v9290_v60 = vld [vmem:[%s9685_s9 + $0x18] ss:$12 sps:$4 sm:$0xff]  }
 0x85b   : > { %5598 = vmatprep.mubr.bf16.mxu1 %v10998_v27  ;;  %5613 = vmatprep.subr.bf16.mxu1 %v9229_v23  ;;  %v11063_v15 = vadd.f32 %v4749_v48, %v4737_v54  ;;  %v11067_v23 = vadd.f32 %v4749_v48, %v4734_v51  ;;  %v9280_v43 = vld [vmem:[%s9680_s26 + $0x2b8] ss:$20 sps:$4 sm:$0xff]   ;;  %v9282_v48 = vld [vmem:[%s9680_s26 + $0x308] ss:$20 sps:$4 sm:$0xff]   ;;  %v9323_v54 = vld [vmem:[%s9685_s9 + $0xf4] ss:$12 sps:$4 sm:$0xff]  }
 0x85c   : > { %5704 = vmatprep.mubr.bf16.mxu0 %v10998_v27  ;;  %5719 = vmatprep.subr.bf16.mxu0 %v9232_v11  ;;  %v9268_v11 = vld [vmem:[%s9680_s26 + $0x60] ss:$20 sps:$4 sm:$0xff]   ;;  %v9321_v51 = vld [vmem:[%s9685_s9 + $0xf0] ss:$12 sps:$4 sm:$0xff]  }
 0x85d   : > { %5599 = vmatmul.mubr.bf16.gmra.mrb[68].mxu1 %v11002_v16  ;;  %5705 = vmatmul.mubr.bf16.gmra.mrb[52].mxu0 %v11002_v16  ;;  %v9311_v33 = vld [vmem:[%s9685_s9 + $0xc0] ss:$12 sps:$4 sm:$0xff]  }
 0x85e   : > { %5614 = vmatpush1.bf16.msra.mxu1 %v9227_v61  ;;  %5720 = vmatpush1.bf16.msra.mxu0 %v9230_v35  ;;  %v11072_v61 = vpack.c.bf16 %v11063_v15, %v11067_v23  ;;  %v9269_v35 = vld [vmem:[%s9680_s26 + $0x1c8] ss:$20 sps:$4 sm:$0xff]  }
 0x85f   : > { %5615 = vmatprep.subr.bf16.mxu1 %v9235_v25  ;;  %5721 = vmatprep.subr.bf16.mxu0 %v9238_v28  ;;  %v9295_v25 = vld [vmem:[%s9685_s9 + $0x34] ss:$12 sps:$4 sm:$0xff]   ;;  %v9293_v28 = vld [vmem:[%s9685_s9 + $0x30] ss:$12 sps:$4 sm:$0xff]  }
 0x860   : > { %5641 = vmatprep.mubr.bf16.mxu1 %v9598_v34  ;;  %5747 = vmatprep.mubr.bf16.mxu0 %v9598_v34 }
 0x862   : > { %5616 = vmatpush1.bf16.msra.mxu1 %v9233_v3  ;;  %5722 = vmatpush1.bf16.msra.mxu0 %v9236_v42  ;;  %v9298_v3 = vld [vmem:[%s9685_s9 + $0x4c] ss:$12 sps:$4 sm:$0xff]   ;;  %v9270_v42 = vld [vmem:[%s9680_s26 + $0x88] ss:$20 sps:$4 sm:$0xff]  }
 0x863   : > { %5617 = vmatprep.subr.bf16.mxu1 %v9241_v55  ;;  %5723 = vmatprep.subr.bf16.mxu0 %v9244_v7  ;;  %v9271_v55 = vld [vmem:[%s9680_s26 + $0x1f0] ss:$20 sps:$4 sm:$0xff]   ;;  %v9296_v7 = vld [vmem:[%s9685_s9 + $0x48] ss:$12 sps:$4 sm:$0xff]  }
 0x866   : > { %5618 = vmatpush1.bf16.msra.mxu1 %v9239_v57  ;;  %5724 = vmatpush1.bf16.msra.mxu0 %v9242_v4  ;;  %v9301_v57 = vld [vmem:[%s9685_s9 + $0x64] ss:$12 sps:$4 sm:$0xff]  }
 0x867   : > { %5619 = vmatprep.subr.bf16.mxu1 %v9247_v0  ;;  %5725 = vmatprep.subr.bf16.mxu0 %v9250_v19  ;;  %v9272_v4 = vld [vmem:[%s9680_s26 + $0xb0] ss:$20 sps:$4 sm:$0xff]   ;;  %v9273_v0 = vld [vmem:[%s9680_s26 + $0x218] ss:$20 sps:$4 sm:$0xff]   ;;  %v9304_v19 = vld [vmem:[%s9685_s9 + $0x7c] ss:$12 sps:$4 sm:$0xff]  }
 0x86a   : > { %5620 = vmatpush1.bf16.msra.mxu1 %v9245_v53  ;;  %5726 = vmatpush1.bf16.msra.mxu0 %v9248_v2  ;;  %v9274_v53 = vld [vmem:[%s9680_s26 + $0xd8] ss:$20 sps:$4 sm:$0xff]   ;;  %v9275_v2 = vld [vmem:[%s9680_s26 + $0x240] ss:$20 sps:$4 sm:$0xff]  }
 0x86b   : > { %5621 = vmatprep.subr.bf16.mxu1 %v9253_v29  ;;  %5727 = vmatprep.subr.bf16.mxu0 %v9256_v8  ;;  %v9302_v29 = vld [vmem:[%s9685_s9 + $0x78] ss:$12 sps:$4 sm:$0xff]   ;;  %v9307_v8 = vld [vmem:[%s9685_s9 + $0x94] ss:$12 sps:$4 sm:$0xff]  }
 0x86e   : > { %5622 = vmatpush1.bf16.msra.mxu1 %v9251_v21  ;;  %5728 = vmatpush1.bf16.msra.mxu0 %v9254_v26  ;;  %v9310_v21 = vld [vmem:[%s9685_s9 + $0xac] ss:$12 sps:$4 sm:$0xff]   ;;  %v9278_v26 = vld [vmem:[%s9680_s26 + $0x128] ss:$20 sps:$4 sm:$0xff]  }
 0x86f   : > { %5623 = vmatprep.subr.bf16.mxu1 %v9259_v46  ;;  %5729 = vmatprep.subr.bf16.mxu0 %v9262_v9  ;;  %v9279_v46 = vld [vmem:[%s9680_s26 + $0x290] ss:$20 sps:$4 sm:$0xff]   ;;  %v9308_v9 = vld [vmem:[%s9685_s9 + $0xa8] ss:$12 sps:$4 sm:$0xff]  }
 0x872   : > { %5624 = vmatpush1.bf16.msra.mxu1 %v9257_v59  ;;  %5730 = vmatpush1.bf16.msra.mxu0 %v9260_v38  ;;  %v9283_v59 = vld [vmem:[%s9680_s26 + $0x330] ss:$20 sps:$4 sm:$0xff]  }
 0x873   : > { %8162 = vmatprep.subr.bf16.mxu1 %v9263_v50  ;;  %6868 = vmatprep.subr.bf16.mxu0 %v9289_v32  ;;  %v9313_v38 = vld [vmem:[%s9685_s9 + $0xc4] ss:$12 sps:$4 sm:$0xff]   ;;  %v9314_v50 = vld [vmem:[%s9685_s9 + $0xc8] ss:$12 sps:$4 sm:$0xff]  }
 0x874   : > { %v9315_v32 = vld [vmem:[%s9685_s9 + $0x8] ss:$12 sps:$4 sm:$0xff]  }
 0x875   : > { %5642 = vmatmul.mubr.bf16.vlgmr.msra.gmra.mrb[64].mxu1 %v11053_v24  ;;  %5748 = vmatmul.mubr.bf16.vlgmr.msra.gmra.mrb[48].mxu0 %v11053_v24 }
 0x876   : > { %8163 = vmatpush3.bf16.msra.mxu1 %v9264_v18  ;;  %5651 = vmatprep.mubr.bf16.mxu1 %v9598_v34  ;;  %v9319_v18 = vld [vmem:[%s9685_s9 + $0xe0] ss:$12 sps:$4 sm:$0xff]  }
 0x877   : > { %8164 = vmatprep.subr.bf16.mxu1 %v9265_v10  ;;  %5757 = vmatprep.mubr.bf16.mxu0 %v9598_v34  ;;  %v9320_v10 = vld [vmem:[%s9685_s9 + $0x20] ss:$12 sps:$4 sm:$0xff]  }
 0x878   : > { %6869 = vmatpush1.bf16.msra.mxu0 %v9287_v14  ;;  %v9324_v14 = vld [vmem:[%s9685_s9 + $0xf8] ss:$12 sps:$4 sm:$0xff]  }
 0x879   : > { %6870 = vmatprep.subr.bf16.mxu0 %v9292_v31  ;;  %v9325_v31 = vld [vmem:[%s9685_s9 + $0x38] ss:$12 sps:$4 sm:$0xff]  }
 0x87a   : > { %8165 = vmatpush3.bf16.msra.mxu1 %v9266_v6  ;;  %v9328_v6 = vld [vmem:[%s9685_s9 + $0x10c] ss:$12 sps:$4 sm:$0xff]  }
 0x87b   : > { %8166 = vmatprep.subr.bf16.mxu1 %v9267_v41  ;;  %v9329_v41 = vld [vmem:[%s9685_s9 + $0x110] ss:$12 sps:$4 sm:$0xff]  }
 0x87c   : > { %6871 = vmatpush1.bf16.msra.mxu0 %v9290_v60  ;;  %v9326_v60 = vld [vmem:[%s9685_s9 + $0x108] ss:$12 sps:$4 sm:$0xff]  }
 0x87d   : > { %5652 = vmatmul.mubr.bf16.gmra.mrb[68].mxu1 %v11072_v61  ;;  %5758 = vmatmul.mubr.bf16.gmra.mrb[52].mxu0 %v11072_v61 }
 0x87e   : > { %8167 = vmatpush3.bf16.msra.mxu1 %v9268_v11  ;;  %5800 = vmatprep.mubr.bf16.mxu1 %v10966_v56  ;;  %v9299_v56 = vld [vmem:[%s9685_s9 + $0x60] ss:$12 sps:$4 sm:$0xff]   ;;  %v9330_v11 = vld [vmem:[%s9685_s9 + $0x50] ss:$12 sps:$4 sm:$0xff]  }
 0x87f   : > { %8168 = vmatprep.subr.bf16.mxu1 %v9269_v35  ;;  %6872 = vmatprep.subr.bf16.mxu0 %v9295_v25  ;;  %v9334_v35 = vld [vmem:[%s9685_s9 + $0x128] ss:$12 sps:$4 sm:$0xff]   ;;  %v9331_v25 = vld [vmem:[%s9685_s9 + $0x120] ss:$12 sps:$4 sm:$0xff]  }
 0x880   : > { %6873 = vmatpush1.bf16.msra.mxu0 %v9293_v28  ;;  %v9335_v28 = vld [vmem:[%s9685_s9 + $0x68] ss:$12 sps:$4 sm:$0xff]  }
 0x881   : > { %6874 = vmatprep.subr.bf16.mxu0 %v9298_v3  ;;  %v9336_v3 = vld [vmem:[%s9685_s9 + $0x138] ss:$12 sps:$4 sm:$0xff]  }
 0x882   : > { %8169 = vmatpush3.bf16.msra.mxu1 %v9270_v42  ;;  %v9338_v42 = vld [vmem:[%s9685_s9 + $0x13c] ss:$12 sps:$4 sm:$0xff]  }
 0x883   : > { %8170 = vmatprep.subr.bf16.mxu1 %v9271_v55  ;;  %v9339_v55 = vld [vmem:[%s9685_s9 + $0x140] ss:$12 sps:$4 sm:$0xff]  }
 0x884   : > { %6875 = vmatpush1.bf16.msra.mxu0 %v9296_v7  ;;  %v9340_v7 = vld [vmem:[%s9685_s9 + $0x80] ss:$12 sps:$4 sm:$0xff]  }
 0x885   : > { %6876 = vmatprep.subr.bf16.mxu0 %v9301_v57  ;;  %v9343_v57 = vld [vmem:[%s9685_s9 + $0x154] ss:$12 sps:$4 sm:$0xff]  }
 0x886   : > { %8171 = vmatpush3.bf16.msra.mxu1 %v9272_v4  ;;  %v9344_v4 = vld [vmem:[%s9685_s9 + $0x158] ss:$12 sps:$4 sm:$0xff]  }
 0x887   : > { %8172 = vmatprep.subr.bf16.mxu1 %v9273_v0  ;;  %v9341_v0 = vld [vmem:[%s9685_s9 + $0x150] ss:$12 sps:$4 sm:$0xff]  }
 0x888   : > { %6877 = vmatpush1.bf16.msra.mxu0 %v9299_v56  ;;  %v9345_v56 = vld [vmem:[%s9685_s9 + $0x98] ss:$12 sps:$4 sm:$0xff]  }
 0x889   : > { %6878 = vmatprep.subr.bf16.mxu0 %v9304_v19  ;;  %v9348_v19 = vld [vmem:[%s9685_s9 + $0x16c] ss:$12 sps:$4 sm:$0xff]  }
 0x88a   : > { %8173 = vmatpush3.bf16.msra.mxu1 %v9274_v53  ;;  %v9349_v53 = vld [vmem:[%s9685_s9 + $0x170] ss:$12 sps:$4 sm:$0xff]  }
 0x88b   : > { %8174 = vmatprep.subr.bf16.mxu1 %v9275_v2  ;;  %v9346_v2 = vld [vmem:[%s9685_s9 + $0x168] ss:$12 sps:$4 sm:$0xff]  }
 0x88c   : > { %6879 = vmatpush1.bf16.msra.mxu0 %v9302_v29  ;;  %v9350_v29 = vld [vmem:[%s9685_s9 + $0xb0] ss:$12 sps:$4 sm:$0xff]  }
 0x88d   : > { %6880 = vmatprep.subr.bf16.mxu0 %v9307_v8  ;;  %v9353_v8 = vld [vmem:[%s9685_s9 + $0x184] ss:$12 sps:$4 sm:$0xff]  }
 0x88e   : > { %8175 = vmatpush3.bf16.msra.mxu1 %v9276_v63  ;;  %v9354_v63 = vld [vmem:[%s9685_s9 + $0x248] ss:$12 sps:$4 sm:$0xff]  }
 0x88f   : > { %8176 = vmatprep.subr.bf16.mxu1 %v9277_v52  ;;  %v11147_v52 = vsub.s32 2, %v10222_v40 }
 0x890   : > { %6881 = vmatpush1.bf16.msra.mxu0 %v9305_v62  ;;  %v11150_v62 = vld [vmem:[%s9690_s12] sm:$0xff] }
 0x891   : > { %6882 = vmatprep.subr.bf16.mxu0 %v9310_v21  ;;  %v11154_v21 = vrot.slane %v11150_v62, %v11147_v52 }
 0x892   : > { %8177 = vmatpush3.bf16.msra.mxu1 %v9278_v26  ;;  %v11157_v26 = vld [vmem:[%s9690_s12 + $0x10] sm:$0xff] }
 0x893   : > { %8330 = vmatprep.subr.bf16.mxu1 %v9279_v46 }
 0x894   : > { %6883 = vmatpush1.bf16.msra.mxu0 %v9308_v9  ;;  %v11164_v9 = vld [vmem:[%s9690_s12 + $0x8] sm:$0xff] }
 0x895   : > { %5801 = vmatmul.mubr.bf16.vlgmr.msra.gmra.mrb[72].mxu1 %v10972_v49  ;;  %v9284_v49 = vld [vmem:[%s9680_s26 + $0x358] ss:$20 sps:$4 sm:$0xff]   ;;  %6884 = vmatprep.subr.bf16.mxu0 %v9313_v38 }
 0x896   : > { %5808 = vmatprep.mubr.bf16.mxu1 %v10998_v27  ;;  %8331 = vmatpush3.bf16.msra.mxu1 %v9279_v46  ;;  %v9285_v27 = vld [vmem:[%s9680_s26 + $0x380] ss:$20 sps:$4 sm:$0xff]   ;;  %v11161_v46 = vrot.slane %v11157_v26, %v11147_v52 }
 0x897   : > { %8332 = vmatprep.subr.bf16.mxu1 %v9280_v43 }
 0x898   : > { %6885 = vmatpush1.bf16.msra.mxu0 %v9311_v33 }
 0x899   : > { %6886 = vmatprep.subr.bf16.mxu0 %v9318_v17 }
 0x89a   : > { %8333 = vmatpush3.bf16.msra.mxu1 %v9280_v43  ;;  %v11168_v43 = vrot.slane %v11164_v9, %v11147_v52 }
 0x89b   : > { %8334 = vmatprep.subr.bf16.mxu1 %v9281_v13 }
 0x89d   : > { %5809 = vmatmul.mubr.bf16.gmra.mrb[76].mxu1 %v11002_v16  ;;  %v9286_v16 = vld [vmem:[%s9680_s26 + $0x3a8] ss:$20 sps:$4 sm:$0xff]  }
 0x89e   : > { %8335 = vmatpush3.bf16.msra.mxu1 %v9281_v13  ;;  %8346 = vmatprep.mubr.bf16.mxu1 %v11053_v24  ;;  %v9316_v24 = vld [vmem:[%s9685_s9 + $0xd8] ss:$12 sps:$4 sm:$0xff]  }
 0x89f   : > { %8336 = vmatprep.subr.bf16.mxu1 %v9282_v48  ;;  %6887 = vmatpush1.bf16.msra.mxu0 %v9316_v24 }
 0x8a0   : > { %6888 = vmatprep.subr.bf16.mxu0 %v9323_v54 }
 0x8a2   : > { %8337 = vmatpush3.bf16.msra.mxu1 %v9282_v48 }
 0x8a3   : > { %8338 = vmatprep.subr.bf16.mxu1 %v9283_v59  ;;  %6889 = vmatpush1.bf16.msra.mxu0 %v9321_v51 }
 0x8a4   : > { %6890 = vmatprep.subr.bf16.mxu0 %v9328_v6 }
 0x8a6   : > { %8339 = vmatpush3.bf16.msra.mxu1 %v9283_v59 }
 0x8a7   : > { %8340 = vmatprep.subr.bf16.mxu1 %v9284_v49  ;;  %6891 = vmatpush1.bf16.msra.mxu0 %v9326_v60 }
 0x8aa   : > { %8341 = vmatpush3.bf16.msra.mxu1 %v9284_v49 }
 0x8ab   : > { %8342 = vmatprep.subr.bf16.mxu1 %v9285_v27 }
 0x8ae   : > { %8343 = vmatpush3.bf16.msra.mxu1 %v9285_v27 }
 0x8af   : > { %8344 = vmatprep.subr.bf16.mxu1 %v9286_v16 }
 0x8b2   : > { %8345 = vmatpush3.bf16.msra.mxu1 %v9286_v16 }
 0x8b3   : > { %8200 = vmatprep.subr.bf16.mxu1 %v9314_v50 }
 0x8b5   : > { %8347 = vmatmul.mubr.bf16.vlgmr.msra.gmra.mrb[80].mxu1 %v11072_v61  ;;  %v9333_v61 = vld [vmem:[%s9685_s9 + $0x124] ss:$12 sps:$4 sm:$0xff]  }
 0x8b6   : > { %8201 = vmatpush3.bf16.msra.mxu1 %v9315_v32  ;;  %6892 = vmatprep.subr.bf16.mxu0 %v9333_v61 }
 0x8b7   : > { %8202 = vmatprep.subr.bf16.mxu1 %v9319_v18  ;;  %6893 = vmatpush1.bf16.msra.mxu0 %v9331_v25  ;;  %v9585_v18 = vld [vmem:[%s9690_s12 + $0x18] sm:$0xff] }
 0x8b8   : > { %6894 = vmatprep.subr.bf16.mxu0 %v9338_v42  ;;  %v11177_v24 = vrot.slane %v9585_v18, %v11147_v52 }
 0x8ba   : > { %8203 = vmatpush3.bf16.msra.mxu1 %v9320_v10 }
 0x8bb   : > { %8204 = vmatprep.subr.bf16.mxu1 %v9324_v14  ;;  %6895 = vmatpush1.bf16.msra.mxu0 %v9336_v3 }
 0x8bc   : > { %6896 = vmatprep.subr.bf16.mxu0 %v9343_v57 }
 0x8be   : > { %8205 = vmatpush3.bf16.msra.mxu1 %v9325_v31 }
 0x8bf   : > { %8206 = vmatprep.subr.bf16.mxu1 %v9329_v41  ;;  %6897 = vmatpush1.bf16.msra.mxu0 %v9341_v0 }
 0x8c0   : > { %6898 = vmatprep.subr.bf16.mxu0 %v9348_v19 }
 0x8c2   : > { %8207 = vmatpush3.bf16.msra.mxu1 %v9330_v11 }
 0x8c3   : > { %8208 = vmatprep.subr.bf16.mxu1 %v9334_v35  ;;  %6899 = vmatpush1.bf16.msra.mxu0 %v9346_v2 }
 0x8c4   : > { %6921 = vmatprep.subr.bf16.mxu0 %v9353_v8 }
 0x8c6   : > { %8209 = vmatpush3.bf16.msra.mxu1 %v9335_v28 }
 0x8c7   : > { %8210 = vmatprep.subr.bf16.mxu1 %v9339_v55 }
 0x8ca   : > { %8211 = vmatpush3.bf16.msra.mxu1 %v9340_v7 }
 0x8cb   : > { %8212 = vmatprep.subr.bf16.mxu1 %v9344_v4 }
 0x8ce   : > { %8213 = vmatpush3.bf16.msra.mxu1 %v9345_v56 }
 0x8cf   : > { %8214 = vmatprep.subr.bf16.mxu1 %v9349_v53 }
 0x8d2   : > { %8215 = vmatpush3.bf16.msra.mxu1 %v9350_v29 }
 0x8d3   : > { %8228 = vmatprep.subr.bf16.mxu1 %v9354_v63 }
 0x948   : > { %v5643_v13 = vpop.f32.mrb[64].mxu1  ;;  %v5749_v48 = vpop.f32.mrb[48].mxu0 }
 0x949   : > { %v8434_v59 = vadd.f32 %v5643_v13, %v11154_v21  ;;  %v8442_v49 = vadd.f32 %v5749_v48, %v11161_v46  ;;  %v5645_v27 = vpop.f32.mrb[65].mxu1  ;;  %v5751_v16 = vpop.f32.mrb[49].mxu0 }
 0x94a   : > { %v11173_v38 = vadd.f32 %v5645_v27, %v11168_v43  ;;  %v5647_v50 = vpop.f32.mrb[66].mxu1  ;;  %v5753_v33 = vpop.f32.mrb[50].mxu0  ;;  %v11188_v25 = vadd.f32 %v5751_v16, %v11177_v24 }
 0x94b   : > { %v5886_v32 = vmul.f32 0.044715, %v8434_v59  ;;  %v5888_v17 = vmul.f32 0.044715, %v8442_v49  ;;  %v8436_v10 = vadd.f32 %v5647_v50, %v11154_v21  ;;  %v11181_v54 = vadd.f32 %v5753_v33, %v11161_v46  ;;  %v5649_v14 = vpop.f32.mrb[67].mxu1  ;;  %v5755_v51 = vpop.f32.mrb[51].mxu0 }
 0x94c   : > { %v5887_v41 = vmul.f32 0.044715, %v11173_v38  ;;  %v11185_v60 = vadd.f32 %v5649_v14, %v11168_v43  ;;  %v11191_v3 = vmul.f32 0.5, %v8434_v59  ;;  %v11193_v42 = vmul.f32 0.5, %v8442_v49 }
 0x94d   : > { %v5906_v31 = vmul.f32 %v8434_v59, %v5886_v32  ;;  %v5908_v6 = vmul.f32 %v8442_v49, %v5888_v17  ;;  %v5891_v11 = vmul.f32 0.044715, %v8436_v10  ;;  %v5893_v28 = vmul.f32 0.044715, %v11181_v54 }
 0x94e   : > { %v5892_v7 = vmul.f32 0.044715, %v11185_v60  ;;  %v5907_v19 = vmul.f32 %v11173_v38, %v5887_v41  ;;  %v11200_v13 = vadd.f32 %v5755_v51, %v11177_v24  ;;  %v5889_v17 = vmul.f32 0.044715, %v11188_v25 }
 0x94f   : > { %v5926_v61 = vmul.f32 %v8434_v59, %v5906_v31  ;;  %v5928_v35 = vmul.f32 %v8442_v49, %v5908_v6  ;;  %v5911_v55 = vmul.f32 %v8436_v10, %v5891_v11  ;;  %v5913_v53 = vmul.f32 %v11181_v54, %v5893_v28 }
 0x950   : > { %v5653_v57 = vpop.f32.mrb[68].mxu1  ;;  %v5759_v4 = vpop.f32.mrb[52].mxu0  ;;  %v5912_v63 = vmul.f32 %v11185_v60, %v5892_v7  ;;  %v5927_v51 = vmul.f32 %v11173_v38, %v5907_v19 }
 0x951   : > { %v5946_v0 = vadd.f32 %v8434_v59, %v5926_v61  ;;  %v5948_v56 = vadd.f32 %v8442_v49, %v5928_v35  ;;  %v5655_v2 = vpop.f32.mrb[69].mxu1  ;;  %v5761_v29 = vpop.f32.mrb[53].mxu0  ;;  %v5931_v8 = vmul.f32 %v8436_v10, %v5911_v55  ;;  %v11203_v48 = vadd.f32 %v5653_v57, %v11154_v21 }
 0x952   : > { %v5657_v27 = vpop.f32.mrb[70].mxu1  ;;  %v5763_v16 = vpop.f32.mrb[54].mxu0  ;;  %v5933_v49 = vmul.f32 %v11181_v54, %v5913_v53  ;;  %v11209_v31 = vadd.f32 %v5759_v4, %v11161_v46  ;;  %v11214_v41 = vadd.f32 %v5655_v2, %v11168_v43  ;;  %v5932_v61 = vmul.f32 %v11185_v60, %v5912_v63 }
 0x953   : > { %v5966_v50 = vmul.f32 0.7978846, %v5946_v0  ;;  %v5968_v59 = vmul.f32 0.7978846, %v5948_v56  ;;  %v5659_v33 = vpop.f32.mrb[71].mxu1  ;;  %v5765_v32 = vpop.f32.mrb[55].mxu0  ;;  %v5951_v18 = vadd.f32 %v8436_v10, %v5931_v8  ;;  %v11220_v7 = vadd.f32 %v5761_v29, %v11177_v24 }
 0x954   : > { %v5896_v14 = vmul.f32 0.044715, %v11203_v48  ;;  %v5953_v6 = vadd.f32 %v11181_v54, %v5933_v49  ;;  %v5894_v35 = vmul.f32 0.044715, %v11200_v13  ;;  %v5897_v55 = vmul.f32 0.044715, %v11214_v41 }
 0x955   : > { %9519 = vtanh.f32 %v5966_v50  ;;  %v5971_v11 = vmul.f32 0.7978846, %v5951_v18  ;;  %v11223_v57 = vadd.f32 %v5657_v27, %v11154_v21  ;;  %v5898_v0 = vmul.f32 0.044715, %v11209_v31 }
 0x956   : > { %9521 = vtanh.f32 %v5968_v59  ;;  %v5973_v28 = vmul.f32 0.7978846, %v5953_v6  ;;  %v5916_v4 = vmul.f32 %v11203_v48, %v5896_v14  ;;  %v11228_v56 = vadd.f32 %v5763_v16, %v11161_v46 }
 0x957   : > { %9523 = vtanh.f32 %v5971_v11  ;;  %v5917_v19 = vmul.f32 %v11214_v41, %v5897_v55  ;;  %v5899_v53 = vmul.f32 0.044715, %v11220_v7  ;;  %v5901_v2 = vmul.f32 0.044715, %v11223_v57 }
 0x958   : > { %9525 = vtanh.f32 %v5973_v28  ;;  %v5909_v29 = vmul.f32 %v11188_v25, %v5889_v17  ;;  %v5871_v8 = vmul.f32 0.5, %v8436_v10  ;;  %v11235_v21 = vadd.f32 %v5659_v33, %v11168_v43 }
 0x959   : > { %v11238_v63 = vadd.f32 %v5765_v32, %v11177_v24  ;;  %v5873_v27 = vmul.f32 0.5, %v11181_v54  ;;  %v5914_v46 = vmul.f32 %v11200_v13, %v5894_v35  ;;  %v5937_v16 = vmul.f32 %v11214_v41, %v5917_v19 }
 0x95a   : > { %v5921_v50 = vmul.f32 %v11223_v57, %v5901_v2  ;;  %v5918_v59 = vmul.f32 %v11209_v31, %v5898_v0  ;;  %v5902_v49 = vmul.f32 0.044715, %v11235_v21  ;;  %v5947_v43 = vadd.f32 %v11173_v38, %v5927_v51 }
 0x95b   : > { %v5904_v10 = vmul.f32 0.044715, %v11238_v63  ;;  %v5936_v33 = vmul.f32 %v11203_v48, %v5916_v4  ;;  %v5919_v24 = vmul.f32 %v11220_v7, %v5899_v53  ;;  %v5903_v54 = vmul.f32 0.044715, %v11228_v56 }
 0x95c   : > { %v5952_v32 = vadd.f32 %v11185_v60, %v5932_v61  ;;  %v5941_v17 = vmul.f32 %v11223_v57, %v5921_v50  ;;  %v5922_v18 = vmul.f32 %v11235_v21, %v5902_v49  ;;  %v5967_v6 = vmul.f32 0.7978846, %v5947_v43 }
 0x95d   : > { %v5924_v14 = vmul.f32 %v11238_v63, %v5904_v10  ;;  %v5929_v35 = vmul.f32 %v11188_v25, %v5909_v29  ;;  %v5934_v51 = vmul.f32 %v11200_v13, %v5914_v46  ;;  %v5957_v55 = vadd.f32 %v11214_v41, %v5937_v16 }
 0x95e   : > { %v5972_v28 = vmul.f32 0.7978846, %v5952_v32  ;;  %v5938_v0 = vmul.f32 %v11209_v31, %v5918_v59  ;;  %v5942_v61 = vmul.f32 %v11235_v21, %v5922_v18  ;;  %9527 = vtanh.f32 %v5967_v6 }
 0x95f   : > { %v9520_v11 = vpop.eup %9519  ;;  %v5923_v53 = vmul.f32 %v11228_v56, %v5903_v54  ;;  %v5977_v2 = vmul.f32 0.7978846, %v5957_v55  ;;  %v5956_v50 = vadd.f32 %v11203_v48, %v5936_v33  ;;  %v5939_v29 = vmul.f32 %v11220_v7, %v5919_v24 }
 0x960   : > { %v9522_v4 = vpop.eup %9521  ;;  %v6006_v19 = vadd.f32 1.0, %v9520_v11  ;;  %9529 = vtanh.f32 %v5972_v28  ;;  %v5944_v46 = vmul.f32 %v11238_v63, %v5924_v14  ;;  %v5962_v16 = vadd.f32 %v11235_v21, %v5942_v61 }
 0x961   : > { %v9524_v49 = vpop.eup %9523  ;;  %v5961_v10 = vadd.f32 %v11223_v57, %v5941_v17  ;;  %9531 = vtanh.f32 %v5977_v2  ;;  %v5976_v18 = vmul.f32 0.7978846, %v5956_v50  ;;  %v5949_v11 = vadd.f32 %v11188_v25, %v5929_v35 }
 0x962   : > { %v9526_v59 = vpop.eup %9525  ;;  %v6011_v43 = vadd.f32 1.0, %v9524_v49  ;;  %v6026_v32 = vmul.f32 %v6006_v19, %v11191_v3  ;;  %v5982_v54 = vmul.f32 0.7978846, %v5962_v16  ;;  %v5954_v33 = vadd.f32 %v11200_v13, %v5934_v51 }
 0x963   : > { %v5981_v6 = vmul.f32 0.7978846, %v5961_v10  ;;  %9533 = vtanh.f32 %v5976_v18  ;;  %v6008_v24 = vadd.f32 1.0, %v9522_v4  ;;  %v6013_v14 = vadd.f32 1.0, %v9526_v59 }
 0x964   : > { %v6031_v28 = vmul.f32 %v6011_v43, %v5871_v8  ;;  %v5943_v55 = vmul.f32 %v11228_v56, %v5923_v53  ;;  %9535 = vtanh.f32 %v5982_v54  ;;  %v5969_v17 = vmul.f32 0.7978846, %v5949_v11 }
 0x965   : > { %v5974_v61 = vmul.f32 0.7978846, %v5954_v33  ;;  %9537 = vtanh.f32 %v5981_v6  ;;  %v6028_v3 = vmul.f32 %v6008_v24, %v11193_v42  ;;  %v6033_v19 = vmul.f32 %v6013_v14, %v5873_v27  ;;  %v9351_v14 = vld [vmem:[%s9685_s9 + $0x180] ss:$12 sps:$4 sm:$0xff]  }
 0x966   : > { %v6046_v49 = vpack.c.bf16 %v6031_v28, %v6026_v32  ;;  %9539 = vtanh.f32 %v5969_v17  ;;  %v5959_v35 = vadd.f32 %v11220_v7, %v5939_v29  ;;  %v5964_v51 = vadd.f32 %v11238_v63, %v5944_v46  ;;  %v9355_v17 = vld [vmem:[%s9685_s9 + $0x188] ss:$12 sps:$4 sm:$0xff]  }
 0x967   : > { %9541 = vtanh.f32 %v5974_v61  ;;  %v11273_v4 = vpack.c.bf16 %v6033_v19, %v6028_v3  ;;  %v5958_v43 = vadd.f32 %v11209_v31, %v5938_v0  ;;  %v5867_v27 = vmul.f32 0.5, %v11173_v38  ;;  %v9359_v19 = vld [vmem:[%s9685_s9 + $0x260] ss:$12 sps:$4 sm:$0xff]  }
 0x968   : > { %v8178_v2 = vpop.f32.mrb[72].mxu1  ;;  %v9528_v50 = vpop.eup %9527  ;;  %v5979_v10 = vmul.f32 0.7978846, %v5959_v35  ;;  %v5984_v59 = vmul.f32 0.7978846, %v5964_v51  ;;  %v5963_v46 = vadd.f32 %v11228_v56, %v5943_v55  ;;  %v5872_v18 = vmul.f32 0.5, %v11185_v60 }
 0x969   : > { %v8179_v8 = vpop.f32.mrb[73].mxu1  ;;  %v6007_v29 = vadd.f32 1.0, %v9528_v50  ;;  %v5978_v0 = vmul.f32 0.7978846, %v5958_v43  ;;  %v9358_v60 = vld [vmem:[%s9685_s9 + $0x19c] ss:$12 sps:$4 sm:$0xff]  }
 0x96a   : > { %v11275_v53 = vadd.f32 %v8179_v8, %v8178_v2  ;;  %v8181_v16 = vpop.f32.mrb[74].mxu1  ;;  %v9530_v42 = vpop.eup %9529  ;;  %9543 = vtanh.f32 %v5979_v10  ;;  %v5983_v33 = vmul.f32 0.7978846, %v5963_v46  ;;  %v5877_v50 = vmul.f32 0.5, %v11214_v41 }
 0x96b   : > { %v8182_v32 = vpop.f32.mrb[75].mxu1  ;;  %v6012_v54 = vadd.f32 1.0, %v9530_v42  ;;  %v9532_v11 = vpop.eup %9531  ;;  %9545 = vtanh.f32 %v5984_v59  ;;  %v6027_v28 = vmul.f32 %v6007_v29, %v5867_v27  ;;  %v5876_v59 = vmul.f32 0.5, %v11203_v48 }
 0x96c   : > { %v11281_v6 = vadd.f32 %v8182_v32, %v8181_v16  ;;  %v6017_v61 = vadd.f32 1.0, %v9532_v11  ;;  %9547 = vtanh.f32 %v5978_v0  ;;  %v5882_v16 = vmul.f32 0.5, %v11235_v21  ;;  %v9356_v0 = vld [vmem:[%s9685_s9 + $0x198] ss:$12 sps:$4 sm:$0xff]  }
 0x96d   : > { %v6032_v24 = vmul.f32 %v6012_v54, %v5872_v18  ;;  %v9534_v38 = vpop.eup %9533  ;;  %9549 = vtanh.f32 %v5983_v33  ;;  %v5881_v29 = vmul.f32 0.5, %v11223_v57  ;;  %v5869_v46 = vmul.f32 0.5, %v11188_v25  ;;  %v9360_v33 = vld [vmem:[%s9685_s9 + $0x1a0] ss:$12 sps:$4 sm:$0xff]  }
 0x96e   : > { %v9536_v55 = vpop.eup %9535  ;;  %v6016_v35 = vadd.f32 1.0, %v9534_v38  ;;  %v6037_v41 = vmul.f32 %v6017_v61, %v5877_v50  ;;  %v5874_v54 = vmul.f32 0.5, %v11200_v13  ;;  %v9363_v38 = vld [vmem:[%s9685_s9 + $0x1b4] ss:$12 sps:$4 sm:$0xff]   ;;  %v9364_v61 = vld [vmem:[%s9685_s9 + $0x278] ss:$12 sps:$4 sm:$0xff]  }
 0x96f   : > { %v6047_v3 = vpack.c.bf16 %v6032_v24, %v6027_v28  ;;  %v9538_v51 = vpop.eup %9537  ;;  %v6022_v10 = vadd.f32 1.0, %v9536_v55 }
 0x970   : > { %v8184_v2 = vpop.f32.mrb[76].mxu1  ;;  %v9540_v43 = vpop.eup %9539  ;;  %v6021_v32 = vadd.f32 1.0, %v9538_v51  ;;  %v6036_v57 = vmul.f32 %v6016_v35, %v5876_v59  ;;  %v9365_v51 = vld [vmem:[%s9685_s9 + $0x1b8] ss:$12 sps:$4 sm:$0xff]  }
 0x971   : > { %v8185_v8 = vpop.f32.mrb[77].mxu1  ;;  %6900 = vmatprep.mubr.bf16.mxu0 %v6047_v3  ;;  %7059 = vmatprep.mubr.bf16.mxu1 %v6047_v3  ;;  %v9542_v18 = vpop.eup %9541  ;;  %v6042_v21 = vmul.f32 %v6022_v10, %v5882_v16  ;;  %v6009_v11 = vadd.f32 1.0, %v9540_v43  ;;  %v9368_v59 = vld [vmem:[%s9685_s9 + $0x1cc] ss:$12 sps:$4 sm:$0xff]   ;;  %v9369_v43 = vld [vmem:[%s9685_s9 + $0x290] ss:$12 sps:$4 sm:$0xff]  }
 0x972   : > { %v11290_v42 = vadd.f32 %v8185_v8, %v8184_v2  ;;  %v8187_v27 = vpop.f32.mrb[78].mxu1  ;;  %6901 = vmatmul.mubr.bf16.vlgmr.msra.gmra.mrb[56].mxu0 %v6046_v49  ;;  %7060 = vmatmul.mubr.bf16.vlgmr.msra.gmra.mrb[84].mxu1 %v6046_v49  ;;  %v6041_v28 = vmul.f32 %v6021_v32, %v5881_v29  ;;  %v6014_v25 = vadd.f32 1.0, %v9542_v18  ;;  %v5884_v8 = vmul.f32 0.5, %v11238_v63  ;;  %v9366_v18 = vld [vmem:[%s9685_s9 + $0x1c8] ss:$12 sps:$4 sm:$0xff]  }
 0x973   : > { %v8188_v48 = vpop.f32.mrb[79].mxu1  ;;  %6922 = vmatpush1.bf16.msra.mxu0 %v9351_v14  ;;  %8229 = vmatpush3.bf16.msra.mxu1 %v9355_v17  ;;  %v6052_v49 = vpack.c.bf16 %v6042_v21, %v6037_v41  ;;  %v6029_v13 = vmul.f32 %v6009_v11, %v5869_v46  ;;  %v9361_v17 = vld [vmem:[%s9685_s9 + $0x1b0] ss:$12 sps:$4 sm:$0xff]   ;;  %v5883_v63 = vmul.f32 0.5, %v11228_v56 }
 0x974   : > { %v11297_v24 = vadd.f32 %v8188_v48, %v8187_v27  ;;  %6923 = vmatprep.subr.bf16.mxu0 %v9358_v60  ;;  %8230 = vmatprep.subr.bf16.mxu1 %v9359_v19  ;;  %v9544_v55 = vpop.eup %9543  ;;  %v6051_v3 = vpack.c.bf16 %v6041_v28, %v6036_v57  ;;  %v6034_v2 = vmul.f32 %v6014_v25, %v5874_v54  ;;  %v5879_v19 = vmul.f32 0.5, %v11220_v7  ;;  %v9370_v41 = vld [vmem:[%s9685_s9 + $0x1d0] ss:$12 sps:$4 sm:$0xff]   ;;  %v9374_v54 = vld [vmem:[%s9685_s9 + $0x2a8] ss:$12 sps:$4 sm:$0xff]  }
 0x975   : > { %v9546_v14 = vpop.eup %9545  ;;  %6910 = vmatprep.mubr.bf16.mxu0 %v6052_v49  ;;  %7067 = vmatprep.mubr.bf16.mxu1 %v6052_v49  ;;  %v6019_v35 = vadd.f32 1.0, %v9544_v55  ;;  %v5878_v7 = vmul.f32 0.5, %v11209_v31  ;;  %v9373_v48 = vld [vmem:[%s9685_s9 + $0x1e4] ss:$12 sps:$4 sm:$0xff]   ;;  %v9378_v57 = vld [vmem:[%s9685_s9 + $0x1fc] ss:$12 sps:$4 sm:$0xff]  }
 0x976   : > { %v6049_v60 = vpack.c.bf16 %v6034_v2, %v6029_v13  ;;  %v6024_v50 = vadd.f32 1.0, %v9546_v14  ;;  %v9548_v16 = vpop.eup %9547  ;;  %v9379_v28 = vld [vmem:[%s9685_s9 + $0x2c0] ss:$12 sps:$4 sm:$0xff]   ;;  %v9376_v25 = vld [vmem:[%s9685_s9 + $0x1f8] ss:$12 sps:$4 sm:$0xff]  }
 0x977   : > { %6924 = vmatpush1.bf16.msra.mxu0 %v9356_v0  ;;  %8231 = vmatpush3.bf16.msra.mxu1 %v9360_v33  ;;  %v9550_v10 = vpop.eup %9549  ;;  %v6039_v27 = vmul.f32 %v6019_v35, %v5879_v19  ;;  %v6018_v32 = vadd.f32 1.0, %v9548_v16  ;;  %v9371_v0 = vld [vmem:[%s9685_s9 + $0x1e0] ss:$12 sps:$4 sm:$0xff]   ;;  %v9375_v33 = vld [vmem:[%s9685_s9 + $0x1e8] ss:$12 sps:$4 sm:$0xff]  }
 0x978   : > { %6925 = vmatprep.subr.bf16.mxu0 %v9363_v38  ;;  %8232 = vmatprep.subr.bf16.mxu1 %v9364_v61  ;;  %v6044_v29 = vmul.f32 %v6024_v50, %v5884_v8  ;;  %v6023_v46 = vadd.f32 1.0, %v9550_v10  ;;  %v9380_v49 = vld [vmem:[%s9685_s9 + $0x200] ss:$12 sps:$4 sm:$0xff]   ;;  %v9381_v2 = vld [vmem:[%s9685_s9 + $0x210] ss:$12 sps:$4 sm:$0xff]  }
 0x979   : > { %v6038_v11 = vmul.f32 %v6018_v32, %v5878_v7  ;;  %v9586_v38 = vld [vmem:[%s9690_s12 + $0x20] sm:$0xff] }
 0x97a   : > { %6911 = vmatmul.mubr.bf16.gmra.mrb[60].mxu0 %v6051_v3  ;;  %7068 = vmatmul.mubr.bf16.gmra.mrb[88].mxu1 %v6051_v3  ;;  %v11311_v21 = vpack.c.bf16 %v6044_v29, %v6039_v27  ;;  %v6043_v31 = vmul.f32 %v6023_v46, %v5883_v63  ;;  %v4931_v61 = vrot.slane %v9586_v38, %v11147_v52  ;;  %v9383_v55 = vld [vmem:[%s9685_s9 + $0x214] ss:$12 sps:$4 sm:$0xff]   ;;  %v9384_v3 = vld [vmem:[%s9685_s9 + $0x2d8] ss:$12 sps:$4 sm:$0xff]   ;;  %v9390_v27 = vld [vmem:[%s9685_s9 + $0x230] ss:$12 sps:$4 sm:$0xff]  }
 0x97b   : > { %6926 = vmatpush1.bf16.msra.mxu0 %v9361_v17  ;;  %8233 = vmatpush3.bf16.msra.mxu1 %v9365_v51  ;;  %v9385_v14 = vld [vmem:[%s9685_s9 + $0x218] ss:$12 sps:$4 sm:$0xff]   ;;  %v9394_v63 = vld [vmem:[%s9685_s9 + $0x308] ss:$12 sps:$4 sm:$0xff]  }
 0x97c   : > { %6953 = vmatprep.mubr.bf16.mxu0 %v6049_v60  ;;  %7108 = vmatprep.mubr.bf16.mxu1 %v6049_v60  ;;  %v11315_v56 = vpack.c.bf16 %v6043_v31, %v6038_v11  ;;  %v5811_v13 = vadd.f32 %v11290_v42, %v4931_v61  ;;  %v5803_v35 = vadd.f32 %v11275_v53, %v4931_v61  ;;  %v9388_v51 = vld [vmem:[%s9685_s9 + $0x22c] ss:$12 sps:$4 sm:$0xff]   ;;  %v9389_v60 = vld [vmem:[%s9685_s9 + $0x2f0] ss:$12 sps:$4 sm:$0xff]  }
 0x97d   : > { %6927 = vmatprep.subr.bf16.mxu0 %v9368_v59  ;;  %8234 = vmatprep.subr.bf16.mxu1 %v9369_v43  ;;  %v5814_v8 = vadd.f32 %v11297_v24, %v4931_v61  ;;  %v5806_v16 = vadd.f32 %v11281_v6, %v4931_v61  ;;  %v9386_v43 = vld [vmem:[%s9685_s9 + $0x228] ss:$12 sps:$4 sm:$0xff]   ;;  %v9393_v7 = vld [vmem:[%s9685_s9 + $0x244] ss:$12 sps:$4 sm:$0xff]   ;;  %v9391_v11 = vld [vmem:[%s9685_s9 + $0x240] ss:$12 sps:$4 sm:$0xff]  }
 0x97f   : > { %6928 = vmatpush1.bf16.msra.mxu0 %v9366_v18  ;;  %8235 = vmatpush3.bf16.msra.mxu1 %v9370_v41 }
 0x980   : > { %6929 = vmatprep.subr.bf16.mxu0 %v9373_v48  ;;  %8236 = vmatprep.subr.bf16.mxu1 %v9374_v54 }
 0x983   : > { %6930 = vmatpush1.bf16.msra.mxu0 %v9371_v0  ;;  %8237 = vmatpush3.bf16.msra.mxu1 %v9375_v33 }
 0x984   : > { %6931 = vmatprep.subr.bf16.mxu0 %v9378_v57  ;;  %8238 = vmatprep.subr.bf16.mxu1 %v9379_v28  ;;  %v9397_v57 = vld [vmem:[%s9685_s9 + $0x25c] ss:$12 sps:$4 sm:$0xff]  }
 0x987   : > { %6932 = vmatpush1.bf16.msra.mxu0 %v9376_v25  ;;  %8239 = vmatpush3.bf16.msra.mxu1 %v9380_v49  ;;  %v9398_v25 = vld [vmem:[%s9685_s9 + $0x320] ss:$12 sps:$4 sm:$0xff]  }
 0x988   : > { %v8348_v17 = vpop.f32.mrb[80].mxu1  ;;  %6933 = vmatprep.subr.bf16.mxu0 %v9383_v55  ;;  %8240 = vmatprep.subr.bf16.mxu1 %v9384_v3  ;;  %v9395_v55 = vld [vmem:[%s9685_s9 + $0x258] ss:$12 sps:$4 sm:$0xff]  }
 0x989   : > { %v11333_v52 = vadd.f32 %v8348_v17, %v5811_v13  ;;  %v5851_v19 = vpop.f32.mrb[81].mxu1  ;;  %v9402_v17 = vld [vmem:[%s9685_s9 + $0x338] ss:$12 sps:$4 sm:$0xff]  }
 0x98a   : > { %v11336_v42 = vadd.f32 %v5851_v19, %v5803_v35  ;;  %v8349_v50 = vpop.f32.mrb[82].mxu1  ;;  %v9406_v19 = vld [vmem:[%s9685_s9 + $0x350] ss:$12 sps:$4 sm:$0xff]  }
 0x98b   : > { %v5900_v53 = vmul.f32 0.044715, %v11333_v52  ;;  %v11340_v10 = vadd.f32 %v8349_v50, %v5814_v8  ;;  %v5854_v59 = vpop.f32.mrb[83].mxu1  ;;  %6934 = vmatpush1.bf16.msra.mxu0 %v9381_v2  ;;  %8241 = vmatpush3.bf16.msra.mxu1 %v9385_v14  ;;  %v9401_v14 = vld [vmem:[%s9685_s9 + $0x274] ss:$12 sps:$4 sm:$0xff]  }
 0x98c   : > { %v5890_v29 = vmul.f32 0.044715, %v11336_v42  ;;  %v11345_v24 = vadd.f32 %v5854_v59, %v5806_v16  ;;  %6935 = vmatprep.subr.bf16.mxu0 %v9388_v51  ;;  %8242 = vmatprep.subr.bf16.mxu1 %v9389_v60  ;;  %v9399_v51 = vld [vmem:[%s9685_s9 + $0x270] ss:$12 sps:$4 sm:$0xff]   ;;  %v9405_v60 = vld [vmem:[%s9685_s9 + $0x28c] ss:$12 sps:$4 sm:$0xff]  }
 0x98d   : > { %v5920_v32 = vmul.f32 %v5900_v53, %v11333_v52  ;;  %v5905_v6 = vmul.f32 0.044715, %v11340_v10  ;;  %v9403_v8 = vld [vmem:[%s9685_s9 + $0x288] ss:$12 sps:$4 sm:$0xff]   ;;  %v9409_v50 = vld [vmem:[%s9685_s9 + $0x2a4] ss:$12 sps:$4 sm:$0xff]  }
 0x98e   : > { %v5910_v46 = vmul.f32 %v5890_v29, %v11336_v42  ;;  %v5895_v18 = vmul.f32 0.044715, %v11345_v24  ;;  %v9410_v16 = vld [vmem:[%s9685_s9 + $0x368] ss:$12 sps:$4 sm:$0xff]  }
 0x98f   : > { %v5940_v41 = vmul.f32 %v5920_v32, %v11333_v52  ;;  %v5925_v48 = vmul.f32 %v5905_v6, %v11340_v10  ;;  %6936 = vmatpush1.bf16.msra.mxu0 %v9386_v43  ;;  %8243 = vmatpush3.bf16.msra.mxu1 %v9390_v27  ;;  %v9407_v43 = vld [vmem:[%s9685_s9 + $0x2a0] ss:$12 sps:$4 sm:$0xff]   ;;  %v9413_v32 = vld [vmem:[%s9685_s9 + $0x2bc] ss:$12 sps:$4 sm:$0xff]  }
 0x990   : > { %v5930_v54 = vmul.f32 %v5910_v46, %v11336_v42  ;;  %v5915_v31 = vmul.f32 %v5895_v18, %v11345_v24  ;;  %6937 = vmatprep.subr.bf16.mxu0 %v9393_v7  ;;  %8350 = vmatprep.subr.bf16.mxu1 %v9394_v63  ;;  %v5885_v46 = vmul.f32 0.5, %v11340_v10  ;;  %v9414_v18 = vld [vmem:[%s9685_s9 + $0x380] ss:$12 sps:$4 sm:$0xff]  }
 0x991   : > { %v5960_v0 = vadd.f32 %v5940_v41, %v11333_v52  ;;  %v5945_v33 = vmul.f32 %v5925_v48, %v11340_v10  ;;  %v5870_v48 = vmul.f32 0.5, %v11336_v42 }
 0x992   : > { %v5935_v28 = vmul.f32 %v5915_v31, %v11345_v24  ;;  %v5950_v49 = vadd.f32 %v5930_v54, %v11336_v42  ;;  %7109 = vmatmul.mubr.bf16.vlgmr.msra.gmra.mrb[92].mxu1 %v11273_v4  ;;  %v5875_v54 = vmul.f32 0.5, %v11345_v24  ;;  %v9411_v31 = vld [vmem:[%s9685_s9 + $0x2b8] ss:$12 sps:$4 sm:$0xff]  }
 0x993   : > { %v5980_v38 = vmul.f32 0.7978846, %v5960_v0  ;;  %v5965_v61 = vadd.f32 %v5945_v33, %v11340_v10  ;;  %6938 = vmatpush1.bf16.msra.mxu0 %v9391_v11  ;;  %7116 = vmatprep.mubr.bf16.mxu1 %v11311_v21 }
 0x994   : > { %v5955_v3 = vadd.f32 %v5935_v28, %v11345_v24  ;;  %v5970_v13 = vmul.f32 0.7978846, %v5950_v49  ;;  %8351 = vmatpush3.bf16.msra.mxu1 %v9394_v63  ;;  %6939 = vmatprep.subr.bf16.mxu0 %v9397_v57  ;;  %v5880_v63 = vmul.f32 0.5, %v11333_v52  ;;  %v9417_v52 = vld [vmem:[%s9685_s9 + $0x2d4] ss:$12 sps:$4 sm:$0xff]  }
 0x995   : > { %9551 = vtanh.f32 %v5980_v38  ;;  %v5985_v2 = vmul.f32 0.7978846, %v5965_v61  ;;  %8352 = vmatprep.subr.bf16.mxu1 %v9398_v25  ;;  %v9418_v28 = vld [vmem:[%s9685_s9 + $0x398] ss:$12 sps:$4 sm:$0xff]   ;;  %v9415_v24 = vld [vmem:[%s9685_s9 + $0x2d0] ss:$12 sps:$4 sm:$0xff]  }
 0x996   : > { %v5975_v35 = vmul.f32 0.7978846, %v5955_v3  ;;  %9553 = vtanh.f32 %v5970_v13  ;;  %v9421_v49 = vld [vmem:[%s9685_s9 + $0x2ec] ss:$12 sps:$4 sm:$0xff]   ;;  %v9422_v38 = vld [vmem:[%s9685_s9 + $0x3b0] ss:$12 sps:$4 sm:$0xff]  }
 0x997   : > { %9555 = vtanh.f32 %v5985_v2  ;;  %6940 = vmatpush1.bf16.msra.mxu0 %v9395_v55  ;;  %v9419_v61 = vld [vmem:[%s9685_s9 + $0x2e8] ss:$12 sps:$4 sm:$0xff]   ;;  %v9425_v55 = vld [vmem:[%s9685_s9 + $0x304] ss:$12 sps:$4 sm:$0xff]   ;;  %v9423_v3 = vld [vmem:[%s9685_s9 + $0x300] ss:$12 sps:$4 sm:$0xff]  }
 0x998   : > { %9557 = vtanh.f32 %v5975_v35  ;;  %8353 = vmatpush3.bf16.msra.mxu1 %v9398_v25  ;;  %6941 = vmatprep.subr.bf16.mxu0 %v9401_v14  ;;  %v9428_v13 = vld [vmem:[%s9685_s9 + $0x31c] ss:$12 sps:$4 sm:$0xff]   ;;  %v9426_v2 = vld [vmem:[%s9685_s9 + $0x318] ss:$12 sps:$4 sm:$0xff]   ;;  %v9431_v14 = vld [vmem:[%s9685_s9 + $0x334] ss:$12 sps:$4 sm:$0xff]  }
 0x999   : > { %8354 = vmatprep.subr.bf16.mxu1 %v9402_v17  ;;  %v9434_v35 = vld [vmem:[%s9685_s9 + $0x34c] ss:$12 sps:$4 sm:$0xff]  }
 0x99a   : > { %7117 = vmatmul.mubr.bf16.gmra.mrb[96].mxu1 %v11315_v56 }
 0x99b   : > { %6942 = vmatpush1.bf16.msra.mxu0 %v9399_v51  ;;  %v9435_v51 = vld [vmem:[%s9685_s9 + $0x360] ss:$12 sps:$4 sm:$0xff]  }
 0x99c   : > { %8355 = vmatpush3.bf16.msra.mxu1 %v9402_v17  ;;  %6943 = vmatprep.subr.bf16.mxu0 %v9405_v60  ;;  %v9429_v17 = vld [vmem:[%s9685_s9 + $0x330] ss:$12 sps:$4 sm:$0xff]  }
 0x99d   : > { %8356 = vmatprep.subr.bf16.mxu1 %v9406_v19  ;;  %v9440_v60 = vld [vmem:[%s9685_s9 + $0x37c] ss:$12 sps:$4 sm:$0xff]  }
 0x99f   : > { %v9552_v53 = vpop.eup %9551  ;;  %6944 = vmatpush1.bf16.msra.mxu0 %v9403_v8  ;;  %v9443_v8 = vld [vmem:[%s9685_s9 + $0x394] ss:$12 sps:$4 sm:$0xff]  }
 0x9a0   : > { %v9554_v59 = vpop.eup %9553  ;;  %v6020_v27 = vadd.f32 1.0, %v9552_v53  ;;  %8357 = vmatpush3.bf16.msra.mxu1 %v9406_v19  ;;  %6945 = vmatprep.subr.bf16.mxu0 %v9409_v50  ;;  %v9438_v19 = vld [vmem:[%s9685_s9 + $0x378] ss:$12 sps:$4 sm:$0xff]   ;;  %v9441_v50 = vld [vmem:[%s9685_s9 + $0x390] ss:$12 sps:$4 sm:$0xff]  }
 0x9a1   : > { %v9556_v29 = vpop.eup %9555  ;;  %v6010_v7 = vadd.f32 1.0, %v9554_v59  ;;  %8358 = vmatprep.subr.bf16.mxu1 %v9410_v16 }
 0x9a2   : > { %v9558_v6 = vpop.eup %9557  ;;  %v6025_v41 = vadd.f32 1.0, %v9556_v29  ;;  %v6040_v0 = vmul.f32 %v6020_v27, %v5880_v63 }
 0x9a3   : > { %v6015_v11 = vadd.f32 1.0, %v9558_v6  ;;  %6946 = vmatpush1.bf16.msra.mxu0 %v9407_v43  ;;  %v6030_v10 = vmul.f32 %v6010_v7, %v5870_v48  ;;  %v6218_v48 = vsub.s32 3, %v10222_v40 }
 0x9a4   : > { %v6045_v33 = vmul.f32 %v6025_v41, %v5885_v46  ;;  %8359 = vmatpush3.bf16.msra.mxu1 %v9410_v16  ;;  %6947 = vmatprep.subr.bf16.mxu0 %v9413_v32  ;;  %v9444_v16 = vld [vmem:[%s9685_s9 + $0x3a8] ss:$12 sps:$4 sm:$0xff]  }
 0x9a5   : > { %v6035_v57 = vmul.f32 %v6015_v11, %v5875_v54  ;;  %8360 = vmatprep.subr.bf16.mxu1 %v9414_v18  ;;  %v6227_v54 = vrot.slane %v11157_v26, %v6218_v48 }
 0x9a6   : > { %v6055_v42 = vpack.c.bf16 %v6045_v33, %v6040_v0 }
 0x9a7   : > { %v6050_v25 = vpack.c.bf16 %v6035_v57, %v6030_v10  ;;  %6948 = vmatpush1.bf16.msra.mxu0 %v9411_v31 }
 0x9a8   : > { %8361 = vmatpush3.bf16.msra.mxu1 %v9414_v18  ;;  %6949 = vmatprep.subr.bf16.mxu0 %v9417_v52 }
 0x9a9   : > { %8362 = vmatprep.subr.bf16.mxu1 %v9418_v28  ;;  %8366 = vmatprep.mubr.bf16.mxu1 %v6050_v25 }
 0x9ab   : > { %6950 = vmatpush1.bf16.msra.mxu0 %v9415_v24 }
 0x9ac   : > { %8363 = vmatpush3.bf16.msra.mxu1 %v9418_v28  ;;  %6951 = vmatprep.subr.bf16.mxu0 %v9421_v49 }
 0x9ad   : > { %8364 = vmatprep.subr.bf16.mxu1 %v9422_v38 }
 0x9af   : > { %6952 = vmatpush1.bf16.msra.mxu0 %v9419_v61 }
 0x9b0   : > { %8365 = vmatpush3.bf16.msra.mxu1 %v9422_v38  ;;  %6974 = vmatprep.subr.bf16.mxu0 %v9425_v55 }
 0x9b2   : > { %6954 = vmatmul.mubr.bf16.vlgmr.msra.gmra.mrb[56].mxu0 %v11273_v4  ;;  %v9432_v4 = vld [vmem:[%s9685_s9 + $0x348] ss:$12 sps:$4 sm:$0xff]  }
 0x9b3   : > { %6963 = vmatprep.mubr.bf16.mxu0 %v11311_v21  ;;  %6975 = vmatpush1.bf16.msra.mxu0 %v9423_v3  ;;  %v9437_v21 = vld [vmem:[%s9685_s9 + $0x364] ss:$12 sps:$4 sm:$0xff]  }
 0x9b4   : > { %8367 = vmatmul.mubr.bf16.vlgmr.msra.gmra.mrb[100].mxu1 %v6055_v42  ;;  %6976 = vmatprep.subr.bf16.mxu0 %v9428_v13 }
 0x9b7   : > { %6977 = vmatpush1.bf16.msra.mxu0 %v9426_v2 }
 0x9b8   : > { %6978 = vmatprep.subr.bf16.mxu0 %v9431_v14 }
 0x9ba   : > { %6964 = vmatmul.mubr.bf16.gmra.mrb[60].mxu0 %v11315_v56  ;;  %v9446_v56 = vld [vmem:[%s9685_s9 + $0x3ac] ss:$12 sps:$4 sm:$0xff]  }
 0x9bb   : > { %6979 = vmatpush1.bf16.msra.mxu0 %v9429_v17  ;;  %7006 = vmatprep.mubr.bf16.mxu0 %v9598_v34 }
 0x9bc   : > { %6980 = vmatprep.subr.bf16.mxu0 %v9434_v35 }
 0x9bf   : > { %6981 = vmatpush1.bf16.msra.mxu0 %v9432_v4 }
 0x9c0   : > { %6982 = vmatprep.subr.bf16.mxu0 %v9437_v21 }
 0x9c3   : > { %6983 = vmatpush1.bf16.msra.mxu0 %v9435_v51 }
 0x9c4   : > { %6984 = vmatprep.subr.bf16.mxu0 %v9440_v60 }
 0x9c7   : > { %6985 = vmatpush1.bf16.msra.mxu0 %v9438_v19 }
 0x9c8   : > { %6986 = vmatprep.subr.bf16.mxu0 %v9443_v8  ;;  %v6219_v8 = vrot.slane %v11150_v62, %v6218_v48 }
 0x9cb   : > { %6987 = vmatpush1.bf16.msra.mxu0 %v9441_v50  ;;  %v6223_v50 = vrot.slane %v11164_v9, %v6218_v48 }
 0x9cc   : > { %6988 = vmatprep.subr.bf16.mxu0 %v9446_v56 }
 0x9cf   : > { %6989 = vmatpush1.bf16.msra.mxu0 %v9444_v16 }
 0x9d2   : > { %7007 = vmatmul.mubr.bf16.vlgmr.msra.gmra.mrb[56].mxu0 %v6050_v25 }
 0x9d3   : > { %7016 = vmatprep.mubr.bf16.mxu0 %v9598_v34 }
 0x9da   : > { %7017 = vmatmul.mubr.bf16.gmra.mrb[60].mxu0 %v6055_v42 }
 0xa45   : > { %v8216_v53 = vpop.f32.mrb[84].mxu1 }
 0xa46   : > { %v8217_v59 = vpop.f32.mrb[85].mxu1 }
 0xa47   : > { %v8218_v43 = vadd.f32 %v8217_v59, %v8216_v53  ;;  %v8219_v27 = vpop.f32.mrb[86].mxu1 }
 0xa48   : > { %v8220_v29 = vpop.f32.mrb[87].mxu1 }
 0xa49   : > { %v8221_v32 = vadd.f32 %v8220_v29, %v8219_v27  ;;  %v7062_v34 = vadd.f32 %v8218_v43, %v6227_v54 }
 0xa4b   : > { %v7065_v10 = vadd.f32 %v8221_v32, %v6227_v54 }
 0xa4d   : > { %v8222_v7 = vpop.f32.mrb[88].mxu1 }
 0xa4e   : > { %v8223_v6 = vpop.f32.mrb[89].mxu1 }
 0xa4f   : > { %v8224_v63 = vadd.f32 %v8223_v6, %v8222_v7  ;;  %v8225_v46 = vpop.f32.mrb[90].mxu1 }
 0xa50   : > { %v8226_v18 = vpop.f32.mrb[91].mxu1 }
 0xa51   : > { %v8227_v41 = vadd.f32 %v8226_v18, %v8225_v46  ;;  %v7070_v49 = vadd.f32 %v8224_v63, %v6227_v54 }
 0xa53   : > { %v7073_v3 = vadd.f32 %v8227_v41, %v6227_v54 }
 0xa65   : > { %v8244_v11 = vpop.f32.mrb[92].mxu1 }
 0xa66   : > { %v8245_v31 = vpop.f32.mrb[93].mxu1 }
 0xa67   : > { %v8246_v0 = vadd.f32 %v8245_v31, %v8244_v11  ;;  %v8247_v33 = vpop.f32.mrb[94].mxu1 }
 0xa68   : > { %v8248_v52 = vpop.f32.mrb[95].mxu1 }
 0xa69   : > { %v8249_v57 = vadd.f32 %v8248_v52, %v8247_v33  ;;  %v7111_v28 = vadd.f32 %v8246_v0, %v7062_v34 }
 0xa6b   : > { %v7114_v42 = vadd.f32 %v8249_v57, %v7065_v10 }
 0xa6d   : > { %v8250_v25 = vpop.f32.mrb[96].mxu1 }
 0xa6e   : > { %v8251_v24 = vpop.f32.mrb[97].mxu1 }
 0xa6f   : > { %v8252_v38 = vadd.f32 %v8251_v24, %v8250_v25  ;;  %v8253_v61 = vpop.f32.mrb[98].mxu1 }
 0xa70   : > { %v8254_v55 = vpop.f32.mrb[99].mxu1 }
 0xa71   : > { %v8255_v13 = vadd.f32 %v8254_v55, %v8253_v61  ;;  %v7119_v2 = vadd.f32 %v8252_v38, %v7070_v49 }
 0xa73   : > { %v7122_v26 = vadd.f32 %v8255_v13, %v7073_v3 }
 0xa87   : > { %v8368_v14 = vpop.f32.mrb[100].mxu1 }
 0xa88   : > { %v7168_v17 = vadd.f32 %v8368_v14, %v7119_v2  ;;  %v7159_v35 = vpop.f32.mrb[101].mxu1 }
 0xa89   : > { %v7160_v4 = vadd.f32 %v7159_v35, %v7111_v28  ;;  %v8369_v21 = vpop.f32.mrb[102].mxu1 }
 0xa8a   : > { %v7171_v51 = vadd.f32 %v8369_v21, %v7122_v26  ;;  %v7162_v60 = vpop.f32.mrb[103].mxu1  ;;  %v7182_v57 = vadd.f32 %v7168_v17, %v11067_v23 }
 0xa8b   : > { %v7163_v19 = vadd.f32 %v7162_v60, %v7114_v42  ;;  %v7176_v7 = vadd.f32 %v7160_v4, %v11046_v36 }
 0xa8c   : > { %v7185_v38 = vadd.f32 %v7171_v51, %v11063_v15 }
 0xa8d   : > { %v7179_v9 = vadd.f32 %v7163_v19, %v11040_v1  ;;  %v7188_v36 = vmul.f32 %v7176_v7, %v10695_v5 }
 0xa8e   : > { %v7197_v2 = vmul.f32 %v7185_v38, %v10695_v5 }
 0xaa5   : > { %v7008_v56 = vpop.f32.mrb[56].mxu0 }
 0xaa6   : > { %v8450_v16 = vadd.f32 %v7008_v56, %v6219_v8  ;;  %v7010_v53 = vpop.f32.mrb[57].mxu0 }
 0xaa7   : > { %v8451_v59 = vadd.f32 %v7010_v53, %v6223_v50  ;;  %v7012_v43 = vpop.f32.mrb[58].mxu0 }
 0xaa8   : > { %v7174_v27 = vadd.f32 %v8450_v16, %v10954_v37  ;;  %v8452_v29 = vadd.f32 %v7012_v43, %v6219_v8  ;;  %v7014_v32 = vpop.f32.mrb[59].mxu0 }
 0xaa9   : > { %v7175_v6 = vadd.f32 %v8451_v59, %v10950_v30  ;;  %v8453_v63 = vadd.f32 %v7014_v32, %v6223_v50 }
 0xaaa   : > { %v7186_v46 = vmul.f32 %v7174_v27, %v10686_v22  ;;  %v7177_v62 = vadd.f32 %v8452_v29, %v10956_v47  ;;  %v7191_v47 = vmul.f32 %v7179_v9, %v10695_v5 }
 0xaab   : > { %v7187_v18 = vmul.f32 %v7175_v6, %v10691_v44  ;;  %v7178_v41 = vadd.f32 %v8453_v63, %v10952_v45 }
 0xaac   : > { %v7189_v48 = vmul.f32 %v7177_v62, %v10686_v22 }
 0xaad   : > { %v7190_v37 = vmul.f32 %v7178_v41, %v10691_v44  ;;  %v7018_v54 = vpop.f32.mrb[60].mxu0  ;;  %v7198_v11 = vadd.f32 %v7187_v18, %v7186_v46 }
 0xaae   : > { %v8454_v30 = vadd.f32 %v7018_v54, %v6219_v8  ;;  %v7020_v31 = vpop.f32.mrb[61].mxu0 }
 0xaaf   : > { %v8455_v34 = vadd.f32 %v7020_v31, %v6223_v50  ;;  %v7022_v0 = vpop.f32.mrb[62].mxu0  ;;  %v7199_v33 = vadd.f32 %v7198_v11, %v7188_v36  ;;  %v7202_v1 = vadd.f32 %v7190_v37, %v7189_v48 }
 0xab0   : > { %v7180_v52 = vadd.f32 %v8454_v30, %v10991_v20  ;;  %v8456_v10 = vadd.f32 %v7022_v0, %v6219_v8  ;;  %v7024_v45 = vpop.f32.mrb[63].mxu0 }
 0xab1   : > { %v7181_v28 = vadd.f32 %v8455_v34, %v10986_v39  ;;  %v8457_v42 = vadd.f32 %v7024_v45, %v6223_v50  ;;  %7200 = vadd.xlane.f32.xlu0 %v7199_v33  ;;  %v7203_v25 = vadd.f32 %v7202_v1, %v7191_v47  ;;  %v7194_v39 = vmul.f32 %v7182_v57, %v10695_v5 }
 0xab2   : > { %v7192_v24 = vmul.f32 %v7180_v52, %v10686_v22  ;;  %v7183_v49 = vadd.f32 %v8456_v10, %v10993_v12 }
 0xab3   : > { %v7193_v61 = vmul.f32 %v7181_v28, %v10691_v44  ;;  %v7184_v55 = vadd.f32 %v8457_v42, %v10988_v58  ;;  %7204 = vadd.xlane.f32.xlu1 %v7203_v25 }
 0xab4   : > { %v7195_v20 = vmul.f32 %v7183_v49, %v10686_v22 }
 0xab5   : > { %v7196_v23 = vmul.f32 %v7184_v55, %v10691_v44  ;;  %v7206_v3 = vadd.f32 %v7193_v61, %v7192_v24 }
 0xab7   : > { %v7207_v13 = vadd.f32 %v7206_v3, %v7194_v39  ;;  %v7210_v26 = vadd.f32 %v7196_v23, %v7195_v20 }
 0xab9   : > { %7208 = vadd.xlane.f32.xlu0 %v7207_v13  ;;  %v7211_v12 = vadd.f32 %v7210_v26, %v7197_v2  ;;  %v7296_v26 = vsub.s32 6, %v10222_v40 }
 0xabb   : > { %7212 = vadd.xlane.f32.xlu1 %v7211_v12 }
 0xb3e   : > { %v7201_v15 = vpop.xlane.xlu0 %7200 }
 0xb3f   : > { %v7214_v14 = vmul.f32 0.0032051282, %v7201_v15 }
 0xb40   : > { %v7205_v17 = vpop.xlane.xlu1 %7204 }
 0xb41   : > { %v7218_v35 = vsub.f32 %v7174_v27, %v7214_v14  ;;  %v7219_v58 = vsub.f32 %v7175_v6, %v7214_v14  ;;  %v7220_v4 = vsub.f32 %v7176_v7, %v7214_v14  ;;  %v7215_v21 = vmul.f32 0.0032051282, %v7205_v17 }
 0xb42   : > { %v7320_v14 = vsub.s32 7, %v10222_v40 }
 0xb43   : > { %v11442_v51 = vmul.f32 %v7218_v35, %v10686_v22  ;;  %v11445_v60 = vmul.f32 %v7219_v58, %v10691_v44  ;;  %v7221_v19 = vsub.f32 %v7177_v62, %v7215_v21  ;;  %v7222_v8 = vsub.f32 %v7178_v41, %v7215_v21  ;;  %v9587_v35 = vld [vmem:[%s9690_s12] sm:$0xff] }
 0xb44   : > { %v7223_v50 = vsub.f32 %v7179_v9, %v7215_v21  ;;  %v11448_v56 = vmul.f32 %v7220_v4, %v10695_v5  ;;  %v7297_v58 = vrot.slane %v9587_v35, %v7296_v26  ;;  %v9588_v4 = vld [vmem:[%s9690_s12 + $0x8] sm:$0xff] }
 0xb45   : > { %v11451_v16 = vmul.f32 %v7221_v19, %v10686_v22  ;;  %v11454_v53 = vmul.f32 %v7222_v8, %v10691_v44  ;;  %v7242_v59 = vmul.f32 %v11442_v51, %v11442_v51  ;;  %v7243_v43 = vmul.f32 %v11445_v60, %v11445_v60  ;;  %v9589_v19 = vld [vmem:[%s9690_s12 + $0x10] sm:$0xff] }
 0xb46   : > { %v7209_v27 = vpop.xlane.xlu0 %7208  ;;  %v11461_v29 = vmul.f32 %v7223_v50, %v10695_v5  ;;  %v7244_v62 = vmul.f32 %v11448_v56, %v11448_v56  ;;  %v7301_v21 = vrot.slane %v9588_v4, %v7296_v26  ;;  %v7305_v8 = vrot.slane %v9589_v19, %v7296_v26 }
 0xb47   : > { %v7216_v32 = vmul.f32 0.0032051282, %v7209_v27  ;;  %v7254_v7 = vadd.f32 %v7243_v43, %v7242_v59  ;;  %v7245_v6 = vmul.f32 %v11451_v16, %v11451_v16  ;;  %v7246_v63 = vmul.f32 %v11454_v53, %v11454_v53 }
 0xb48   : > { %v7213_v46 = vpop.xlane.xlu1 %7212  ;;  %v7247_v54 = vmul.f32 %v11461_v29, %v11461_v29  ;;  %v7321_v59 = vrot.slane %v9587_v35, %v7320_v14  ;;  %v7325_v43 = vrot.slane %v9588_v4, %v7320_v14  ;;  %v7329_v27 = vrot.slane %v9589_v19, %v7320_v14 }
 0xb49   : > { %v7224_v9 = vsub.f32 %v7180_v52, %v7216_v32  ;;  %v7225_v18 = vsub.f32 %v7181_v28, %v7216_v32  ;;  %v7226_v41 = vsub.f32 %v7182_v57, %v7216_v32  ;;  %v7217_v48 = vmul.f32 0.0032051282, %v7213_v46 }
 0xb4a   : > { %v7255_v37 = vadd.f32 %v7254_v7, %v7244_v62  ;;  %v7258_v36 = vadd.f32 %v7246_v63, %v7245_v6 }
 0xb4b   : > { %v11472_v11 = vmul.f32 %v7224_v9, %v10686_v22  ;;  %v11475_v30 = vmul.f32 %v7225_v18, %v10691_v44  ;;  %v7227_v31 = vsub.f32 %v7183_v49, %v7217_v48  ;;  %v7228_v34 = vsub.f32 %v7184_v55, %v7217_v48 }
 0xb4c   : > { %v7229_v0 = vsub.f32 %v7185_v38, %v7217_v48  ;;  %7256 = vadd.xlane.f32.xlu0 %v7255_v37  ;;  %v7259_v33 = vadd.f32 %v7258_v36, %v7247_v54  ;;  %v11478_v47 = vmul.f32 %v7226_v41, %v10695_v5 }
 0xb4d   : > { %v11481_v1 = vmul.f32 %v7227_v31, %v10686_v22  ;;  %v11484_v52 = vmul.f32 %v7228_v34, %v10691_v44  ;;  %v7248_v10 = vmul.f32 %v11472_v11, %v11472_v11  ;;  %v7249_v45 = vmul.f32 %v11475_v30, %v11475_v30 }
 0xb4e   : > { %7260 = vadd.xlane.f32.xlu1 %v7259_v33  ;;  %v11491_v57 = vmul.f32 %v7229_v0, %v10695_v5  ;;  %v7250_v28 = vmul.f32 %v11478_v47, %v11478_v47 }
 0xb4f   : > { %v7262_v42 = vadd.f32 %v7249_v45, %v7248_v10  ;;  %v7251_v22 = vmul.f32 %v11481_v1, %v11481_v1  ;;  %v7252_v44 = vmul.f32 %v11484_v52, %v11484_v52 }
 0xb50   : > { %v7253_v24 = vmul.f32 %v11491_v57, %v11491_v57 }
 0xb51   : > { %v7263_v25 = vadd.f32 %v7262_v42, %v7250_v28  ;;  %v7266_v49 = vadd.f32 %v7252_v44, %v7251_v22 }
 0xb53   : > { %7264 = vadd.xlane.f32.xlu0 %v7263_v25  ;;  %v7267_v38 = vadd.f32 %v7266_v49, %v7253_v24 }
 0xb55   : > { %7268 = vadd.xlane.f32.xlu1 %v7267_v38 }
 0xbd9   : > { %v7257_v5 = vpop.xlane.xlu0 %7256 }
 0xbda   : > { %v7270_v61 = vmul.f32 0.0032051282, %v7257_v5 }
 0xbdb   : > { %v7261_v55 = vpop.xlane.xlu1 %7260 }
 0xbdc   : > { %v7274_v20 = vadd.f32 1e-12, %v7270_v61  ;;  %v7271_v23 = vmul.f32 0.0032051282, %v7261_v55 }
 0xbde   : > { %9559 = vrsqrt.f32 %v7274_v20  ;;  %v7275_v39 = vadd.f32 1e-12, %v7271_v23 }
 0xbe0   : > { %9561 = vrsqrt.f32 %v7275_v39  ;;  %v7265_v3 = vpop.xlane.xlu0 %7264 }
 0xbe1   : > { %v7272_v13 = vmul.f32 0.0032051282, %v7265_v3 }
 0xbe2   : > { %v7269_v2 = vpop.xlane.xlu1 %7268 }
 0xbe3   : > { %v7276_v12 = vadd.f32 1e-12, %v7272_v13  ;;  %v7273_v15 = vmul.f32 0.0032051282, %v7269_v2 }
 0xbe5   : > { %9563 = vrsqrt.f32 %v7276_v12  ;;  %v7277_v17 = vadd.f32 1e-12, %v7273_v15 }
 0xbe7   : > { %9565 = vrsqrt.f32 %v7277_v17 }
 0xbe8   : > { %v9560_v50 = vpop.eup %9559 }
 0xbe9   : > { %v7282_v32 = vmul.f32 %v9560_v50, %v11442_v51  ;;  %v7283_v7 = vmul.f32 %v9560_v50, %v11445_v60  ;;  %v7284_v6 = vmul.f32 %v9560_v50, %v11448_v56 }
 0xbea   : > { %v9562_v40 = vpop.eup %9561 }
 0xbeb   : > { %v7306_v63 = vmul.f32 %v7297_v58, %v7282_v32  ;;  %v7307_v46 = vmul.f32 %v7301_v21, %v7283_v7  ;;  %v7308_v62 = vmul.f32 %v7305_v8, %v7284_v6  ;;  %v7285_v9 = vmul.f32 %v9562_v40, %v11451_v16 }
 0xbec   : > { %v7286_v18 = vmul.f32 %v9562_v40, %v11454_v53  ;;  %v7287_v41 = vmul.f32 %v9562_v40, %v11461_v29 }
 0xbed   : > { %v7330_v48 = vadd.f32 %v7321_v59, %v7306_v63  ;;  %v7331_v37 = vadd.f32 %v7325_v43, %v7307_v46  ;;  %v7332_v54 = vadd.f32 %v7329_v27, %v7308_v62  ;;  %v7309_v36 = vmul.f32 %v7297_v58, %v7285_v9 }
 0xbee   : > { %v7310_v31 = vmul.f32 %v7301_v21, %v7286_v18  ;;  %v7311_v51 = vmul.f32 %v7305_v8, %v7287_v41 }
 0xbef   : > { %v9564_v34 = vpop.eup %9563  ;;  %7342 = vst [vmem:[%s11565_s8] sm:$0xff] %v7330_v48  ;;  %7343 = vst [vmem:[%s11565_s8 + $0x8] sm:$0xff] %v7331_v37  ;;  %v7333_v60 = vadd.f32 %v7321_v59, %v7309_v36 }
 0xbf0   : > { %7344 = vst [vmem:[%s11565_s8 + $0x10] sm:$0xff] %v7332_v54  ;;  %v7334_v56 = vadd.f32 %v7325_v43, %v7310_v31  ;;  %v7335_v16 = vadd.f32 %v7329_v27, %v7311_v51  ;;  %v7288_v53 = vmul.f32 %v9564_v34, %v11472_v11  ;;  %v7289_v29 = vmul.f32 %v9564_v34, %v11475_v30 }
 0xbf1   : > { %v9566_v0 = vpop.eup %9565  ;;  %7345 = vst [vmem:[%s11565_s8 + $0x18] sm:$0xff] %v7333_v60  ;;  %v7290_v33 = vmul.f32 %v9564_v34, %v11478_v47 }
 0xbf2   : > { %7346 = vst [vmem:[%s11565_s8 + $0x20] sm:$0xff] %v7334_v56  ;;  %7347 = vst [vmem:[%s11565_s8 + $0x28] sm:$0xff] %v7335_v16  ;;  %v7312_v10 = vmul.f32 %v7297_v58, %v7288_v53  ;;  %v7313_v45 = vmul.f32 %v7301_v21, %v7289_v29  ;;  %v7291_v11 = vmul.f32 %v9566_v0, %v11481_v1 }
 0xbf3   : > { %v7292_v30 = vmul.f32 %v9566_v0, %v11484_v52  ;;  %v7314_v28 = vmul.f32 %v7305_v8, %v7290_v33  ;;  %v7293_v42 = vmul.f32 %v9566_v0, %v11491_v57 }
 0xbf4   : > { %v7336_v22 = vadd.f32 %v7321_v59, %v7312_v10  ;;  %v7337_v44 = vadd.f32 %v7325_v43, %v7313_v45  ;;  %v7315_v47 = vmul.f32 %v7297_v58, %v7291_v11 }
 0xbf5   : > { %v7316_v25 = vmul.f32 %v7301_v21, %v7292_v30  ;;  %v7338_v24 = vadd.f32 %v7329_v27, %v7314_v28  ;;  %v7317_v49 = vmul.f32 %v7305_v8, %v7293_v42 }
 0xbf6   : > { %7348 = vst [vmem:[%s11565_s8 + $0x30] sm:$0xff] %v7336_v22  ;;  %7349 = vst [vmem:[%s11565_s8 + $0x38] sm:$0xff] %v7337_v44  ;;  %v7339_v1 = vadd.f32 %v7321_v59, %v7315_v47 }
 0xbf7   : > { %v7340_v38 = vadd.f32 %v7325_v43, %v7316_v25  ;;  %7350 = vst [vmem:[%s11565_s8 + $0x40] sm:$0xff] %v7338_v24  ;;  %v7341_v52 = vadd.f32 %v7329_v27, %v7317_v49 }
 0xbf8   : > { %7351 = vst [vmem:[%s11565_s8 + $0x48] sm:$0xff] %v7339_v1 }
 0xbf9   : > { %7352 = vst [vmem:[%s11565_s8 + $0x50] sm:$0xff] %v7340_v38  ;;  %7353 = vst [vmem:[%s11565_s8 + $0x58] sm:$0xff] %v7341_v52 }
 0xbfa PF: > { %s18_s27 = sadd.s32 1, %s9596_s27  }
 0xbfb   : > { %p15_p5 = scmp.ge.s32.totalorder %s18_s27, 4  }
 0xbfd   :  { %17 = sbr.rel (!%p15_p5) target bundleno = 1 (0x1), region = 94 }

</bundles_post_ra>
